<compile_context>
chip_gen: v7x
topology: tpu7x:2x2x1
jax: 0.10.0
libtpu: 0.0.40
codegen_flags: <defaults>
</compile_context>

<pallas_src>
import functools

import jax
import jax.numpy as jnp
import numpy as np
from jax.experimental import pallas as pl
from jax.experimental.pallas import tpu as pltpu


def _attention_kernel(h_ref, enc_ref, wht_ref, wet_ref, b_ref, v_ref, out_ref, *, s):
    # h_ref   : (TB, H)     last-layer hidden states for this batch tile (compute_dtype)
    # enc_ref : (TB*S, H)   encoder outputs, (batch, src) rows flattened (compute_dtype)
    # wht_ref : (H, H)      attn.weight[:, :H].T  (hidden half, pre-transposed)
    # wet_ref : (H, H)      attn.weight[:, H:].T  (encoder half, pre-transposed)
    # b_ref   : (1, H)      attn.bias (f32)
    # v_ref   : (1, H)      scoring vector (f32)
    # out_ref : (1, TB*S)   softmax attention weights, flattened lane-dense (f32)
    tb = h_ref.shape[0]
    tbs = enc_ref.shape[0]

    # Linear(2H -> H) over cat([h, enc]) split into two matmuls; weights are
    # pre-transposed in the wrapper so there is no in-kernel transpose.
    # Inputs may be bf16; accumulation is forced to f32.
    hb = jnp.dot(h_ref[...], wht_ref[...],
                 preferred_element_type=jnp.float32) + b_ref[...]            # (TB, H)
    ee = jnp.dot(enc_ref[...], wet_ref[...],
                 preferred_element_type=jnp.float32)                         # (TB*S, H)

    # 0/1 segment map generated in-kernel (~2 vregs of VPU work; removes two
    # HBM inputs + their DMAs): flattened row i belongs to batch element i // s.
    row = jax.lax.broadcasted_iota(jnp.int32, (tbs, tb), 0)
    col = jax.lax.broadcasted_iota(jnp.int32, (tbs, tb), 1)
    lo = col * s
    seg = ((row >= lo) & (row < lo + s)).astype(jnp.float32)                 # (TB*S, TB)

    # Replicate each batch element's hidden contribution across its S rows via
    # a tiny 0/1 matmul on the MXU (avoids a broadcast+reshape relayout).
    h_rows = jnp.dot(seg, hb, preferred_element_type=jnp.float32)            # (TB*S, H)

    # TODO(synk): on v6e/v7x the tanh could run in bf16 (EUP bf16 path) once
    # the big matmul is bf16; kept in f32 to match the PyTorch numerics.
    energy = jnp.tanh(ee + h_rows)                                           # (TB*S, H)

    # scores[i] = <v, energy[i]> : contract the H axes directly (A @ B^T stays
    # on the MXU); no transpose of `energy` is materialized.
    scores = jax.lax.dot_general(
        v_ref[...], energy, (((1,), (1,)), ((), ())),
        preferred_element_type=jnp.float32)                                  # (1, TB*S)

    # Softmax over src_len within each batch segment.  |scores| <= ||v||_1
    # (since |tanh| <= 1), so subtracting the tile-wide max is numerically safe
    # and equivalent to per-segment max subtraction for moderate ||v||_1.
    m = jnp.max(scores, axis=-1, keepdims=True)                              # (1, 1)
    e = jnp.exp(scores - m)                                                  # (1, TB*S)
    seg_sum = jnp.dot(e, seg, preferred_element_type=jnp.float32)            # (1, TB)
    # Exact reciprocal: seg_sum is a single vreg, approx=True saves nothing and
    # injects ~1e-3 relative error (this was the previous correctness failure).
    inv = 1.0 / seg_sum                                                      # (1, TB)
    denom_inv = jax.lax.dot_general(
        inv, seg, (((1,), (1,)), ((), ())),
        preferred_element_type=jnp.float32)                                  # (1, TB*S)
    out_ref[...] = e * denom_inv


def _tpu_generation_params():
    """Return (num_tensorcores_per_program, vmem_tile_budget_bytes)."""
    try:
        dev = jax.devices()[0]
        if dev.platform != "tpu":
            return 1, 14 << 20
        kind = (getattr(dev, "device_kind", "") or "").lower()
        if "v7" in kind:
            return 2, 28 << 20            # 2 TCs/chip, 64 MiB VMEM (32 MiB scoped default)
        if "v6" in kind:
            return 1, 28 << 20            # single TC, 128 MiB VMEM (32 MiB scoped default)
        if "v5e" in kind or "v5 lite" in kind or "v5lite" in kind:
            return 1, 14 << 20            # single TC, 16 MiB scoped default
        if "v5p" in kind or "v5" in kind or "v4" in kind or "v3" in kind:
            return 2, 28 << 20            # megacore: shard 'parallel' axis across 2 cores
        return 1, 14 << 20
    except Exception:                     # e.g. interpret mode on CPU
        return 1, 14 << 20


def _choose_tb(B, S, H, itemsize, num_tensorcores, vmem_tile_budget_bytes):
    """Pick the batch-tile size TB (dtype- and generation-aware).

    TB divides B and either TB == B or (TB % min_sublane == 0 and
    (TB*S) % 128 == 0) so every BlockSpec stays tile-aligned for the compute
    dtype (f32: 8, bf16: 16, int8/fp8: 32 sublanes).  Among valid choices take
    the largest whose double-buffered per-step buffers fit the VMEM budget.
    Only when the chip has >= 2 TensorCores (v7x / megacore) is a >= num_cores
    step count preferred; on single-TC v5e/v6e extra steps just add per-step
    overhead and serial softmax-tail latency.
    """
    min_sub = {4: 8, 2: 16, 1: 32}.get(itemsize, 8)

    def step_bytes(d):
        tbs = d * S
        per = (d * H + tbs * H + 2 * H * H) * itemsize + 2 * H * 4 + tbs * 4
        return 2 * per                    # double-buffered pipeline

    valid = [d for d in range(1, B + 1)
             if B % d == 0 and (d == B or (d % min_sub == 0 and (d * S) % 128 == 0))]
    fitting = [d for d in valid if step_bytes(d) <= vmem_tile_budget_bytes] or [min(valid)]
    tb = max(fitting)
    if num_tensorcores >= 2 and B // tb < num_tensorcores:
        smaller = [d for d in fitting if (B // d) >= num_tensorcores]
        if smaller:
            tb = max(smaller)
    return tb, step_bytes(tb)


def attention_forward(hidden, encoder_outputs, attn_w, attn_b, v,
                      compute_dtype=jnp.bfloat16):
    """Pallas equivalent of Attention.forward.

    hidden          : (num_layers, B, H)
    encoder_outputs : (B, S, H)
    attn_w          : (H, 2H)   nn.Linear(2H, H).weight
    attn_b          : (H,)      nn.Linear(2H, H).bias
    v               : (H,)      scoring parameter
    returns         : (B, S)    softmax attention weights (f32)
    """
    B, S, H = encoder_outputs.shape
    itemsize = jnp.dtype(compute_dtype).itemsize
    num_tc, vmem_budget = _tpu_generation_params()
    tb, per_step_bytes = _choose_tb(B, S, H, itemsize, num_tc, vmem_budget)
    tbs = tb * S

    # Pre-transposed weight halves (done once in the wrapper, not per grid step).
    wht = attn_w[:, :H].T.astype(compute_dtype)     # (H, H) multiplies hidden[-1]
    wet = attn_w[:, H:].T.astype(compute_dtype)     # (H, H) multiplies encoder_outputs
    b2d = attn_b.reshape(1, H).astype(jnp.float32)
    v2d = v.reshape(1, H).astype(jnp.float32)

    h_last = hidden[-1].astype(compute_dtype)                       # (B, H)
    enc_flat = encoder_outputs.reshape(B * S, H).astype(compute_dtype)

    kernel = functools.partial(_attention_kernel, s=S)

    flops = 2 * B * S * H * H + 2 * B * H * H + 2 * B * S * H
    transcendentals = B * S * H + B * S
    bytes_accessed = ((B * S * H + B * H + 2 * H * H) * itemsize
                      + B * S * 4 + 2 * H * 4)
    vmem_limit = int(min(100 << 20, max(20 << 20, per_step_bytes * 3 // 2 + (8 << 20))))

    out_flat = pl.pallas_call(
        kernel,
        out_shape=jax.ShapeDtypeStruct((1, B * S), jnp.float32),
        grid_spec=pltpu.PrefetchScalarGridSpec(
            num_scalar_prefetch=0,
            grid=(B // tb,),
            in_specs=[
                pl.BlockSpec((tb, H), lambda b: (b, 0)),        # hidden[-1] tile
                pl.BlockSpec((tbs, H), lambda b: (b, 0)),       # encoder rows tile
                pl.BlockSpec((H, H), lambda b: (0, 0)),         # Wh^T (shared)
                pl.BlockSpec((H, H), lambda b: (0, 0)),         # We^T (shared)
                pl.BlockSpec((1, H), lambda b: (0, 0)),         # bias
                pl.BlockSpec((1, H), lambda b: (0, 0)),         # v
            ],
            out_specs=pl.BlockSpec((1, tbs), lambda b: (0, b)),  # lane-dense output
        ),
        compiler_params=pltpu.CompilerParams(
            dimension_semantics=("parallel",),
            vmem_limit_bytes=vmem_limit,
        ),
        cost_estimate=pl.CostEstimate(
            flops=flops,
            transcendentals=transcendentals,
            bytes_accessed=bytes_accessed),
    )(h_last, enc_flat, wht, wet, b2d, v2d)
    return out_flat.reshape(B, S)


def _reference(hidden, encoder_outputs, attn_w, attn_b, v):
    # Pure-JAX replica of the PyTorch forward for correctness checking.
    B, S, H = encoder_outputs.shape
    h = jnp.repeat(hidden[-1][:, None, :], S, axis=1)          # (B, S, H)
    cat = jnp.concatenate([h, encoder_outputs], axis=2)        # (B, S, 2H)
    energy = jnp.tanh(cat @ attn_w.T + attn_b)                 # (B, S, H)
    attention = jnp.sum(v * energy, axis=2)                    # (B, S)
    return jax.nn.softmax(attention, axis=1)


if __name__ == "__main__":
    # Small shapes consistent with the module (hidden_dim matches the spec).
    num_layers = 2
    batch = 16
    src_len = 16
    hidden_dim = 512

    key = jax.random.PRNGKey(0)
    k_h, k_enc, k_w, k_b, k_v = jax.random.split(key, 5)

    hidden = jax.random.normal(k_h, (num_layers, batch, hidden_dim), dtype=jnp.float32)
    encoder_outputs = jax.random.normal(k_enc, (batch, src_len, hidden_dim),
                                        dtype=jnp.float32)

    # Deterministic parameter init (shapes follow nn.Linear(2H, H) and nn.Parameter(H)).
    lin_bound = 1.0 / np.sqrt(2 * hidden_dim)
    attn_w = jax.random.uniform(k_w, (hidden_dim, 2 * hidden_dim),
                                minval=-lin_bound, maxval=lin_bound, dtype=jnp.float32)
    attn_b = jax.random.uniform(k_b, (hidden_dim,),
                                minval=-lin_bound, maxval=lin_bound, dtype=jnp.float32)
    v_bound = 1.0 / np.sqrt(hidden_dim)
    v = jax.random.uniform(k_v, (hidden_dim,),
                           minval=-v_bound, maxval=v_bound, dtype=jnp.float32)

    ref = _reference(hidden, encoder_outputs, attn_w, attn_b, v)

    # f32 path: matches the PyTorch module's numerics (exact-reciprocal softmax).
    out_f32 = jax.block_until_ready(
        attention_forward(hidden, encoder_outputs, attn_w, attn_b, v,
                          compute_dtype=jnp.float32))
    np.testing.assert_allclose(np.asarray(out_f32), np.asarray(ref),
                               rtol=3e-3, atol=1e-5)

    # bf16 path (default): halved HBM traffic on the encoder stream + bf16 MXU;
    # accumulation/tanh/softmax stay in f32, so only input rounding differs.
    out_bf16 = jax.block_until_ready(
        attention_forward(hidden, encoder_outputs, attn_w, attn_b, v))
    np.testing.assert_allclose(np.asarray(out_bf16), np.asarray(ref),
                               rtol=3e-2, atol=5e-4)

    print("KERNEL_OK")
</pallas_src>

<mosaic_0001>
module attributes {stable_mosaic.version = 11 : i64} {
  func.func @_attention_kernel(%arg0: i32, %arg1: memref<16x512xf32, #tpu.memory_space<vmem>>, %arg2: memref<256x512xf32, #tpu.memory_space<vmem>>, %arg3: memref<512x512xf32, #tpu.memory_space<vmem>>, %arg4: memref<512x512xf32, #tpu.memory_space<vmem>>, %arg5: memref<1x512xf32, #tpu.memory_space<vmem>>, %arg6: memref<1x512xf32, #tpu.memory_space<vmem>>, %arg7: memref<1x256xf32, #tpu.memory_space<vmem>>) attributes {dimension_semantics = [#tpu.dimension_semantics<parallel>], iteration_bounds = array<i64: 1>, scalar_prefetch = 0 : i64, scratch_operands = 0 : i64, tpu.core_type = #tpu.core_type<tc>, window_params = [{transform_indices = @transform_0, window_bounds = array<i64: 16, 512>}, {transform_indices = @transform_1, window_bounds = array<i64: 256, 512>}, {pipeline_mode = #tpu.pipeline_mode<synchronous>, transform_indices = @transform_2, window_bounds = array<i64: 512, 512>}, {pipeline_mode = #tpu.pipeline_mode<synchronous>, transform_indices = @transform_3, window_bounds = array<i64: 512, 512>}, {pipeline_mode = #tpu.pipeline_mode<synchronous>, transform_indices = @transform_4, window_bounds = array<i64: 1, 512>}, {pipeline_mode = #tpu.pipeline_mode<synchronous>, transform_indices = @transform_5, window_bounds = array<i64: 1, 512>}, {transform_indices = @transform_6, window_bounds = array<i64: 1, 256>}]} {
    %c0 = arith.constant 0 : index
    %c0_0 = arith.constant 0 : index
    %0 = vector.load %arg1[%c0, %c0_0] : memref<16x512xf32, #tpu.memory_space<vmem>>, vector<16x512xf32>
    %c0_1 = arith.constant 0 : index
    %c0_2 = arith.constant 0 : index
    %1 = vector.load %arg3[%c0_1, %c0_2] : memref<512x512xf32, #tpu.memory_space<vmem>>, vector<512x512xf32>
    %cst = arith.constant dense<0.000000e+00> : vector<16x512xf32>
    %2 = tpu.matmul %0, %1, %cst {dimension_numbers = #tpu.dot_dimension_numbers<[1], [0], [0], [1], [0, 0, 1, 1], [], []>} : vector<16x512xf32>, vector<512x512xf32>, vector<16x512xf32> -> vector<16x512xf32>
    %c0_3 = arith.constant 0 : index
    %c0_4 = arith.constant 0 : index
    %3 = vector.load %arg5[%c0_3, %c0_4] : memref<1x512xf32, #tpu.memory_space<vmem>>, vector<1x512xf32>
    %4 = vector.broadcast %3 : vector<1x512xf32> to vector<16x512xf32>
    %5 = arith.addf %2, %4 : vector<16x512xf32>
    %c0_5 = arith.constant 0 : index
    %c0_6 = arith.constant 0 : index
    %6 = vector.load %arg2[%c0_5, %c0_6] : memref<256x512xf32, #tpu.memory_space<vmem>>, vector<256x512xf32>
    %c0_7 = arith.constant 0 : index
    %c0_8 = arith.constant 0 : index
    %7 = vector.load %arg4[%c0_7, %c0_8] : memref<512x512xf32, #tpu.memory_space<vmem>>, vector<512x512xf32>
    %cst_9 = arith.constant dense<0.000000e+00> : vector<256x512xf32>
    %8 = tpu.matmul %6, %7, %cst_9 {dimension_numbers = #tpu.dot_dimension_numbers<[1], [0], [0], [1], [0, 0, 1, 1], [], []>} : vector<256x512xf32>, vector<512x512xf32>, vector<256x512xf32> -> vector<256x512xf32>
    %9 = tpu.iota {dimensions = array<i32: 0>} : vector<256x16xi32>
    %10 = tpu.iota {dimensions = array<i32: 1>} : vector<256x16xi32>
    %c16_i32 = arith.constant 16 : i32
    %11 = vector.broadcast %c16_i32 : i32 to vector<256x16xi32>
    %12 = arith.muli %10, %11 : vector<256x16xi32>
    %13 = arith.cmpi sge, %9, %12 : vector<256x16xi32>
    %c16_i32_10 = arith.constant 16 : i32
    %14 = vector.broadcast %c16_i32_10 : i32 to vector<256x16xi32>
    %15 = arith.addi %12, %14 : vector<256x16xi32>
    %16 = arith.cmpi slt, %9, %15 : vector<256x16xi32>
    %17 = arith.andi %13, %16 : vector<256x16xi1>
    %18 = arith.extui %17 : vector<256x16xi1> to vector<256x16xi32>
    %19 = arith.sitofp %18 : vector<256x16xi32> to vector<256x16xf32>
    %cst_11 = arith.constant dense<0.000000e+00> : vector<256x512xf32>
    %20 = tpu.matmul %19, %5, %cst_11 {dimension_numbers = #tpu.dot_dimension_numbers<[1], [0], [0], [1], [0, 0, 1, 1], [], []>} : vector<256x16xf32>, vector<16x512xf32>, vector<256x512xf32> -> vector<256x512xf32>
    %21 = arith.addf %8, %20 : vector<256x512xf32>
    %22 = math.tanh %21 : vector<256x512xf32>
    %c0_12 = arith.constant 0 : index
    %c0_13 = arith.constant 0 : index
    %23 = vector.load %arg6[%c0_12, %c0_13] : memref<1x512xf32, #tpu.memory_space<vmem>>, vector<1x512xf32>
    %cst_14 = arith.constant dense<0.000000e+00> : vector<1x256xf32>
    %24 = tpu.matmul %23, %22, %cst_14 {dimension_numbers = #tpu.dot_dimension_numbers<[1], [1], [0], [0], [0, 0, 1, 0], [], []>} : vector<1x512xf32>, vector<256x512xf32>, vector<1x256xf32> -> vector<1x256xf32>
    %cst_15 = arith.constant dense<0xFF800000> : vector<1xf32>
    %25 = vector.multi_reduction <maximumf>, %24, %cst_15 [1] : vector<1x256xf32> to vector<1xf32>
    %26 = vector.shape_cast %25 : vector<1xf32> to vector<1x1xf32>
    %27 = vector.broadcast %26 : vector<1x1xf32> to vector<1x256xf32>
    %28 = arith.subf %24, %27 : vector<1x256xf32>
    %29 = math.exp %28 : vector<1x256xf32>
    %cst_16 = arith.constant dense<0.000000e+00> : vector<1x16xf32>
    %30 = tpu.matmul %29, %19, %cst_16 {dimension_numbers = #tpu.dot_dimension_numbers<[1], [0], [0], [1], [0, 0, 1, 1], [], []>} : vector<1x256xf32>, vector<256x16xf32>, vector<1x16xf32> -> vector<1x16xf32>
    %cst_17 = arith.constant 1.000000e+00 : f32
    %31 = vector.broadcast %cst_17 : f32 to vector<1x16xf32>
    %32 = arith.divf %31, %30 : vector<1x16xf32>
    %cst_18 = arith.constant dense<0.000000e+00> : vector<1x256xf32>
    %33 = tpu.matmul %32, %19, %cst_18 {dimension_numbers = #tpu.dot_dimension_numbers<[1], [1], [0], [0], [0, 0, 1, 0], [], []>} : vector<1x16xf32>, vector<256x16xf32>, vector<1x256xf32> -> vector<1x256xf32>
    %34 = arith.mulf %29, %33 : vector<1x256xf32>
    %c0_19 = arith.constant 0 : index
    %c0_20 = arith.constant 0 : index
    %35 = vector.load %arg7[%c0_19, %c0_20] : memref<1x256xf32, #tpu.memory_space<vmem>>, vector<1x256xf32>
    tpu.vector_store %arg7[%c0_19, %c0_20], %34 {strides = array<i32>} : memref<1x256xf32, #tpu.memory_space<vmem>>, vector<1x256xf32>,
    return
  }
  func.func @transform_0(%arg0: i32) -> (i32, i32) {
    %c0_i32 = arith.constant 0 : i32
    %c0_i32_0 = arith.constant 0 : i32
    return %arg0, %c0_i32 : i32, i32
  }
  func.func @transform_1(%arg0: i32) -> (i32, i32) {
    %c0_i32 = arith.constant 0 : i32
    %c0_i32_0 = arith.constant 0 : i32
    return %arg0, %c0_i32 : i32, i32
  }
  func.func @transform_2(%arg0: i32) -> (i32, i32) {
    %c0_i32 = arith.constant 0 : i32
    %c0_i32_0 = arith.constant 0 : i32
    %c0_i32_1 = arith.constant 0 : i32
    return %c0_i32, %c0_i32_0 : i32, i32
  }
  func.func @transform_3(%arg0: i32) -> (i32, i32) {
    %c0_i32 = arith.constant 0 : i32
    %c0_i32_0 = arith.constant 0 : i32
    %c0_i32_1 = arith.constant 0 : i32
    return %c0_i32, %c0_i32_0 : i32, i32
  }
  func.func @transform_4(%arg0: i32) -> (i32, i32) {
    %c0_i32 = arith.constant 0 : i32
    %c0_i32_0 = arith.constant 0 : i32
    %c0_i32_1 = arith.constant 0 : i32
    return %c0_i32, %c0_i32_0 : i32, i32
  }
  func.func @transform_5(%arg0: i32) -> (i32, i32) {
    %c0_i32 = arith.constant 0 : i32
    %c0_i32_0 = arith.constant 0 : i32
    %c0_i32_1 = arith.constant 0 : i32
    return %c0_i32, %c0_i32_0 : i32, i32
  }
  func.func @transform_6(%arg0: i32) -> (i32, i32) {
    %c0_i32 = arith.constant 0 : i32
    %c0_i32_0 = arith.constant 0 : i32
    return %c0_i32, %arg0 : i32, i32
  }
}

</mosaic_0001>

<bundles_post_ra>
// kernel: tpu_custom_call.1
= control target key start
LH: loop header
LB: loop body
LE: loop exit
PB: predicated region body
PF: predicated region fallthrough
CT: control target
= control target key end

     0   :  { %11 = vsyncpa [#allocation3], 0  ;;  %s6679_s0 = inlined_call_operand.hbm [shape: f32[16,512], index: 0, kind: input, shape index: {}]   ;;  %s6680_s1 = inlined_call_operand.hbm [shape: f32[256,512], index: 1, kind: input, shape index: {}]   ;;  %s6681_s2 = inlined_call_operand.hbm [shape: f32[512,512], index: 2, kind: input, shape index: {}]   ;;  %s6682_s3 = inlined_call_operand.hbm [shape: f32[512,512], index: 3, kind: input, shape index: {}]   ;;  %s6683_s4 = inlined_call_operand.vmem [shape: f32[1,512], index: 4, kind: input, shape index: {}]   ;;  %s6684_s5 = inlined_call_operand.vmem [shape: f32[1,512], index: 5, kind: input, shape index: {}]   ;;  %s6685_s6 = inlined_call_operand.hbm [shape: f32[1,256], index: 6, kind: output, shape index: {}]  }
   0x1   :  { %12 = vsyncpa [#allocation6], 0 }
   0x2   :  { %13 = vsyncpa [#allocation9], 0 }
   0x3   :  { %14 = vsyncpa [#allocation4], 0  ;;  %s5009_s21 = smov [#allocation5]   ;;  %s5010_s23 = smov [#allocation2]  }
   0x4   :  { %s32_s22 = sshll.u32 %s5009_s21, 4  ;;  %s20_s24 = sshll.u32 %s5010_s23, 4  ;;  %s33_s22 = int_to_ptr.vmem [resolvable:$true] %s32_s22  ;;  %s5054_s24 = int_to_ptr.vmem [resolvable:$true] %s20_s24 }
   0x5   :  { %s4891_s27 = scalar_lea.hbm %s6680_s1, 16384 }
   0x6   :  { %p4892_p0 = scmp.ne.s32.totalorder %s6680_s1, %s4891_s27  ;;  %p4895_p1 = scmp.lt.u32.totalorder %s4891_s27, %s6680_s1 }
   0x8   :  { %p4897_p2 = pnand %p4895_p1, %p4892_p0 }
   0xa   :  { %4900 = shalt.err (!%p4897_p2)
}
   0xb   :  { %s4901_s8 = scalar_lea.vmem %s33_s22, 16384  ;;  %p4906_p4 = scmp.lt.s32.totalorder %s33_s22, %s33_s22 }
   0xc   :  { %p4902_p3 = scmp.ne.s32.totalorder %s33_s22, %s4901_s8  ;;  %p4907_p5 = scmp.lt.s32.totalorder %s4901_s8, %s4901_s8 }
   0xe   :  { %p4908_p6 = por %p4907_p5, %p4906_p4 }
  0x10   :  { %p4909_p7 = pnand %p4908_p6, %p4902_p3 }
  0x12   :  { %4912 = shalt.err (!%p4909_p7)
}
  0x13   :  { %s5011_s9 = smov 512   ;;  %s5012_s10 = smov 32  }
  0x14   :  { %38 = dma.hbm_to_vmem [thread:$0]  %s6680_s1, 16384, %s33_s22, [#allocation6], %s5011_s9, %s5011_s9, %s5012_s10  }
  0x15   :  { %s4913_s15 = scalar_lea.hbm %s6679_s0, 1024 }
  0x16   :  { %p4914_p8 = scmp.ne.s32.totalorder %s6679_s0, %s4913_s15  ;;  %p4917_p9 = scmp.lt.u32.totalorder %s4913_s15, %s6679_s0 }
  0x18   :  { %p4919_p10 = pnand %p4917_p9, %p4914_p8 }
  0x1a   :  { %4922 = shalt.err (!%p4919_p10)
}
  0x1b   :  { %s4923_s20 = scalar_lea.vmem %s5054_s24, 1024  ;;  %p4928_p12 = scmp.lt.s32.totalorder %s5054_s24, %s5054_s24 }
  0x1c   :  { %p4924_p11 = scmp.ne.s32.totalorder %s5054_s24, %s4923_s20  ;;  %p4929_p13 = scmp.lt.s32.totalorder %s4923_s20, %s4923_s20 }
  0x1e   :  { %p4930_p0 = por %p4929_p13, %p4928_p12 }
  0x20   :  { %p4931_p1 = pnand %p4930_p0, %p4924_p11 }
  0x22   :  { %4934 = shalt.err (!%p4931_p1)
}
  0x23   :  { %26 = dma.hbm_to_vmem [thread:$0]  %s6679_s0, 1024, %s5054_s24, [#allocation3], %s5011_s9, %s5011_s9, %s5012_s10  }
  0x24   :  { %s5013_s22 = smov [#allocation7]   ;;  %s5014_s25 = smov [#allocation8]  }
  0x25   :  { %s44_s23 = sshll.u32 %s5013_s22, 4  ;;  %s56_s26 = sshll.u32 %s5014_s25, 4  ;;  %s45_s23 = int_to_ptr.vmem [resolvable:$true] %s44_s23  ;;  %s5091_s26 = int_to_ptr.vmem [resolvable:$true] %s56_s26 }
  0x26   :  { %s4935_s29 = scalar_lea.hbm %s6681_s2, 32768 }
  0x27   :  { %p4936_p2 = scmp.ne.s32.totalorder %s6681_s2, %s4935_s29  ;;  %p4939_p3 = scmp.lt.u32.totalorder %s4935_s29, %s6681_s2 }
  0x29   :  { %p4941_p4 = pnand %p4939_p3, %p4936_p2 }
  0x2b   :  { %4944 = shalt.err (!%p4941_p4)
}
  0x2c   :  { %s4945_s0 = scalar_lea.vmem %s45_s23, 32768  ;;  %p4950_p6 = scmp.lt.s32.totalorder %s45_s23, %s45_s23 }
  0x2d   :  { %p4946_p5 = scmp.ne.s32.totalorder %s45_s23, %s4945_s0  ;;  %p4951_p7 = scmp.lt.s32.totalorder %s4945_s0, %s4945_s0 }
  0x2f   :  { %p4952_p8 = por %p4951_p7, %p4950_p6 }
  0x31   :  { %p4953_p9 = pnand %p4952_p8, %p4946_p5 }
  0x33   :  { %4956 = shalt.err (!%p4953_p9)
}
  0x34   :  { %50 = dma.hbm_to_vmem [thread:$0]  %s6681_s2, 32768, %s45_s23, [#allocation6], %s5011_s9, %s5011_s9, %s5012_s10  }
  0x35   :  { %s4957_s15 = scalar_lea.hbm %s6682_s3, 32768 }
  0x36   :  { %p4958_p10 = scmp.ne.s32.totalorder %s6682_s3, %s4957_s15  ;;  %p4961_p11 = scmp.lt.u32.totalorder %s4957_s15, %s6682_s3 }
  0x38   :  { %p4963_p12 = pnand %p4961_p11, %p4958_p10 }
  0x3a   :  { %4966 = shalt.err (!%p4963_p12)
}
  0x3b   :  { %s4967_s20 = scalar_lea.vmem %s5091_s26, 32768  ;;  %p4972_p0 = scmp.lt.s32.totalorder %s5091_s26, %s5091_s26 }
  0x3c   :  { %p4968_p13 = scmp.ne.s32.totalorder %s5091_s26, %s4967_s20  ;;  %p4973_p1 = scmp.lt.s32.totalorder %s4967_s20, %s4967_s20 }
  0x3e   :  { %p4974_p2 = por %p4973_p1, %p4972_p0 }
  0x40   :  { %p4975_p3 = pnand %p4974_p2, %p4968_p13 }
  0x42   :  { %4978 = shalt.err (!%p4975_p3)
}
  0x43   :  { %62 = dma.hbm_to_vmem [thread:$0]  %s6682_s3, 32768, %s5091_s26, [#allocation9], %s5011_s9, %s5011_s9, %s5012_s10  }
  0x44   :  { %5001 = dma.done.wait [#allocation3], 1024  }
  0x45   :  { %5002 = vsyncadd [#allocation3], 4294966272 }
  0x46   :  { %5003 = dma.done.wait [#allocation6], 49152  }
  0x47   :  { %5004 = vsyncadd [#allocation6], 4294918144 }
  0x48   :  { %5005 = dma.done.wait [#allocation9], 32768  }
  0x49   :  { %5006 = vsyncadd [#allocation9], 4294934528  ;;  %v88_v0 = vld [vmem:[#allocation7 + $0x8] sm:$0xff]  ;;  %v87_v2 = vld [vmem:[#allocation7] sm:$0xff] }
  0x4a   :  { %v92_v1 = vld [vmem:[#allocation7 + $0x28] sm:$0xff]  ;;  %v91_v4 = vld [vmem:[#allocation7 + $0x20] sm:$0xff]  ;;  %v90_v11 = vld [vmem:[#allocation7 + $0x18] sm:$0xff] }
  0x4b   :  { %v3615_v3 = vpack.c.bf16 %v92_v1, %v88_v0  ;;  %v96_v5 = vld [vmem:[#allocation7 + $0x48] sm:$0xff]  ;;  %v3617_v7 = vpack.c.bf16 %v91_v4, %v87_v2  ;;  %v95_v9 = vld [vmem:[#allocation7 + $0x40] sm:$0xff]  ;;  %v94_v12 = vld [vmem:[#allocation7 + $0x38] sm:$0xff] }
  0x4c   :  { %v100_v6 = vld [vmem:[#allocation7 + $0x68] sm:$0xff]  ;;  %v99_v10 = vld [vmem:[#allocation7 + $0x60] sm:$0xff]  ;;  %v89_v13 = vld [vmem:[#allocation7 + $0x10] sm:$0xff]  ;;  %v3743_v16 = vpack.c.bf16 %v94_v12, %v90_v11 }
  0x4d   :  { %v3619_v8 = vpack.c.bf16 %v100_v6, %v96_v5  ;;  %3616 = vmatprep.subr.bf16.mxu0 %v3615_v3  ;;  %v93_v14 = vld [vmem:[#allocation7 + $0x30] sm:$0xff]  ;;  %v3621_v15 = vpack.c.bf16 %v99_v10, %v95_v9  ;;  %v104_v18 = vld [vmem:[#allocation7 + $0x88] sm:$0xff]  ;;  %v103_v20 = vld [vmem:[#allocation7 + $0x80] sm:$0xff] }
  0x4e   :  { %3618 = vmatpush1.bf16.msra.mxu0 %v3617_v7  ;;  %v3745_v17 = vpack.c.bf16 %v93_v14, %v89_v13  ;;  %v108_v19 = vld [vmem:[#allocation7 + $0xa8] sm:$0xff]  ;;  %v107_v22 = vld [vmem:[#allocation7 + $0xa0] sm:$0xff]  ;;  %v98_v23 = vld [vmem:[#allocation7 + $0x58] sm:$0xff]  ;;  %3744 = vmatprep.subr.bf16.mxu1 %v3743_v16 }
  0x4f   :  { %3620 = vmatprep.subr.bf16.mxu0 %v3619_v8  ;;  %v3623_v21 = vpack.c.bf16 %v108_v19, %v104_v18  ;;  %v102_v24 = vld [vmem:[#allocation7 + $0x78] sm:$0xff]  ;;  %v97_v26 = vld [vmem:[#allocation7 + $0x50] sm:$0xff]  ;;  %v112_v28 = vld [vmem:[#allocation7 + $0xc8] sm:$0xff]  ;;  %v3625_v31 = vpack.c.bf16 %v107_v22, %v103_v20 }
  0x50   :  { %v3747_v25 = vpack.c.bf16 %v102_v24, %v98_v23  ;;  %v101_v27 = vld [vmem:[#allocation7 + $0x70] sm:$0xff]  ;;  %3746 = vmatpush1.bf16.msra.mxu1 %v3745_v17  ;;  %v116_v30 = vld [vmem:[#allocation7 + $0xe8] sm:$0xff]  ;;  %v106_v32 = vld [vmem:[#allocation7 + $0x98] sm:$0xff] }
  0x51   :  { %v3749_v29 = vpack.c.bf16 %v101_v27, %v97_v26  ;;  %v110_v33 = vld [vmem:[#allocation7 + $0xb8] sm:$0xff]  ;;  %v105_v34 = vld [vmem:[#allocation7 + $0x90] sm:$0xff]  ;;  %v3627_v35 = vpack.c.bf16 %v116_v30, %v112_v28  ;;  %v111_v36 = vld [vmem:[#allocation7 + $0xc0] sm:$0xff] }
  0x52   :  { %3622 = vmatpush1.bf16.msra.mxu0 %v3621_v15  ;;  %3748 = vmatprep.subr.bf16.mxu1 %v3747_v25  ;;  %v115_v37 = vld [vmem:[#allocation7 + $0xe0] sm:$0xff]  ;;  %v3751_v38 = vpack.c.bf16 %v110_v33, %v106_v32  ;;  %v109_v39 = vld [vmem:[#allocation7 + $0xb0] sm:$0xff]  ;;  %v120_v40 = vld [vmem:[#allocation7 + $0x108] sm:$0xff] }
  0x53   :  { %3624 = vmatprep.subr.bf16.mxu0 %v3623_v21  ;;  %v124_v41 = vld [vmem:[#allocation7 + $0x128] sm:$0xff]  ;;  %v114_v42 = vld [vmem:[#allocation7 + $0xd8] sm:$0xff]  ;;  %v3753_v43 = vpack.c.bf16 %v109_v39, %v105_v34  ;;  %v3629_v45 = vpack.c.bf16 %v115_v37, %v111_v36  ;;  %v119_v46 = vld [vmem:[#allocation7 + $0x100] sm:$0xff] }
  0x54   :  { %3750 = vmatpush1.bf16.msra.mxu1 %v3749_v29  ;;  %v118_v44 = vld [vmem:[#allocation7 + $0xf8] sm:$0xff]  ;;  %v113_v48 = vld [vmem:[#allocation7 + $0xd0] sm:$0xff]  ;;  %v3631_v50 = vpack.c.bf16 %v124_v41, %v120_v40  ;;  %v123_v51 = vld [vmem:[#allocation7 + $0x120] sm:$0xff] }
  0x55   :  { %3752 = vmatprep.subr.bf16.mxu1 %v3751_v38  ;;  %v3755_v47 = vpack.c.bf16 %v118_v44, %v114_v42  ;;  %v117_v49 = vld [vmem:[#allocation7 + $0xf0] sm:$0xff]  ;;  %v122_v52 = vld [vmem:[#allocation7 + $0x118] sm:$0xff]  ;;  %v128_v54 = vld [vmem:[#allocation7 + $0x148] sm:$0xff]  ;;  %v3633_v57 = vpack.c.bf16 %v123_v51, %v119_v46 }
  0x56   :  { %3626 = vmatpush1.bf16.msra.mxu0 %v3625_v31  ;;  %v126_v53 = vld [vmem:[#allocation7 + $0x138] sm:$0xff]  ;;  %v132_v55 = vld [vmem:[#allocation7 + $0x168] sm:$0xff]  ;;  %v3757_v56 = vpack.c.bf16 %v117_v49, %v113_v48  ;;  %v127_v58 = vld [vmem:[#allocation7 + $0x140] sm:$0xff] }
  0x57   :  { %3628 = vmatprep.subr.bf16.mxu0 %v3627_v35  ;;  %v3759_v59 = vpack.c.bf16 %v126_v53, %v122_v52  ;;  %v121_v60 = vld [vmem:[#allocation7 + $0x110] sm:$0xff]  ;;  %v3635_v62 = vpack.c.bf16 %v132_v55, %v128_v54  ;;  %v131_v63 = vld [vmem:[#allocation7 + $0x160] sm:$0xff]  ;;  %v130_v0 = vld [vmem:[#allocation7 + $0x158] sm:$0xff] }
  0x58   :  { %3754 = vmatpush1.bf16.msra.mxu1 %v3753_v43  ;;  %v125_v61 = vld [vmem:[#allocation7 + $0x130] sm:$0xff]  ;;  %v134_v1 = vld [vmem:[#allocation7 + $0x178] sm:$0xff]  ;;  %v136_v2 = vld [vmem:[#allocation7 + $0x188] sm:$0xff]  ;;  %v3637_v5 = vpack.c.bf16 %v131_v63, %v127_v58 }
  0x59   :  { %3756 = vmatprep.subr.bf16.mxu1 %v3755_v47  ;;  %v140_v3 = vld [vmem:[#allocation7 + $0x1a8] sm:$0xff]  ;;  %v3761_v4 = vpack.c.bf16 %v125_v61, %v121_v60  ;;  %v135_v6 = vld [vmem:[#allocation7 + $0x180] sm:$0xff]  ;;  %v3763_v7 = vpack.c.bf16 %v134_v1, %v130_v0  ;;  %v129_v8 = vld [vmem:[#allocation7 + $0x150] sm:$0xff] }
  0x5a   :  { %3630 = vmatpush1.bf16.msra.mxu0 %v3629_v45  ;;  %v133_v9 = vld [vmem:[#allocation7 + $0x170] sm:$0xff]  ;;  %v3639_v10 = vpack.c.bf16 %v140_v3, %v136_v2  ;;  %v139_v11 = vld [vmem:[#allocation7 + $0x1a0] sm:$0xff]  ;;  %v138_v12 = vld [vmem:[#allocation7 + $0x198] sm:$0xff] }
  0x5b   :  { %3632 = vmatprep.subr.bf16.mxu0 %v3631_v50  ;;  %v142_v13 = vld [vmem:[#allocation7 + $0x1b8] sm:$0xff]  ;;  %v144_v14 = vld [vmem:[#allocation7 + $0x1c8] sm:$0xff]  ;;  %v3765_v16 = vpack.c.bf16 %v133_v9, %v129_v8  ;;  %v3641_v17 = vpack.c.bf16 %v139_v11, %v135_v6  ;;  %v143_v18 = vld [vmem:[#allocation7 + $0x1c0] sm:$0xff] }
  0x5c   :  { %3758 = vmatpush1.bf16.msra.mxu1 %v3757_v56  ;;  %v148_v15 = vld [vmem:[#allocation7 + $0x1e8] sm:$0xff]  ;;  %v3767_v19 = vpack.c.bf16 %v142_v13, %v138_v12  ;;  %v137_v20 = vld [vmem:[#allocation7 + $0x190] sm:$0xff]  ;;  %v147_v23 = vld [vmem:[#allocation7 + $0x1e0] sm:$0xff] }
  0x5d   :  { %3760 = vmatprep.subr.bf16.mxu1 %v3759_v59  ;;  %v141_v21 = vld [vmem:[#allocation7 + $0x1b0] sm:$0xff]  ;;  %v3643_v22 = vpack.c.bf16 %v148_v15, %v144_v14  ;;  %v146_v24 = vld [vmem:[#allocation7 + $0x1d8] sm:$0xff]  ;;  %v152_v26 = vld [vmem:[#allocation7 + $0x208] sm:$0xff]  ;;  %v3645_v29 = vpack.c.bf16 %v147_v23, %v143_v18 }
  0x5e   :  { %3634 = vmatpush1.bf16.msra.mxu0 %v3633_v57  ;;  %v150_v25 = vld [vmem:[#allocation7 + $0x1f8] sm:$0xff]  ;;  %v156_v27 = vld [vmem:[#allocation7 + $0x228] sm:$0xff]  ;;  %v3769_v28 = vpack.c.bf16 %v141_v21, %v137_v20  ;;  %v151_v30 = vld [vmem:[#allocation7 + $0x200] sm:$0xff] }
  0x5f   :  { %3636 = vmatprep.subr.bf16.mxu0 %v3635_v62  ;;  %v3771_v31 = vpack.c.bf16 %v150_v25, %v146_v24  ;;  %v145_v32 = vld [vmem:[#allocation7 + $0x1d0] sm:$0xff]  ;;  %v3647_v34 = vpack.c.bf16 %v156_v27, %v152_v26  ;;  %v155_v35 = vld [vmem:[#allocation7 + $0x220] sm:$0xff]  ;;  %v154_v36 = vld [vmem:[#allocation7 + $0x218] sm:$0xff] }
  0x60   :  { %3762 = vmatpush1.bf16.msra.mxu1 %v3761_v4  ;;  %v149_v33 = vld [vmem:[#allocation7 + $0x1f0] sm:$0xff]  ;;  %v158_v37 = vld [vmem:[#allocation7 + $0x238] sm:$0xff]  ;;  %v160_v38 = vld [vmem:[#allocation7 + $0x248] sm:$0xff]  ;;  %v3649_v41 = vpack.c.bf16 %v155_v35, %v151_v30 }
  0x61   :  { %3764 = vmatprep.subr.bf16.mxu1 %v3763_v7  ;;  %v164_v39 = vld [vmem:[#allocation7 + $0x268] sm:$0xff]  ;;  %v3773_v40 = vpack.c.bf16 %v149_v33, %v145_v32  ;;  %v159_v42 = vld [vmem:[#allocation7 + $0x240] sm:$0xff]  ;;  %v3775_v43 = vpack.c.bf16 %v158_v37, %v154_v36  ;;  %v153_v44 = vld [vmem:[#allocation7 + $0x210] sm:$0xff] }
  0x62   :  { %3638 = vmatpush1.bf16.msra.mxu0 %v3637_v5  ;;  %v157_v45 = vld [vmem:[#allocation7 + $0x230] sm:$0xff]  ;;  %v3651_v46 = vpack.c.bf16 %v164_v39, %v160_v38  ;;  %v163_v47 = vld [vmem:[#allocation7 + $0x260] sm:$0xff]  ;;  %v162_v48 = vld [vmem:[#allocation7 + $0x258] sm:$0xff] }
  0x63   :  { %3640 = vmatprep.subr.bf16.mxu0 %v3639_v10  ;;  %v166_v49 = vld [vmem:[#allocation7 + $0x278] sm:$0xff]  ;;  %v168_v50 = vld [vmem:[#allocation7 + $0x288] sm:$0xff]  ;;  %v3777_v52 = vpack.c.bf16 %v157_v45, %v153_v44  ;;  %v3653_v53 = vpack.c.bf16 %v163_v47, %v159_v42  ;;  %v167_v54 = vld [vmem:[#allocation7 + $0x280] sm:$0xff] }
  0x64   :  { %3766 = vmatpush1.bf16.msra.mxu1 %v3765_v16  ;;  %v172_v51 = vld [vmem:[#allocation7 + $0x2a8] sm:$0xff]  ;;  %v3779_v55 = vpack.c.bf16 %v166_v49, %v162_v48  ;;  %v161_v56 = vld [vmem:[#allocation7 + $0x250] sm:$0xff]  ;;  %v171_v59 = vld [vmem:[#allocation7 + $0x2a0] sm:$0xff] }
  0x65   :  { %3768 = vmatprep.subr.bf16.mxu1 %v3767_v19  ;;  %v165_v57 = vld [vmem:[#allocation7 + $0x270] sm:$0xff]  ;;  %v3655_v58 = vpack.c.bf16 %v172_v51, %v168_v50  ;;  %v170_v60 = vld [vmem:[#allocation7 + $0x298] sm:$0xff]  ;;  %v176_v62 = vld [vmem:[#allocation7 + $0x2c8] sm:$0xff]  ;;  %v3657_v2 = vpack.c.bf16 %v171_v59, %v167_v54 }
  0x66   :  { %3642 = vmatpush1.bf16.msra.mxu0 %v3641_v17  ;;  %v174_v61 = vld [vmem:[#allocation7 + $0x2b8] sm:$0xff]  ;;  %v180_v63 = vld [vmem:[#allocation7 + $0x2e8] sm:$0xff]  ;;  %v3781_v0 = vpack.c.bf16 %v165_v57, %v161_v56  ;;  %v175_v1 = vld [vmem:[#allocation7 + $0x2c0] sm:$0xff] }
  0x67   :  { %3644 = vmatprep.subr.bf16.mxu0 %v3643_v22  ;;  %v179_v3 = vld [vmem:[#allocation7 + $0x2e0] sm:$0xff]  ;;  %v3783_v4 = vpack.c.bf16 %v174_v61, %v170_v60  ;;  %v169_v5 = vld [vmem:[#allocation7 + $0x290] sm:$0xff]  ;;  %v3659_v7 = vpack.c.bf16 %v180_v63, %v176_v62  ;;  %v178_v8 = vld [vmem:[#allocation7 + $0x2d8] sm:$0xff] }
  0x68   :  { %3770 = vmatpush1.bf16.msra.mxu1 %v3769_v28  ;;  %v173_v6 = vld [vmem:[#allocation7 + $0x2b0] sm:$0xff]  ;;  %v182_v9 = vld [vmem:[#allocation7 + $0x2f8] sm:$0xff]  ;;  %v80_v10 = vld [vmem:[#allocation2 + $0x8] sm:$0xff]  ;;  %v3661_v14 = vpack.c.bf16 %v179_v3, %v175_v1 }
  0x69   :  { %3772 = vmatprep.subr.bf16.mxu1 %v3771_v31  ;;  %v184_v11 = vld [vmem:[#allocation7 + $0x308] sm:$0xff]  ;;  %429 = vmatprep.mubr.f32.mxu0 %v80_v10  ;;  %v3785_v13 = vpack.c.bf16 %v173_v6, %v169_v5  ;;  %v183_v15 = vld [vmem:[#allocation7 + $0x300] sm:$0xff]  ;;  %v3787_v16 = vpack.c.bf16 %v182_v9, %v178_v8  ;;  %v177_v17 = vld [vmem:[#allocation7 + $0x2d0] sm:$0xff] }
  0x6a   :  { %3646 = vmatpush1.bf16.msra.mxu0 %v3645_v29  ;;  %v188_v12 = vld [vmem:[#allocation7 + $0x328] sm:$0xff]  ;;  %583 = vmatprep.mubr.f32.mxu1 %v80_v10  ;;  %v181_v18 = vld [vmem:[#allocation7 + $0x2f0] sm:$0xff]  ;;  %v187_v20 = vld [vmem:[#allocation7 + $0x320] sm:$0xff] }
  0x6b   :  { %3648 = vmatprep.subr.bf16.mxu0 %v3647_v34  ;;  %v3663_v19 = vpack.c.bf16 %v188_v12, %v184_v11  ;;  %v186_v21 = vld [vmem:[#allocation7 + $0x318] sm:$0xff]  ;;  %v192_v23 = vld [vmem:[#allocation7 + $0x348] sm:$0xff]  ;;  %v3789_v25 = vpack.c.bf16 %v181_v18, %v177_v17  ;;  %v3665_v26 = vpack.c.bf16 %v187_v20, %v183_v15  ;;  %v191_v27 = vld [vmem:[#allocation7 + $0x340] sm:$0xff] }
  0x6c   :  { %3774 = vmatpush1.bf16.msra.mxu1 %v3773_v40  ;;  %v190_v22 = vld [vmem:[#allocation7 + $0x338] sm:$0xff]  ;;  %v196_v24 = vld [vmem:[#allocation7 + $0x368] sm:$0xff]  ;;  %v185_v29 = vld [vmem:[#allocation7 + $0x310] sm:$0xff] }
  0x6d   :  { %3776 = vmatprep.subr.bf16.mxu1 %v3775_v43  ;;  %v3791_v28 = vpack.c.bf16 %v190_v22, %v186_v21  ;;  %v189_v30 = vld [vmem:[#allocation7 + $0x330] sm:$0xff]  ;;  %v3667_v31 = vpack.c.bf16 %v196_v24, %v192_v23  ;;  %v195_v32 = vld [vmem:[#allocation7 + $0x360] sm:$0xff]  ;;  %v194_v33 = vld [vmem:[#allocation7 + $0x358] sm:$0xff] }
  0x6e   :  { %3650 = vmatpush1.bf16.msra.mxu0 %v3649_v41  ;;  %v198_v34 = vld [vmem:[#allocation7 + $0x378] sm:$0xff]  ;;  %v200_v35 = vld [vmem:[#allocation7 + $0x388] sm:$0xff]  ;;  %v3793_v37 = vpack.c.bf16 %v189_v30, %v185_v29  ;;  %v3669_v38 = vpack.c.bf16 %v195_v32, %v191_v27  ;;  %v199_v39 = vld [vmem:[#allocation7 + $0x380] sm:$0xff] }
  0x6f   :  { %3652 = vmatprep.subr.bf16.mxu0 %v3651_v46  ;;  %v204_v36 = vld [vmem:[#allocation7 + $0x3a8] sm:$0xff]  ;;  %v3795_v40 = vpack.c.bf16 %v198_v34, %v194_v33  ;;  %v193_v41 = vld [vmem:[#allocation7 + $0x350] sm:$0xff]  ;;  %v203_v44 = vld [vmem:[#allocation7 + $0x3a0] sm:$0xff] }
  0x70   :  { %3778 = vmatpush1.bf16.msra.mxu1 %v3777_v52  ;;  %v197_v42 = vld [vmem:[#allocation7 + $0x370] sm:$0xff]  ;;  %v3671_v43 = vpack.c.bf16 %v204_v36, %v200_v35  ;;  %v202_v45 = vld [vmem:[#allocation7 + $0x398] sm:$0xff]  ;;  %v208_v47 = vld [vmem:[#allocation7 + $0x3c8] sm:$0xff]  ;;  %v3673_v50 = vpack.c.bf16 %v203_v44, %v199_v39 }
  0x71   :  { %3780 = vmatprep.subr.bf16.mxu1 %v3779_v55  ;;  %v206_v46 = vld [vmem:[#allocation7 + $0x3b8] sm:$0xff]  ;;  %v212_v48 = vld [vmem:[#allocation7 + $0x3e8] sm:$0xff]  ;;  %v3797_v49 = vpack.c.bf16 %v197_v42, %v193_v41  ;;  %v207_v51 = vld [vmem:[#allocation7 + $0x3c0] sm:$0xff] }
  0x72   :  { %3654 = vmatpush1.bf16.msra.mxu0 %v3653_v53  ;;  %v3799_v52 = vpack.c.bf16 %v206_v46, %v202_v45  ;;  %v201_v53 = vld [vmem:[#allocation7 + $0x390] sm:$0xff]  ;;  %v3675_v55 = vpack.c.bf16 %v212_v48, %v208_v47  ;;  %v211_v56 = vld [vmem:[#allocation7 + $0x3e0] sm:$0xff]  ;;  %v210_v57 = vld [vmem:[#allocation7 + $0x3d8] sm:$0xff] }
  0x73   :  { %3656 = vmatprep.subr.bf16.mxu0 %v3655_v58  ;;  %v205_v54 = vld [vmem:[#allocation7 + $0x3b0] sm:$0xff]  ;;  %v214_v58 = vld [vmem:[#allocation7 + $0x3f8] sm:$0xff]  ;;  %v216_v59 = vld [vmem:[#allocation7 + $0x408] sm:$0xff]  ;;  %v3677_v62 = vpack.c.bf16 %v211_v56, %v207_v51 }
  0x74   :  { %3782 = vmatpush1.bf16.msra.mxu1 %v3781_v0  ;;  %v220_v60 = vld [vmem:[#allocation7 + $0x428] sm:$0xff]  ;;  %v3801_v61 = vpack.c.bf16 %v205_v54, %v201_v53  ;;  %v215_v63 = vld [vmem:[#allocation7 + $0x400] sm:$0xff]  ;;  %v3803_v0 = vpack.c.bf16 %v214_v58, %v210_v57  ;;  %v209_v1 = vld [vmem:[#allocation7 + $0x3d0] sm:$0xff] }
  0x75   :  { %3784 = vmatprep.subr.bf16.mxu1 %v3783_v4  ;;  %v3679_v3 = vpack.c.bf16 %v220_v60, %v216_v59  ;;  %v219_v4 = vld [vmem:[#allocation7 + $0x420] sm:$0xff]  ;;  %v218_v5 = vld [vmem:[#allocation7 + $0x418] sm:$0xff]  ;;  %v228_v8 = vld [vmem:[#allocation7 + $0x468] sm:$0xff] }
  0x76   :  { %3658 = vmatpush1.bf16.msra.mxu0 %v3657_v2  ;;  %v213_v2 = vld [vmem:[#allocation7 + $0x3f0] sm:$0xff]  ;;  %v222_v6 = vld [vmem:[#allocation7 + $0x438] sm:$0xff]  ;;  %v79_v9 = vld [vmem:[#allocation2] sm:$0xff]  ;;  %v3681_v11 = vpack.c.bf16 %v219_v4, %v215_v63 }
  0x77   :  { %3660 = vmatprep.subr.bf16.mxu0 %v3659_v7  ;;  %v224_v7 = vld [vmem:[#allocation7 + $0x448] sm:$0xff]  ;;  %v3805_v10 = vpack.c.bf16 %v213_v2, %v209_v1  ;;  %v223_v12 = vld [vmem:[#allocation7 + $0x440] sm:$0xff]  ;;  %v221_v15 = vld [vmem:[#allocation7 + $0x430] sm:$0xff] }
  0x78   :  { %3786 = vmatpush1.bf16.msra.mxu1 %v3785_v13  ;;  %v3807_v13 = vpack.c.bf16 %v222_v6, %v218_v5  ;;  %v227_v17 = vld [vmem:[#allocation7 + $0x460] sm:$0xff]  ;;  %v226_v18 = vld [vmem:[#allocation7 + $0x458] sm:$0xff]  ;;  %v232_v20 = vld [vmem:[#allocation7 + $0x488] sm:$0xff] }
  0x79   :  { %3788 = vmatprep.subr.bf16.mxu1 %v3787_v16  ;;  %v3683_v16 = vpack.c.bf16 %v228_v8, %v224_v7  ;;  %v236_v21 = vld [vmem:[#allocation7 + $0x4a8] sm:$0xff]  ;;  %v3685_v23 = vpack.c.bf16 %v227_v17, %v223_v12  ;;  %v231_v24 = vld [vmem:[#allocation7 + $0x480] sm:$0xff]  ;;  %v229_v27 = vld [vmem:[#allocation7 + $0x470] sm:$0xff] }
  0x7a   :  { %3662 = vmatpush1.bf16.msra.mxu0 %v3661_v14  ;;  %v217_v14 = vld [vmem:[#allocation7 + $0x410] sm:$0xff]  ;;  %v235_v29 = vld [vmem:[#allocation7 + $0x4a0] sm:$0xff]  ;;  %v234_v30 = vld [vmem:[#allocation7 + $0x498] sm:$0xff] }
  0x7b   :  { %3664 = vmatprep.subr.bf16.mxu0 %v3663_v19  ;;  %v230_v19 = vld [vmem:[#allocation7 + $0x478] sm:$0xff]  ;;  %v3809_v22 = vpack.c.bf16 %v221_v15, %v217_v14  ;;  %v240_v32 = vld [vmem:[#allocation7 + $0x4c8] sm:$0xff]  ;;  %v3689_v35 = vpack.c.bf16 %v235_v29, %v231_v24  ;;  %v239_v36 = vld [vmem:[#allocation7 + $0x4c0] sm:$0xff] }
  0x7c   :  { %3790 = vmatpush1.bf16.msra.mxu1 %v3789_v25  ;;  %v3811_v25 = vpack.c.bf16 %v230_v19, %v226_v18  ;;  %v244_v33 = vld [vmem:[#allocation7 + $0x4e8] sm:$0xff]  ;;  %v237_v39 = vld [vmem:[#allocation7 + $0x4b0] sm:$0xff]  ;;  %v243_v41 = vld [vmem:[#allocation7 + $0x4e0] sm:$0xff] }
  0x7d   :  { %3792 = vmatprep.subr.bf16.mxu1 %v3791_v28  ;;  %v3687_v28 = vpack.c.bf16 %v236_v21, %v232_v20  ;;  %v242_v42 = vld [vmem:[#allocation7 + $0x4d8] sm:$0xff]  ;;  %v248_v44 = vld [vmem:[#allocation7 + $0x508] sm:$0xff]  ;;  %v3693_v47 = vpack.c.bf16 %v243_v41, %v239_v36  ;;  %v247_v48 = vld [vmem:[#allocation7 + $0x500] sm:$0xff] }
  0x7e   :  { %3666 = vmatpush1.bf16.msra.mxu0 %v3665_v26  ;;  %v225_v26 = vld [vmem:[#allocation7 + $0x450] sm:$0xff]  ;;  %v252_v45 = vld [vmem:[#allocation7 + $0x528] sm:$0xff]  ;;  %v251_v53 = vld [vmem:[#allocation7 + $0x520] sm:$0xff] }
  0x7f   :  { %3668 = vmatprep.subr.bf16.mxu0 %v3667_v31  ;;  %v238_v31 = vld [vmem:[#allocation7 + $0x4b8] sm:$0xff]  ;;  %v3813_v34 = vpack.c.bf16 %v229_v27, %v225_v26  ;;  %v245_v51 = vld [vmem:[#allocation7 + $0x4f0] sm:$0xff]  ;;  %v256_v56 = vld [vmem:[#allocation7 + $0x548] sm:$0xff]  ;;  %v3697_v60 = vpack.c.bf16 %v251_v53, %v247_v48 }
  0x80   :  { %3794 = vmatpush1.bf16.msra.mxu1 %v3793_v37  ;;  %v3815_v37 = vpack.c.bf16 %v238_v31, %v234_v30  ;;  %v250_v54 = vld [vmem:[#allocation7 + $0x518] sm:$0xff]  ;;  %v260_v57 = vld [vmem:[#allocation7 + $0x568] sm:$0xff]  ;;  %v255_v59 = vld [vmem:[#allocation7 + $0x540] sm:$0xff] }
  0x81   :  { %3796 = vmatprep.subr.bf16.mxu1 %v3795_v40  ;;  %v3691_v40 = vpack.c.bf16 %v244_v33, %v240_v32  ;;  %v249_v63 = vld [vmem:[#allocation7 + $0x510] sm:$0xff]  ;;  %v3699_v1 = vpack.c.bf16 %v260_v57, %v256_v56  ;;  %v264_v2 = vld [vmem:[#allocation7 + $0x588] sm:$0xff]  ;;  %v262_v4 = vld [vmem:[#allocation7 + $0x578] sm:$0xff] }
  0x82   :  { %3670 = vmatpush1.bf16.msra.mxu0 %v3669_v38  ;;  %v233_v38 = vld [vmem:[#allocation7 + $0x490] sm:$0xff]  ;;  %v268_v5 = vld [vmem:[#allocation7 + $0x5a8] sm:$0xff]  ;;  %v83_v7 = vld [vmem:[#allocation2 + $0x20] sm:$0xff] }
  0x83   :  { %3672 = vmatprep.subr.bf16.mxu0 %v3671_v43  ;;  %v246_v43 = vld [vmem:[#allocation7 + $0x4f8] sm:$0xff]  ;;  %v3817_v46 = vpack.c.bf16 %v237_v39, %v233_v38  ;;  %v84_v6 = vld [vmem:[#allocation2 + $0x28] sm:$0xff]  ;;  %v261_v14 = vld [vmem:[#allocation7 + $0x570] sm:$0xff]  ;;  %v3703_v15 = vpack.c.bf16 %v268_v5, %v264_v2 }
  0x84   :  { %3798 = vmatpush1.bf16.msra.mxu1 %v3797_v49  ;;  %v3819_v49 = vpack.c.bf16 %v246_v43, %v242_v42  ;;  %v270_v17 = vld [vmem:[#allocation7 + $0x5b8] sm:$0xff]  ;;  %v272_v19 = vld [vmem:[#allocation7 + $0x5c8] sm:$0xff]  ;;  %v269_v26 = vld [vmem:[#allocation7 + $0x5b0] sm:$0xff] }
  0x85   :  { %3800 = vmatprep.subr.bf16.mxu1 %v3799_v52  ;;  %v3695_v52 = vpack.c.bf16 %v252_v45, %v248_v44  ;;  %v82_v18 = vld [vmem:[#allocation2 + $0x18] sm:$0xff]  ;;  %v276_v20 = vld [vmem:[#allocation7 + $0x5e8] sm:$0xff]  ;;  %v277_v38 = vld [vmem:[#allocation7 + $0x5f0] sm:$0xff] }
  0x86   :  { %3674 = vmatpush1.bf16.msra.mxu0 %v3673_v50  ;;  %v241_v50 = vld [vmem:[#allocation7 + $0x4d0] sm:$0xff]  ;;  %v3707_v27 = vpack.c.bf16 %v276_v20, %v272_v19  ;;  %v274_v29 = vld [vmem:[#allocation7 + $0x5d8] sm:$0xff]  ;;  %v280_v31 = vld [vmem:[#allocation7 + $0x608] sm:$0xff] }
  0x87   :  { %3676 = vmatprep.subr.bf16.mxu0 %v3675_v55  ;;  %v254_v55 = vld [vmem:[#allocation7 + $0x538] sm:$0xff]  ;;  %v3821_v58 = vpack.c.bf16 %v245_v51, %v241_v50  ;;  %v284_v32 = vld [vmem:[#allocation7 + $0x628] sm:$0xff]  ;;  %v285_v50 = vld [vmem:[#allocation7 + $0x630] sm:$0xff] }
  0x88   :  { %3802 = vmatpush1.bf16.msra.mxu1 %v3801_v61  ;;  %v259_v61 = vld [vmem:[#allocation7 + $0x560] sm:$0xff]  ;;  %v278_v30 = vld [vmem:[#allocation7 + $0x5f8] sm:$0xff]  ;;  %v3711_v39 = vpack.c.bf16 %v284_v32, %v280_v31  ;;  %v288_v43 = vld [vmem:[#allocation7 + $0x648] sm:$0xff] }
  0x89   :  { %3804 = vmatprep.subr.bf16.mxu1 %v3803_v0  ;;  %v253_v0 = vld [vmem:[#allocation7 + $0x530] sm:$0xff]  ;;  %v3835_v36 = vpack.c.bf16 %v278_v30, %v274_v29  ;;  %v282_v41 = vld [vmem:[#allocation7 + $0x618] sm:$0xff]  ;;  %v292_v44 = vld [vmem:[#allocation7 + $0x668] sm:$0xff] }
  0x8a   :  { %3678 = vmatpush1.bf16.msra.mxu0 %v3677_v62  ;;  %v3823_v62 = vpack.c.bf16 %v254_v55, %v250_v54  ;;  %v3825_v8 = vpack.c.bf16 %v253_v0, %v249_v63  ;;  %v286_v42 = vld [vmem:[#allocation7 + $0x638] sm:$0xff]  ;;  %v3715_v51 = vpack.c.bf16 %v292_v44, %v288_v43  ;;  %v296_v55 = vld [vmem:[#allocation7 + $0x688] sm:$0xff]  ;;  %v299_v0 = vld [vmem:[#allocation7 + $0x6a0] sm:$0xff] }
  0x8b   :  { %3680 = vmatprep.subr.bf16.mxu0 %v3679_v3  ;;  %v258_v3 = vld [vmem:[#allocation7 + $0x558] sm:$0xff]  ;;  %v3839_v48 = vpack.c.bf16 %v286_v42, %v282_v41  ;;  %v300_v56 = vld [vmem:[#allocation7 + $0x6a8] sm:$0xff]  ;;  %v311_v19 = vld [vmem:[#allocation7 + $0x700] sm:$0xff] }
  0x8c   :  { %3806 = vmatpush1.bf16.msra.mxu1 %v3805_v10  ;;  %v3701_v10 = vpack.c.bf16 %v259_v61, %v255_v59  ;;  %v3827_v12 = vpack.c.bf16 %v262_v4, %v258_v3  ;;  %v290_v53 = vld [vmem:[#allocation7 + $0x658] sm:$0xff]  ;;  %v295_v59 = vld [vmem:[#allocation7 + $0x680] sm:$0xff]  ;;  %v289_v61 = vld [vmem:[#allocation7 + $0x650] sm:$0xff]  ;;  %v3719_v63 = vpack.c.bf16 %v300_v56, %v296_v55 }
  0x8d   :  { %430 = vmatmul.mubr.f32.vlgmr.msra.gmra.mrb[0].mxu0 %v79_v9  ;;  %3808 = vmatprep.subr.bf16.mxu1 %v3807_v13  ;;  %v257_v13 = vld [vmem:[#allocation7 + $0x550] sm:$0xff]  ;;  %v294_v54 = vld [vmem:[#allocation7 + $0x678] sm:$0xff]  ;;  %v304_v3 = vld [vmem:[#allocation7 + $0x6c8] sm:$0xff] }
  0x8e   :  { %3682 = vmatpush1.bf16.msra.mxu0 %v3681_v11  ;;  %435 = vmatprep.mubr.f32.mxu0 %v84_v6  ;;  %v267_v11 = vld [vmem:[#allocation7 + $0x5a0] sm:$0xff]  ;;  %v3829_v21 = vpack.c.bf16 %v261_v14, %v257_v13  ;;  %v302_v2 = vld [vmem:[#allocation7 + $0x6b8] sm:$0xff]  ;;  %v308_v4 = vld [vmem:[#allocation7 + $0x6e8] sm:$0xff] }
  0x8f   :  { %3684 = vmatprep.subr.bf16.mxu0 %v3683_v16  ;;  %584 = vmatmul.mubr.f32.vlgmr.msra.gmra.mrb[0].mxu1 %v79_v9  ;;  %v263_v9 = vld [vmem:[#allocation7 + $0x580] sm:$0xff]  ;;  %v266_v16 = vld [vmem:[#allocation7 + $0x598] sm:$0xff] }
  0x90   :  { %3810 = vmatpush1.bf16.msra.mxu1 %v3809_v22  ;;  %589 = vmatprep.mubr.f32.mxu1 %v84_v6  ;;  %v3705_v22 = vpack.c.bf16 %v267_v11, %v263_v9  ;;  %v3831_v24 = vpack.c.bf16 %v270_v17, %v266_v16  ;;  %v3721_v6 = vpack.c.bf16 %v299_v0, %v295_v59  ;;  %v297_v9 = vld [vmem:[#allocation7 + $0x690] sm:$0xff]  ;;  %v306_v13 = vld [vmem:[#allocation7 + $0x6d8] sm:$0xff]  ;;  %v316_v16 = vld [vmem:[#allocation7 + $0x728] sm:$0xff] }
  0x91   :  { %3812 = vmatprep.subr.bf16.mxu1 %v3811_v25  ;;  %436 = vmatmul.mubr.f32.gmra.mrb[2].mxu0 %v83_v7  ;;  %v265_v25 = vld [vmem:[#allocation7 + $0x590] sm:$0xff]  ;;  %v3723_v11 = vpack.c.bf16 %v308_v4, %v304_v3  ;;  %v310_v14 = vld [vmem:[#allocation7 + $0x6f8] sm:$0xff]  ;;  %v319_v31 = vld [vmem:[#allocation7 + $0x740] sm:$0xff] }
  0x92   :  { %3686 = vmatpush1.bf16.msra.mxu0 %v3685_v23  ;;  %506 = vmatprep.mubr.f32.mxu0 %v82_v18  ;;  %v271_v23 = vld [vmem:[#allocation7 + $0x5c0] sm:$0xff]  ;;  %v3833_v33 = vpack.c.bf16 %v269_v26, %v265_v25  ;;  %v3851_v20 = vpack.c.bf16 %v310_v14, %v306_v13  ;;  %v314_v25 = vld [vmem:[#allocation7 + $0x718] sm:$0xff]  ;;  %v341_v3 = vld [vmem:[#allocation7 + $0x7f0] sm:$0xff]  ;;  %v6711_v13 = vmov 0.0  }
  0x93   :  { %3688 = vmatprep.subr.bf16.mxu0 %v3687_v28  ;;  %v275_v28 = vld [vmem:[#allocation7 + $0x5e0] sm:$0xff]  ;;  %590 = vmatmul.mubr.f32.gmra.mrb[2].mxu1 %v83_v7  ;;  %v318_v26 = vld [vmem:[#allocation7 + $0x738] sm:$0xff] }
  0x94   :  { %3814 = vmatpush1.bf16.msra.mxu1 %v3813_v34  ;;  %660 = vmatprep.mubr.f32.mxu1 %v82_v18  ;;  %v3709_v34 = vpack.c.bf16 %v275_v28, %v271_v23  ;;  %v303_v7 = vld [vmem:[#allocation7 + $0x6c0] sm:$0xff]  ;;  %v324_v28 = vld [vmem:[#allocation7 + $0x768] sm:$0xff]  ;;  %v3855_v32 = vpack.c.bf16 %v318_v26, %v314_v25 }
  0x95   :  { %3816 = vmatprep.subr.bf16.mxu1 %v3815_v37  ;;  %v273_v37 = vld [vmem:[#allocation7 + $0x5d0] sm:$0xff]  ;;  %v327_v43 = vld [vmem:[#allocation7 + $0x780] sm:$0xff] }
  0x96   :  { %3690 = vmatpush1.bf16.msra.mxu0 %v3689_v35  ;;  %v279_v35 = vld [vmem:[#allocation7 + $0x600] sm:$0xff]  ;;  %v3837_v45 = vpack.c.bf16 %v277_v38, %v273_v37  ;;  %v322_v37 = vld [vmem:[#allocation7 + $0x758] sm:$0xff] }
  0x97   :  { %3692 = vmatprep.subr.bf16.mxu0 %v3691_v40  ;;  %v283_v40 = vld [vmem:[#allocation7 + $0x620] sm:$0xff]  ;;  %v326_v38 = vld [vmem:[#allocation7 + $0x778] sm:$0xff] }
  0x98   :  { %3818 = vmatpush1.bf16.msra.mxu1 %v3817_v46  ;;  %v3713_v46 = vpack.c.bf16 %v283_v40, %v279_v35  ;;  %v332_v40 = vld [vmem:[#allocation7 + $0x7a8] sm:$0xff]  ;;  %v3859_v44 = vpack.c.bf16 %v326_v38, %v322_v37  ;;  %v335_v55 = vld [vmem:[#allocation7 + $0x7c0] sm:$0xff] }
  0x99   :  { %3820 = vmatprep.subr.bf16.mxu1 %v3819_v49  ;;  %v281_v49 = vld [vmem:[#allocation7 + $0x610] sm:$0xff] }
  0x9a   :  { %3694 = vmatpush1.bf16.msra.mxu0 %v3693_v47  ;;  %v287_v47 = vld [vmem:[#allocation7 + $0x640] sm:$0xff]  ;;  %v3841_v57 = vpack.c.bf16 %v285_v50, %v281_v49  ;;  %v330_v49 = vld [vmem:[#allocation7 + $0x798] sm:$0xff] }
  0x9b   :  { %3696 = vmatprep.subr.bf16.mxu0 %v3695_v52  ;;  %v291_v52 = vld [vmem:[#allocation7 + $0x660] sm:$0xff]  ;;  %v334_v50 = vld [vmem:[#allocation7 + $0x7b8] sm:$0xff] }
  0x9c   :  { %3822 = vmatpush1.bf16.msra.mxu1 %v3821_v58  ;;  %v3717_v58 = vpack.c.bf16 %v291_v52, %v287_v47  ;;  %v340_v52 = vld [vmem:[#allocation7 + $0x7e8] sm:$0xff]  ;;  %v3863_v56 = vpack.c.bf16 %v334_v50, %v330_v49 }
  0x9d   :  { %3824 = vmatprep.subr.bf16.mxu1 %v3823_v62  ;;  %v293_v62 = vld [vmem:[#allocation7 + $0x670] sm:$0xff] }
  0x9e   :  { %3698 = vmatpush1.bf16.msra.mxu0 %v3697_v60  ;;  %v3843_v60 = vpack.c.bf16 %v294_v54, %v290_v53  ;;  %v3845_v5 = vpack.c.bf16 %v293_v62, %v289_v61  ;;  %v338_v61 = vld [vmem:[#allocation7 + $0x7d8] sm:$0xff] }
  0x9f   :  { %3700 = vmatprep.subr.bf16.mxu0 %v3699_v1  ;;  %v298_v1 = vld [vmem:[#allocation7 + $0x698] sm:$0xff] }
  0xa0   :  { %3826 = vmatpush1.bf16.msra.mxu1 %v3825_v8  ;;  %v3847_v8 = vpack.c.bf16 %v302_v2, %v298_v1  ;;  %v342_v62 = vld [vmem:[#allocation7 + $0x7f8] sm:$0xff]  ;;  %v337_v2 = vld [vmem:[#allocation7 + $0x7d0] sm:$0xff] }
  0xa1   :  { %3828 = vmatprep.subr.bf16.mxu1 %v3827_v12  ;;  %v307_v12 = vld [vmem:[#allocation7 + $0x6e0] sm:$0xff]  ;;  %v3867_v1 = vpack.c.bf16 %v342_v62, %v338_v61  ;;  %v3869_v4 = vpack.c.bf16 %v341_v3, %v337_v2 }
  0xa2   :  { %3702 = vmatpush1.bf16.msra.mxu0 %v3701_v10  ;;  %v301_v10 = vld [vmem:[#allocation7 + $0x6b0] sm:$0xff]  ;;  %v3725_v18 = vpack.c.bf16 %v307_v12, %v303_v7 }
  0xa3   :  { %3704 = vmatprep.subr.bf16.mxu0 %v3703_v15  ;;  %v312_v15 = vld [vmem:[#allocation7 + $0x708] sm:$0xff]  ;;  %v3849_v17 = vpack.c.bf16 %v301_v10, %v297_v9  ;;  %v85_v7 = vld [vmem:[#allocation2 + $0x30] sm:$0xff] }
  0xa4   :  { %3830 = vmatpush1.bf16.msra.mxu1 %v3829_v21  ;;  %v305_v21 = vld [vmem:[#allocation7 + $0x6d0] sm:$0xff]  ;;  %v3727_v23 = vpack.c.bf16 %v316_v16, %v312_v15 }
  0xa5   :  { %3832 = vmatprep.subr.bf16.mxu1 %v3831_v24  ;;  %v315_v24 = vld [vmem:[#allocation7 + $0x720] sm:$0xff] }
  0xa6   :  { %3706 = vmatpush1.bf16.msra.mxu0 %v3705_v22  ;;  %v309_v22 = vld [vmem:[#allocation7 + $0x6f0] sm:$0xff]  ;;  %v3729_v30 = vpack.c.bf16 %v315_v24, %v311_v19  ;;  %v6780_v19 = vmov 0  ;;  %v6789_v24 = vmov 0 }
  0xa7   :  { %3708 = vmatprep.subr.bf16.mxu0 %v3707_v27  ;;  %v320_v27 = vld [vmem:[#allocation7 + $0x748] sm:$0xff]  ;;  %v3853_v29 = vpack.c.bf16 %v309_v22, %v305_v21 }
  0xa8   :  { %3834 = vmatpush1.bf16.msra.mxu1 %v3833_v33  ;;  %v313_v33 = vld [vmem:[#allocation7 + $0x710] sm:$0xff]  ;;  %v3731_v35 = vpack.c.bf16 %v324_v28, %v320_v27  ;;  %v6792_v27 = vmov 0  ;;  %v6795_v28 = vmov 0 }
  0xa9   :  { %3836 = vmatprep.subr.bf16.mxu1 %v3835_v36  ;;  %v323_v36 = vld [vmem:[#allocation7 + $0x760] sm:$0xff] }
  0xaa   :  { %3710 = vmatpush1.bf16.msra.mxu0 %v3709_v34  ;;  %v317_v34 = vld [vmem:[#allocation7 + $0x730] sm:$0xff]  ;;  %v3733_v42 = vpack.c.bf16 %v323_v36, %v319_v31  ;;  %v6798_v31 = vmov 0  ;;  %v6807_v36 = vmov 0 }
  0xab   :  { %3712 = vmatprep.subr.bf16.mxu0 %v3711_v39  ;;  %v328_v39 = vld [vmem:[#allocation7 + $0x788] sm:$0xff]  ;;  %v3857_v41 = vpack.c.bf16 %v317_v34, %v313_v33 }
  0xac   :  { %3838 = vmatpush1.bf16.msra.mxu1 %v3837_v45  ;;  %v321_v45 = vld [vmem:[#allocation7 + $0x750] sm:$0xff]  ;;  %v3735_v47 = vpack.c.bf16 %v332_v40, %v328_v39  ;;  %v6810_v39 = vmov 0  ;;  %v6813_v40 = vmov 0 }
  0xad   :  { %3840 = vmatprep.subr.bf16.mxu1 %v3839_v48  ;;  %v331_v48 = vld [vmem:[#allocation7 + $0x7a0] sm:$0xff] }
  0xae   :  { %3714 = vmatpush1.bf16.msra.mxu0 %v3713_v46  ;;  %v325_v46 = vld [vmem:[#allocation7 + $0x770] sm:$0xff]  ;;  %v3737_v54 = vpack.c.bf16 %v331_v48, %v327_v43  ;;  %v6816_v43 = vmov 0 }
  0xaf   :  { %3716 = vmatprep.subr.bf16.mxu0 %v3715_v51  ;;  %v336_v51 = vld [vmem:[#allocation7 + $0x7c8] sm:$0xff]  ;;  %v3861_v53 = vpack.c.bf16 %v325_v46, %v321_v45  ;;  %v343_v46 = vld [vmem:[%s6683_s4] sm:$0xf] }
  0xb0   :  { %3842 = vmatpush1.bf16.msra.mxu1 %v3841_v57  ;;  %v329_v57 = vld [vmem:[#allocation7 + $0x790] sm:$0xff]  ;;  %v3739_v59 = vpack.c.bf16 %v340_v52, %v336_v51 }
  0xb1   :  { %3844 = vmatprep.subr.bf16.mxu1 %v3843_v60  ;;  %v339_v60 = vld [vmem:[#allocation7 + $0x7e0] sm:$0xff] }
  0xb2   :  { %3718 = vmatpush1.bf16.msra.mxu0 %v3717_v58  ;;  %v333_v58 = vld [vmem:[#allocation7 + $0x7b0] sm:$0xff]  ;;  %v3741_v0 = vpack.c.bf16 %v339_v60, %v335_v55 }
  0xb3   :  { %3720 = vmatprep.subr.bf16.mxu0 %v3719_v63  ;;  %v3865_v63 = vpack.c.bf16 %v333_v58, %v329_v57 }
  0xb4   :  { %3846 = vmatpush1.bf16.msra.mxu1 %v3845_v5  ;;  %v81_v5 = vld [vmem:[#allocation2 + $0x10] sm:$0xff] }
  0xb5   :  { %3848 = vmatprep.subr.bf16.mxu1 %v3847_v8  ;;  %v6705_v8 = vlaneseq }
  0xb6   :  { %3722 = vmatpush1.bf16.msra.mxu0 %v3721_v6  ;;  %v86_v6 = vld [vmem:[#allocation2 + $0x38] sm:$0xff] }
  0xb7   :  { %3724 = vmatprep.subr.bf16.mxu0 %v3723_v11  ;;  %v1091_v9 = vand.u32 127, %v6705_v8  ;;  %v5135_v12 = vshrl.u32 %v6705_v8, 7  ;;  %v816_v8 = vld [vmem:[#allocation8 + $0x78] sm:$0xff] }
  0xb8   :  { %3850 = vmatpush1.bf16.msra.mxu1 %v3849_v17 }
  0xb9   :  { %3852 = vmatprep.subr.bf16.mxu1 %v3851_v20  ;;  %v5129_v10 = vmul.u32 16, %v1091_v9  ;;  %v1059_v14 = vadd.s32 8, %v5135_v12  ;;  %v1060_v17 = vadd.s32 16, %v5135_v12  ;;  %v6783_v20 = vmov 0 }
  0xba   :  { %3726 = vmatpush1.bf16.msra.mxu0 %v3725_v18  ;;  %v1061_v18 = vadd.s32 24, %v5135_v12  ;;  %v1062_v21 = vadd.s32 32, %v5135_v12  ;;  %v1063_v22 = vadd.s32 40, %v5135_v12  ;;  %v1064_v25 = vadd.s32 48, %v5135_v12 }
  0xbb   :  { %3728 = vmatprep.subr.bf16.mxu0 %v3727_v23  ;;  %v5132_v11 = vadd.s32 16, %v5129_v10  ;;  %vm1093_vm0 = vcmp.ge.s32.totalorder %v5135_v12, %v5129_v10  ;;  %vm1094_vm2 = vcmp.ge.s32.totalorder %v1059_v14, %v5129_v10  ;;  %vm1095_vm7 = vcmp.ge.s32.totalorder %v1060_v17, %v5129_v10 }
  0xbc   :  { %3854 = vmatpush1.bf16.msra.mxu1 %v3853_v29  ;;  %vm1096_vm9 = vcmp.ge.s32.totalorder %v1061_v18, %v5129_v10  ;;  %vm1097_vm14 = vcmp.ge.s32.totalorder %v1062_v21, %v5129_v10  ;;  %v6786_v23 = vmov 0  ;;  %v1065_v26 = vadd.s32 56, %v5135_v12 }
  0xbd   :  { %3856 = vmatprep.subr.bf16.mxu1 %v3855_v32  ;;  %vm1126_vm1 = vcmp.lt.s32.totalorder %v5135_v12, %v5132_v11  ;;  %vm1127_vm3 = vcmp.lt.s32.totalorder %v1059_v14, %v5132_v11  ;;  %vm1128_vm8 = vcmp.lt.s32.totalorder %v1060_v17, %v5132_v11  ;;  %vm1129_vm10 = vcmp.lt.s32.totalorder %v1061_v18, %v5132_v11 }
  0xbe   :  { %3730 = vmatpush1.bf16.msra.mxu0 %v3729_v30  ;;  %vm5146_vm4 = vmand %vm1093_vm0, %vm1126_vm1  ;;  %vm1130_vm15 = vcmp.lt.s32.totalorder %v1062_v21, %v5132_v11  ;;  %vm1098_vm0 = vcmp.ge.s32.totalorder %v1063_v22, %v5129_v10  ;;  %vm1131_vm1 = vcmp.lt.s32.totalorder %v1063_v22, %v5132_v11  ;;  %v1066_v29 = vadd.s32 64, %v5135_v12 }
  0xbf   :  { %3732 = vmatprep.subr.bf16.mxu0 %v3731_v35  ;;  %vm5150_vm5 = vmand %vm1094_vm2, %vm1127_vm3  ;;  %v1067_v30 = vadd.s32 72, %v5135_v12  ;;  %v6801_v32 = vmov 0  ;;  %v1068_v33 = vadd.s32 80, %v5135_v12  ;;  %v1069_v34 = vadd.s32 88, %v5135_v12 }
  0xc0   :  { %3858 = vmatpush1.bf16.msra.mxu1 %v3857_v41  ;;  %vm5164_vm11 = vmand %vm1095_vm7, %vm1128_vm8  ;;  %vm1099_vm8 = vcmp.ge.s32.totalorder %v1064_v25, %v5129_v10  ;;  %vm1101_vm7 = vcmp.ge.s32.totalorder %v1066_v29, %v5129_v10  ;;  %vm1134_vm13 = vcmp.lt.s32.totalorder %v1066_v29, %v5132_v11  ;;  %v6804_v35 = vmov 0  ;;  %v805_v29 = vld [vmem:[#allocation8 + $0x20] sm:$0xff] }
  0xc1   :  { %3860 = vmatprep.subr.bf16.mxu1 %v3859_v44  ;;  %v6781_v19 = vsel %vm5164_vm11, 4294967295, %v6780_v19  ;;  %vm5168_vm12 = vmand %vm1096_vm9, %vm1129_vm10  ;;  %vm1132_vm9 = vcmp.lt.s32.totalorder %v1064_v25, %v5132_v11  ;;  %vm1100_vm10 = vcmp.ge.s32.totalorder %v1065_v26, %v5129_v10  ;;  %vm1103_vm6 = vcmp.ge.s32.totalorder %v1068_v33, %v5129_v10 }
  0xc2   :  { %3734 = vmatpush1.bf16.msra.mxu0 %v3733_v42  ;;  %6782 = vst [vmem:[#allocation15_spill] sm:$0xff] %v6781_v19  ;;  %v6784_v20 = vsel %vm5168_vm12, 4294967295, %v6783_v20  ;;  %vm5182_vm2 = vmand %vm1097_vm14, %vm1130_vm15  ;;  %vm1133_vm14 = vcmp.lt.s32.totalorder %v1065_v26, %v5132_v11  ;;  %v1070_v37 = vadd.s32 96, %v5135_v12  ;;  %v1071_v38 = vadd.s32 104, %v5135_v12  ;;  %v801_v26 = vld [vmem:[#allocation8] sm:$0xff]  ;;  %v6109_v19 = vld [vmem:[#allocation5 + $0x118] sm:$0xff] }
  0xc3   :  { %3736 = vmatprep.subr.bf16.mxu0 %v3735_v47  ;;  %6785 = vst [vmem:[#allocation16_spill] sm:$0xff] %v6784_v20  ;;  %v6787_v23 = vsel %vm5182_vm2, 4294967295, %v6786_v23  ;;  %vm5186_vm3 = vmand %vm1098_vm0, %vm1131_vm1  ;;  %v1072_v41 = vadd.s32 112, %v5135_v12  ;;  %v1073_v42 = vadd.s32 120, %v5135_v12  ;;  %v6819_v44 = vmov 0  ;;  %v784_v20 = vld [vmem:[#allocation5 + $0x378] sm:$0xff] }
  0xc4   :  { %3862 = vmatpush1.bf16.msra.mxu1 %v3861_v53  ;;  %6788 = vst [vmem:[#allocation17_spill] sm:$0xff] %v6787_v23  ;;  %v6790_v24 = vsel %vm5186_vm3, 4294967295, %v6789_v24  ;;  %vm5200_vm15 = vmand %vm1099_vm8, %vm1132_vm9  ;;  %vm1102_vm8 = vcmp.ge.s32.totalorder %v1067_v30, %v5129_v10  ;;  %vm1135_vm9 = vcmp.lt.s32.totalorder %v1067_v30, %v5132_v11  ;;  %v6708_v45 = vsub.s32 0, %v5135_v12  ;;  %v810_v30 = vld [vmem:[#allocation8 + $0x48] sm:$0xff] }
  0xc5   :  { %3864 = vmatprep.subr.bf16.mxu1 %v3863_v56  ;;  %6791 = vst [vmem:[#allocation18_spill] sm:$0xff] %v6790_v24  ;;  %v6793_v27 = vsel %vm5200_vm15, 4294967295, %v6792_v27  ;;  %vm5204_vm0 = vmand %vm1100_vm10, %vm1133_vm14  ;;  %v6709_v47 = vsub.s32 1, %v5135_v12  ;;  %v6706_v48 = vsub.s32 2, %v5135_v12  ;;  %v6707_v49 = vsub.s32 3, %v5135_v12  ;;  %v6081_v24 = vld [vmem:[#allocation5 + $0xb8] sm:$0xff] }
  0xc6   :  { %3738 = vmatpush1.bf16.msra.mxu0 %v3737_v54  ;;  %6794 = vst [vmem:[#allocation19_spill] sm:$0xff] %v6793_v27  ;;  %v6796_v28 = vsel %vm5204_vm0, 4294967295, %v6795_v28  ;;  %vm5218_vm10 = vmand %vm1101_vm7, %vm1134_vm13  ;;  %vm1136_vm0 = vcmp.lt.s32.totalorder %v1068_v33, %v5132_v11  ;;  %vm1104_vm13 = vcmp.ge.s32.totalorder %v1069_v34, %v5129_v10  ;;  %vm1137_vm7 = vcmp.lt.s32.totalorder %v1069_v34, %v5132_v11  ;;  %v814_v34 = vld [vmem:[#allocation8 + $0x68] sm:$0xff] }
  0xc7   :  { %3740 = vmatprep.subr.bf16.mxu0 %v3739_v59  ;;  %6797 = vst [vmem:[#allocation20_spill] sm:$0xff] %v6796_v28  ;;  %v6799_v31 = vsel %vm5218_vm10, 4294967295, %v6798_v31  ;;  %vm5222_vm14 = vmand %vm1102_vm8, %vm1135_vm9  ;;  %vm1138_vm10 = vcmp.lt.s32.totalorder %v1070_v37, %v5132_v11  ;;  %v1082_v51 = vadd.s32 192, %v5135_v12  ;;  %v348_v52 = vrot.slane %v343_v46, %v6708_v45  ;;  %v811_v45 = vld [vmem:[#allocation8 + $0x50] sm:$0xff]  ;;  %v5866_v27 = vld [vmem:[#allocation5 + $0x1c8] sm:$0xff] }
  0xc8   :  { %3866 = vmatpush1.bf16.msra.mxu1 %v3865_v63  ;;  %6800 = vst [vmem:[#allocation21_spill] sm:$0xff] %v6799_v31  ;;  %v6802_v32 = vsel %vm5222_vm14, 4294967295, %v6801_v32  ;;  %vm5236_vm8 = vmand %vm1103_vm6, %vm1136_vm0  ;;  %vm1105_vm14 = vcmp.ge.s32.totalorder %v1070_v37, %v5129_v10  ;;  %vm1106_vm6 = vcmp.ge.s32.totalorder %v1071_v38, %v5129_v10  ;;  %vm1139_vm0 = vcmp.lt.s32.totalorder %v1071_v38, %v5132_v11  ;;  %v804_v37 = vld [vmem:[#allocation8 + $0x18] sm:$0xff] }
  0xc9   :  { %3868 = vmatprep.subr.bf16.mxu1 %v3867_v1  ;;  %6803 = vst [vmem:[#allocation22_spill] sm:$0xff] %v6802_v32  ;;  %v6805_v35 = vsel %vm5236_vm8, 4294967295, %v6804_v35  ;;  %vm5240_vm9 = vmand %vm1104_vm13, %vm1137_vm7  ;;  %vm1140_vm8 = vcmp.lt.s32.totalorder %v1072_v41, %v5132_v11  ;;  %v352_v54 = vrot.slane %v343_v46, %v6709_v47  ;;  %v356_v55 = vrot.slane %v343_v46, %v6706_v48  ;;  %v806_v1 = vld [vmem:[#allocation8 + $0x28] sm:$0xff]  ;;  %v808_v38 = vld [vmem:[#allocation8 + $0x38] sm:$0xff] }
  0xca   :  { %3742 = vmatpush1.bf16.msra.mxu0 %v3741_v0  ;;  %6806 = vst [vmem:[#allocation23_spill] sm:$0xff] %v6805_v35  ;;  %v6808_v36 = vsel %vm5240_vm9, 4294967295, %v6807_v36  ;;  %vm5254_vm13 = vmand %vm1105_vm14, %vm1138_vm10  ;;  %vm1107_vm9 = vcmp.ge.s32.totalorder %v1072_v41, %v5129_v10  ;;  %vm1108_vm10 = vcmp.ge.s32.totalorder %v1073_v42, %v5129_v10  ;;  %vm1141_vm14 = vcmp.lt.s32.totalorder %v1073_v42, %v5132_v11  ;;  %v802_v0 = vld [vmem:[#allocation8 + $0x8] sm:$0xff]  ;;  %v815_v47 = vld [vmem:[#allocation8 + $0x70] sm:$0xff] }
  0xcb   :  { %6809 = vst [vmem:[#allocation24_spill] sm:$0xff] %v6808_v36  ;;  %v6811_v39 = vsel %vm5254_vm13, 4294967295, %v6810_v39  ;;  %vm5258_vm7 = vmand %vm1106_vm6, %vm1139_vm0  ;;  %v360_v57 = vrot.slane %v343_v46, %v6707_v49  ;;  %v1083_v63 = vadd.s32 200, %v5135_v12  ;;  %v6822_v18 = vmov 0  ;;  %v882_v48 = vld [vmem:[#allocation8 + $0x288] sm:$0xff] }
  0xcc   :  { %3870 = vmatpush1.bf16.msra.mxu1 %v3869_v4  ;;  %6812 = vst [vmem:[#allocation25_spill] sm:$0xff] %v6811_v39  ;;  %v6814_v40 = vsel %vm5258_vm7, 4294967295, %v6813_v40  ;;  %vm5272_vm6 = vmand %vm1107_vm9, %vm1140_vm8  ;;  %vm1117_vm8 = vcmp.ge.s32.totalorder %v1082_v51, %v5129_v10  ;;  %vm1150_vm9 = vcmp.lt.s32.totalorder %v1082_v51, %v5132_v11  ;;  %v3879_v21 = vpack.c.bf16 %v806_v1, %v802_v0  ;;  %v817_v1 = vld [vmem:[#allocation8 + $0x80] sm:$0xff]  ;;  %v926_v39 = vld [vmem:[#allocation8 + $0x3e8] sm:$0xff] }
  0xcd   :  { %507 = vmatmul.mubr.f32.vlgmr.msra.gmra.mrb[0].mxu0 %v81_v5  ;;  %6815 = vst [vmem:[#allocation26_spill] sm:$0xff] %v6814_v40  ;;  %v6817_v43 = vsel %vm5272_vm6, 4294967295, %v6816_v43  ;;  %vm5276_vm0 = vmand %vm1108_vm10, %vm1141_vm14  ;;  %v1084_v22 = vadd.s32 208, %v5135_v12  ;;  %vm1118_vm14 = vcmp.ge.s32.totalorder %v1083_v63, %v5129_v10  ;;  %vm1151_vm1 = vcmp.lt.s32.totalorder %v1083_v63, %v5132_v11  ;;  %v5794_v40 = vld [vmem:[#allocation5 + $0xc8] sm:$0xff]  ;;  %v6977_v15 = vld [vmem:[#allocation18_spill] sm:$0xff] }
  0xce   :  { %512 = vmatprep.mubr.f32.mxu0 %v86_v6  ;;  %6818 = vst [vmem:[#allocation27_spill] sm:$0xff] %v6817_v43  ;;  %v6820_v44 = vsel %vm5276_vm0, 4294967295, %v6819_v44  ;;  %vm5305_vm10 = vmand %vm1117_vm8, %vm1150_vm9  ;;  %v5315_v42 = vsel %vm5146_vm4, 1.0, %v6711_v13  ;;  %v3881_v51 = vpack.c.bf16 %v805_v29, %v801_v26  ;;  %v1086_v63 = vadd.s32 224, %v5135_v12  ;;  %v838_v26 = vld [vmem:[#allocation8 + $0x128] sm:$0xff] }
  0xcf   :  { %661 = vmatmul.mubr.f32.vlgmr.msra.gmra.mrb[0].mxu1 %v81_v5  ;;  %6821 = vst [vmem:[#allocation28_spill] sm:$0xff] %v6820_v44  ;;  %v6823_v18 = vsel %vm5305_vm10, 4294967295, %v6822_v18  ;;  %6825 = vst [vmem:[#allocation30_spill] sm:$0xff] %v5315_v42  ;;  %v5320_v46 = vsel %vm5305_vm10, 1.0, %v6711_v13  ;;  %vm1119_vm0 = vcmp.ge.s32.totalorder %v1084_v22, %v5129_v10  ;;  %vm1152_vm8 = vcmp.lt.s32.totalorder %v1084_v22, %v5132_v11  ;;  %v829_v22 = vld [vmem:[#allocation8 + $0xe0] sm:$0xff]  ;;  %v5776_v43 = vld [vmem:[#allocation5 + $0x88] sm:$0xff] }
  0xd0   :  { %666 = vmatprep.mubr.f32.mxu1 %v86_v6  ;;  %6824 = vst [vmem:[#allocation29_spill] sm:$0xff] %v6823_v18  ;;  %6826 = vst [vmem:[#allocation31_spill] sm:$0xff] %v5320_v46  ;;  %vm6830_vm10 = vcmask 130048   ;;  %v5396_v29 = vsel %vm5168_vm12, 1.0, %v6711_v13 }
  0xd1   :  { %513 = vmatmul.mubr.f32.gmra.mrb[2].mxu0 %v85_v7  ;;  %vm5326_vm9 = vmand %vm1118_vm14, %vm1151_vm1  ;;  %6846 = vst [vmem:[#allocation39_spill] sm:$0xff] %v5396_v29 }
  0xd2   :  { %1415 = vmatprep.mubr.f32.mxu0 %v6711_v13  ;;  %vm6831_vm1 = vmmov %vm6830_vm10 }
  0xd3   :  { %667 = vmatmul.mubr.f32.gmra.mrb[2].mxu1 %v85_v7 }
  0xd4   :  { %1559 = vmatprep.mubr.f32.mxu1 %v6711_v13 }
 0x1a0   :  { %v508_v50 = vpop.f32.mrb[0].mxu0 }
 0x1a1   :  { %v510_v53 = vpop.f32.mrb[1].mxu0  ;;  %v4345_v60 = vadd.f32 %v508_v50, %v348_v52  ;;  %v6827_v50 = vmov 0 }
 0x1a2   :  { %v662_v56 = vpop.f32.mrb[0].mxu1  ;;  %v4346_v2 = vadd.f32 %v510_v53, %v352_v54  ;;  %v6828_v50 = vsel %vm5326_vm9, 4294967295, %v6827_v50  ;;  %v809_v53 = vld [vmem:[#allocation8 + $0x40] sm:$0xff] }
 0x1a3   :  { %v664_v59 = vpop.f32.mrb[1].mxu1  ;;  %v4349_v4 = vadd.f32 %v662_v56, %v356_v55  ;;  %6829 = vst [vmem:[#allocation32_spill] sm:$0xff] %v6828_v50  ;;  %v4007_v56 = vpack.c.bf16 %v808_v38, %v804_v37  ;;  %v1088_v37 = vadd.s32 240, %v5135_v12  ;;  %v5909_v50 = vld [vmem:[#allocation5 + $0x268] sm:$0xff] }
 0x1a4   :  { %v514_v58 = vpop.f32.mrb[2].mxu0  ;;  %v4350_v6 = vadd.f32 %v664_v59, %v360_v57  ;;  %v5341_v59 = vsel %vm5150_vm5, 1.0, %v6711_v13 }
 0x1a5   :  { %v4347_v61 = vadd.f32 %v514_v58, %v348_v52  ;;  %v516_v62 = vpop.f32.mrb[3].mxu0  ;;  %v3883_v52 = vpack.c.bf16 %v814_v34, %v810_v30  ;;  %v822_v58 = vld [vmem:[#allocation8 + $0xa8] sm:$0xff]  ;;  %6832 = vst [vmem:[#allocation33_spill] sm:$0xff] %v5341_v59 }
 0x1a6   :  { %v4348_v3 = vadd.f32 %v516_v62, %v352_v54  ;;  %v668_v7 = vpop.f32.mrb[2].mxu1  ;;  %v813_v54 = vld [vmem:[#allocation8 + $0x60] sm:$0xff] }
 0x1a7   :  { %v3873_v5 = vpack.c.bf16 %v4347_v61, %v4345_v60  ;;  %v4351_v14 = vadd.f32 %v668_v7, %v356_v55  ;;  %v670_v17 = vpop.f32.mrb[3].mxu1  ;;  %v1085_v55 = vadd.s32 216, %v5135_v12  ;;  %v5346_v60 = vsel %vm5326_vm9, 1.0, %v6711_v13 }
 0x1a8   :  { %v3871_v9 = vpack.c.bf16 %v4348_v3, %v4346_v2  ;;  %v4352_v25 = vadd.f32 %v670_v17, %v360_v57  ;;  %v818_v57 = vld [vmem:[#allocation8 + $0x88] sm:$0xff]  ;;  %6833 = vst [vmem:[#allocation34_spill] sm:$0xff] %v5346_v60  ;;  %v6834_v61 = vmov 0  ;;  %v3885_v62 = vpack.c.bf16 %v813_v54, %v809_v53  ;;  %v821_v2 = vld [vmem:[#allocation8 + $0xa0] sm:$0xff] }
 0x1a9   :  { %v3877_v33 = vpack.c.bf16 %v4351_v14, %v4349_v4  ;;  %vm1120_vm14 = vcmp.ge.s32.totalorder %v1085_v55, %v5129_v10  ;;  %v3887_v0 = vpack.c.bf16 %v822_v58, %v818_v57  ;;  %vm6837_vm9 = vcmask 130048   ;;  %v826_v3 = vld [vmem:[#allocation8 + $0xc8] sm:$0xff] }
 0x1aa   :  { %3872 = vmatprep.subr.bf16.mxu0 %v3871_v9  ;;  %4343 = vmatprep.subr.bf16.mxu1 %v3871_v9  ;;  %v3875_v41 = vpack.c.bf16 %v4352_v25, %v4350_v6  ;;  %v830_v4 = vld [vmem:[#allocation8 + $0xe8] sm:$0xff]  ;;  %v6841_v7 = vmov 0  ;;  %v3889_v9 = vpack.c.bf16 %v821_v2, %v817_v1  ;;  %v1087_v14 = vadd.s32 232, %v5135_v12 }
 0x1ab   :  { %3874 = vmatpush1.bf16.msra.mxu0 %v3873_v5  ;;  %4344 = vmatpush1.bf16.msra.mxu1 %v3873_v5  ;;  %v5369_v5 = vsel %vm5164_vm11, 1.0, %v6711_v13  ;;  %v3891_v17 = vpack.c.bf16 %v830_v4, %v826_v3  ;;  %v834_v25 = vld [vmem:[#allocation8 + $0x108] sm:$0xff]  ;;  %v5421_v54 = vsel %vm5182_vm2, 1.0, %v6711_v13  ;;  %v1089_v58 = vadd.s32 248, %v5135_v12 }
 0x1ac   :  { %3880 = vmatprep.subr.bf16.mxu0 %v3879_v21  ;;  %3876 = vmatprep.subr.bf16.mxu1 %v3875_v41  ;;  %6839 = vst [vmem:[#allocation36_spill] sm:$0xff] %v5369_v5  ;;  %v825_v21 = vld [vmem:[#allocation8 + $0xc0] sm:$0xff]  ;;  %v3895_v38 = vpack.c.bf16 %v838_v26, %v834_v25  ;;  %v846_v53 = vld [vmem:[#allocation8 + $0x168] sm:$0xff]  ;;  %6853 = vst [vmem:[#allocation42_spill] sm:$0xff] %v5421_v54  ;;  %v5446_v3 = vsel %vm5186_vm3, 1.0, %v6711_v13  ;;  %vm6935_vm2 = vcmask 130048  }
 0x1ad   :  { %v3893_v34 = vpack.c.bf16 %v829_v22, %v825_v21  ;;  %v833_v41 = vld [vmem:[#allocation8 + $0x100] sm:$0xff]  ;;  %v850_v1 = vld [vmem:[#allocation8 + $0x188] sm:$0xff]  ;;  %6860 = vst [vmem:[#allocation45_spill] sm:$0xff] %v5446_v3  ;;  %vm6936_vm3 = vmmov %vm6935_vm2 }
 0x1ae   :  { %3417 = vmatmul.mubr.msk.f32.vlgmr.msra.gmra.mrb[4].mxu0 %vm6830_vm10, %v5315_v42  ;;  %3441 = vmatmul.mubr.msk.f32.vlgmr.msra.gmra.mrb[4].mxu1 %vm6831_vm1, %v5320_v46  ;;  %vm5353_vm10 = vmand %vm1119_vm0, %vm1152_vm8  ;;  %vm1153_vm1 = vcmp.lt.s32.totalorder %v1085_v55, %v5132_v11  ;;  %v854_v2 = vld [vmem:[#allocation8 + $0x1a8] sm:$0xff]  ;;  %v849_v21 = vld [vmem:[#allocation8 + $0x180] sm:$0xff] }
 0x1af   :  { %3878 = vmatpush1.bf16.msra.mxu1 %v3877_v33  ;;  %1421 = vmatprep.mubr.f32.mxu0 %v6711_v13  ;;  %v6835_v61 = vsel %vm5353_vm10, 4294967295, %v6834_v61  ;;  %vm6838_vm0 = vmmov %vm6837_vm9  ;;  %v5374_v6 = vsel %vm5353_vm10, 1.0, %v6711_v13  ;;  %vm6844_vm10 = vcmask 130048   ;;  %v6848_v33 = vmov 0  ;;  %v853_v22 = vld [vmem:[#allocation8 + $0x1a0] sm:$0xff]  ;;  %v858_v25 = vld [vmem:[#allocation8 + $0x1c8] sm:$0xff] }
 0x1b0   :  { %1565 = vmatprep.mubr.f32.mxu1 %v6711_v13  ;;  %3882 = vmatpush1.bf16.msra.mxu0 %v3881_v51  ;;  %6836 = vst [vmem:[#allocation35_spill] sm:$0xff] %v6835_v61  ;;  %6840 = vst [vmem:[#allocation37_spill] sm:$0xff] %v5374_v6  ;;  %v837_v51 = vld [vmem:[#allocation8 + $0x120] sm:$0xff]  ;;  %v862_v26 = vld [vmem:[#allocation8 + $0x1e8] sm:$0xff] }
 0x1b1   :  { %3884 = vmatprep.subr.bf16.mxu0 %v3883_v52  ;;  %4008 = vmatprep.subr.bf16.mxu1 %v4007_v56  ;;  %vm5380_vm8 = vmand %vm1120_vm14, %vm1153_vm1  ;;  %vm1155_vm14 = vcmp.lt.s32.totalorder %v1087_v14, %v5132_v11  ;;  %vm6851_vm1 = vcmask 130048   ;;  %v842_v52 = vld [vmem:[#allocation8 + $0x148] sm:$0xff]  ;;  %v6855_v56 = vmov 0  ;;  %v3897_v57 = vpack.c.bf16 %v837_v51, %v833_v41 }
 0x1b2   :  { %3418 = vmatmul.mubr.msk.f32.gmra.mrb[6].mxu0 %vm6837_vm9, %v5341_v59  ;;  %3442 = vmatmul.mubr.msk.f32.gmra.mrb[6].mxu1 %vm6838_vm0, %v5346_v60  ;;  %v6842_v7 = vsel %vm5380_vm8, 4294967295, %v6841_v7  ;;  %vm1121_vm9 = vcmp.ge.s32.totalorder %v1086_v63, %v5129_v10  ;;  %vm1154_vm0 = vcmp.lt.s32.totalorder %v1086_v63, %v5132_v11  ;;  %vm6845_vm11 = vmmov %vm6844_vm10  ;;  %v5401_v30 = vsel %vm5380_vm8, 1.0, %v6711_v13  ;;  %v841_v63 = vld [vmem:[#allocation8 + $0x140] sm:$0xff]  ;;  %v5857_v61 = vld [vmem:[#allocation5 + $0x1a8] sm:$0xff] }
 0x1b3   :  { %1427 = vmatprep.mubr.f32.mxu0 %v6711_v13  ;;  %1571 = vmatprep.mubr.f32.mxu1 %v6711_v13  ;;  %6843 = vst [vmem:[#allocation38_spill] sm:$0xff] %v6842_v7  ;;  %6847 = vst [vmem:[#allocation40_spill] sm:$0xff] %v5401_v30  ;;  %vm6865_vm8 = vcmask 130048   ;;  %v3905_v41 = vpack.c.bf16 %v853_v22, %v849_v21  ;;  %v3907_v51 = vpack.c.bf16 %v862_v26, %v858_v25  ;;  %v803_v21 = vld [vmem:[#allocation8 + $0x10] sm:$0xff]  ;;  %v878_v25 = vld [vmem:[#allocation8 + $0x268] sm:$0xff] }
 0x1b4   :  { %3886 = vmatpush1.bf16.msra.mxu0 %v3885_v62  ;;  %v3899_v62 = vpack.c.bf16 %v846_v53, %v842_v52  ;;  %v857_v52 = vld [vmem:[#allocation8 + $0x1c0] sm:$0xff]  ;;  %v807_v22 = vld [vmem:[#allocation8 + $0x30] sm:$0xff]  ;;  %v812_v26 = vld [vmem:[#allocation8 + $0x58] sm:$0xff] }
 0x1b5   :  { %3888 = vmatprep.subr.bf16.mxu0 %v3887_v0  ;;  %v845_v0 = vld [vmem:[#allocation8 + $0x160] sm:$0xff]  ;;  %v4011_v49 = vpack.c.bf16 %v816_v8, %v812_v26  ;;  %v819_v26 = vld [vmem:[#allocation8 + $0x90] sm:$0xff]  ;;  %v5848_v7 = vld [vmem:[#allocation5 + $0x188] sm:$0xff] }
 0x1b6   :  { %3419 = vmatmul.mubr.msk.f32.gmra.mrb[8].mxu0 %vm6844_vm10, %v5369_v5  ;;  %3443 = vmatmul.mubr.msk.f32.gmra.mrb[8].mxu1 %vm6845_vm11, %v5374_v6  ;;  %vm5405_vm10 = vmand %vm1121_vm9, %vm1154_vm0  ;;  %vm1122_vm11 = vcmp.ge.s32.totalorder %v1087_v14, %v5129_v10  ;;  %v3901_v14 = vpack.c.bf16 %v845_v0, %v841_v63  ;;  %v861_v53 = vld [vmem:[#allocation8 + $0x1e0] sm:$0xff] }
 0x1b7   :  { %1433 = vmatprep.mubr.f32.mxu0 %v6711_v13  ;;  %1577 = vmatprep.mubr.f32.mxu1 %v6711_v13  ;;  %v6849_v33 = vsel %vm5405_vm10, 4294967295, %v6848_v33  ;;  %vm6852_vm9 = vmmov %vm6851_vm1  ;;  %v5426_v55 = vsel %vm5405_vm10, 1.0, %v6711_v13  ;;  %vm6858_vm10 = vcmask 130048   ;;  %v3909_v0 = vpack.c.bf16 %v861_v53, %v857_v52  ;;  %v873_v52 = vld [vmem:[#allocation8 + $0x240] sm:$0xff] }
 0x1b8   :  { %6850 = vst [vmem:[#allocation41_spill] sm:$0xff] %v6849_v33  ;;  %3890 = vmatpush1.bf16.msra.mxu0 %v3889_v9  ;;  %6854 = vst [vmem:[#allocation43_spill] sm:$0xff] %v5426_v55  ;;  %v6862_v9 = vmov 0  ;;  %v877_v53 = vld [vmem:[#allocation8 + $0x260] sm:$0xff]  ;;  %v5821_v33 = vld [vmem:[#allocation5 + $0x128] sm:$0xff] }
 0x1b9   :  { %3892 = vmatprep.subr.bf16.mxu0 %v3891_v17  ;;  %vm5430_vm0 = vmand %vm1122_vm11, %vm1155_vm14  ;;  %vm1124_vm14 = vcmp.ge.s32.totalorder %v1089_v58, %v5129_v10  ;;  %v3903_v17 = vpack.c.bf16 %v854_v2, %v850_v1  ;;  %v865_v1 = vld [vmem:[#allocation8 + $0x200] sm:$0xff]  ;;  %v3917_v8 = vpack.c.bf16 %v877_v53, %v873_v52  ;;  %v832_v52 = vld [vmem:[#allocation8 + $0xf8] sm:$0xff] }
 0x1ba   :  { %3420 = vmatmul.mubr.msk.f32.gmra.mrb[10].mxu0 %vm6851_vm1, %v5396_v29  ;;  %3444 = vmatmul.mubr.msk.f32.gmra.mrb[10].mxu1 %vm6852_vm9, %v5401_v30  ;;  %v6856_v56 = vsel %vm5430_vm0, 4294967295, %v6855_v56  ;;  %vm1123_vm1 = vcmp.ge.s32.totalorder %v1088_v37, %v5129_v10  ;;  %vm1156_vm9 = vcmp.lt.s32.totalorder %v1088_v37, %v5132_v11  ;;  %vm6859_vm11 = vmmov %vm6858_vm10  ;;  %v5451_v4 = vsel %vm5430_vm0, 1.0, %v6711_v13  ;;  %v869_v2 = vld [vmem:[#allocation8 + $0x220] sm:$0xff] }
 0x1bb   :  { %1439 = vmatprep.mubr.f32.mxu0 %v6711_v13  ;;  %1583 = vmatprep.mubr.f32.mxu1 %v6711_v13  ;;  %6857 = vst [vmem:[#allocation44_spill] sm:$0xff] %v6856_v56  ;;  %6861 = vst [vmem:[#allocation46_spill] sm:$0xff] %v5451_v4  ;;  %v894_v56 = vld [vmem:[#allocation8 + $0x2e8] sm:$0xff] }
 0x1bc   :  { %3894 = vmatpush1.bf16.msra.mxu0 %v3893_v34  ;;  %vm6866_vm0 = vmmov %vm6865_vm8  ;;  %v5470_v34 = vsel %vm5200_vm15, 1.0, %v6711_v13  ;;  %vm6924_vm15 = vcmask 130048  }
 0x1bd   :  { %3896 = vmatprep.subr.bf16.mxu0 %v3895_v38  ;;  %6867 = vst [vmem:[#allocation48_spill] sm:$0xff] %v5470_v34  ;;  %v6869_v38 = vmov 0 }
 0x1be   :  { %3421 = vmatmul.mubr.msk.f32.gmra.mrb[12].mxu0 %vm6858_vm10, %v5421_v54  ;;  %3445 = vmatmul.mubr.msk.f32.gmra.mrb[12].mxu1 %vm6859_vm11, %v5426_v55  ;;  %vm5455_vm10 = vmand %vm1123_vm1, %vm1156_vm9  ;;  %vm1157_vm11 = vcmp.lt.s32.totalorder %v1089_v58, %v5132_v11  ;;  %v870_v58 = vld [vmem:[#allocation8 + $0x228] sm:$0xff]  ;;  %vm6873_vm9 = vnez %v6796_v28 }
 0x1bf   :  { %1445 = vmatprep.mubr.f32.mxu0 %v6711_v13  ;;  %1589 = vmatprep.mubr.f32.mxu1 %v6711_v13  ;;  %v6863_v9 = vsel %vm5455_vm10, 4294967295, %v6862_v9  ;;  %v5475_v37 = vsel %vm5455_vm10, 1.0, %v6711_v13  ;;  %vm6872_vm1 = vmmov %vm6866_vm0  ;;  %vm6888_vm10 = vnez %v6808_v36  ;;  %v5812_v36 = vld [vmem:[#allocation5 + $0x108] sm:$0xff] }
 0x1c0   :  { %6864 = vst [vmem:[#allocation47_spill] sm:$0xff] %v6863_v9  ;;  %3898 = vmatpush1.bf16.msra.mxu0 %v3897_v57  ;;  %6868 = vst [vmem:[#allocation49_spill] sm:$0xff] %v5475_v37  ;;  %v866_v57 = vld [vmem:[#allocation8 + $0x208] sm:$0xff]  ;;  %v824_v9 = vld [vmem:[#allocation8 + $0xb8] sm:$0xff] }
 0x1c1   :  { %3900 = vmatprep.subr.bf16.mxu0 %v3899_v62  ;;  %v5490_v62 = vsel %vm6873_vm9, 1.0, %v6711_v13  ;;  %vm6929_vm9 = vcmask 130048   ;;  %v5875_v28 = vld [vmem:[#allocation5 + $0x1e8] sm:$0xff] }
 0x1c2   :  { %3422 = vmatmul.mubr.msk.f32.gmra.mrb[14].mxu0 %vm6865_vm8, %v5446_v3  ;;  %3446 = vmatmul.mubr.msk.f32.gmra.mrb[14].mxu1 %vm6866_vm0, %v5451_v4  ;;  %vm5477_vm8 = vmand %vm1124_vm14, %vm1157_vm11  ;;  %6874 = vst [vmem:[#allocation51_spill] sm:$0xff] %v5490_v62 }
 0x1c3   :  { %1451 = vmatprep.mubr.f32.mxu0 %v6711_v13  ;;  %1595 = vmatprep.mubr.f32.mxu1 %v6711_v13  ;;  %v6870_v38 = vsel %vm5477_vm8, 4294967295, %v6869_v38  ;;  %v5495_v63 = vsel %vm5477_vm8, 1.0, %v6711_v13  ;;  %vm6876_vm14 = vmmov %vm6866_vm0  ;;  %vm6885_vm8 = vnez %v6805_v35  ;;  %v5803_v35 = vld [vmem:[#allocation5 + $0xe8] sm:$0xff] }
 0x1c4   :  { %6871 = vst [vmem:[#allocation50_spill] sm:$0xff] %v6870_v38  ;;  %3902 = vmatpush1.bf16.msra.mxu0 %v3901_v14  ;;  %6875 = vst [vmem:[#allocation52_spill] sm:$0xff] %v5495_v63  ;;  %v3911_v14 = vpack.c.bf16 %v870_v58, %v866_v57  ;;  %v4009_v57 = vpack.c.bf16 %v807_v22, %v803_v21  ;;  %v886_v38 = vld [vmem:[#allocation8 + $0x2a8] sm:$0xff] }
 0x1c5   :  { %3904 = vmatprep.subr.bf16.mxu0 %v3903_v17  ;;  %v874_v17 = vld [vmem:[#allocation8 + $0x248] sm:$0xff]  ;;  %vm6877_vm11 = vmmov %vm6866_vm0  ;;  %v3919_v21 = vpack.c.bf16 %v886_v38, %v882_v48  ;;  %v893_v48 = vld [vmem:[#allocation8 + $0x2e0] sm:$0xff] }
 0x1c6   :  { %3423 = vmatmul.mubr.msk.f32.gmra.mrb[16].mxu0 %vm6866_vm0, %v5470_v34  ;;  %3447 = vmatmul.mubr.msk.f32.gmra.mrb[16].mxu1 %vm6872_vm1, %v5475_v37  ;;  %vm6878_vm0 = vnez %v6799_v31  ;;  %v3915_v58 = vpack.c.bf16 %v878_v25, %v874_v17  ;;  %v4013_v17 = vpack.c.bf16 %v815_v47, %v811_v45  ;;  %v890_v22 = vld [vmem:[#allocation8 + $0x2c8] sm:$0xff]  ;;  %v889_v47 = vld [vmem:[#allocation8 + $0x2c0] sm:$0xff] }
 0x1c7   :  { %1457 = vmatprep.mubr.f32.mxu0 %v6711_v13  ;;  %1601 = vmatprep.mubr.f32.mxu1 %v6711_v13  ;;  %v898_v38 = vld [vmem:[#allocation8 + $0x308] sm:$0xff] }
 0x1c8   :  { %3906 = vmatpush1.bf16.msra.mxu0 %v3905_v41  ;;  %v5506_v41 = vsel %vm6878_vm0, 1.0, %v6711_v13  ;;  %vm6914_vm0 = vcmask 130048   ;;  %v5830_v31 = vld [vmem:[#allocation5 + $0x148] sm:$0xff] }
 0x1c9   :  { %3908 = vmatprep.subr.bf16.mxu0 %v3907_v51  ;;  %6879 = vst [vmem:[#allocation53_spill] sm:$0xff] %v5506_v41  ;;  %v3913_v51 = vpack.c.bf16 %v869_v2, %v865_v1  ;;  %v881_v2 = vld [vmem:[#allocation8 + $0x280] sm:$0xff] }
 0x1ca   :  { %3424 = vmatmul.mubr.msk.f32.gmra.mrb[18].mxu0 %vm6876_vm14, %v5490_v62  ;;  %3448 = vmatmul.mubr.msk.f32.gmra.mrb[18].mxu1 %vm6877_vm11, %v5495_v63  ;;  %vm6880_vm14 = vmmov %vm6872_vm1  ;;  %vm6882_vm11 = vnez %v6802_v32  ;;  %v5839_v32 = vld [vmem:[#allocation5 + $0x168] sm:$0xff] }
 0x1cb   :  { %1463 = vmatprep.mubr.f32.mxu0 %v6711_v13  ;;  %1672 = vmatprep.mubr.f32.mxu1 %v6711_v13  ;;  %v820_v13 = vld [vmem:[#allocation8 + $0x98] sm:$0xff] }
 0x1cc   :  { %3910 = vmatpush1.bf16.msra.mxu0 %v3909_v0  ;;  %v6881_v0 = vmov 0.0   ;;  %v4015_v25 = vpack.c.bf16 %v824_v9, %v820_v13  ;;  %v3923_v9 = vpack.c.bf16 %v894_v56, %v890_v22  ;;  %v3925_v56 = vpack.c.bf16 %v893_v48, %v889_v47  ;;  %v848_v47 = vld [vmem:[#allocation8 + $0x178] sm:$0xff] }
 0x1cd   :  { %3912 = vmatprep.subr.bf16.mxu0 %v3911_v14  ;;  %v5517_v1 = vsel %vm6882_vm11, 1.0, %v6881_v0  ;;  %v885_v14 = vld [vmem:[#allocation8 + $0x2a0] sm:$0xff]  ;;  %v5528_v45 = vsel %vm6885_vm8, 1.0, %v6881_v0  ;;  %vm6919_vm11 = vcmask 130048  }
 0x1ce   :  { %3425 = vmatmul.mubr.msk.f32.gmra.mrb[20].mxu0 %vm6872_vm1, %v5506_v41  ;;  %3449 = vmatmul.mubr.msk.f32.vlgmr.msra.gmra.mrb[20].mxu1 %vm6880_vm14, %v5315_v42  ;;  %6883 = vst [vmem:[#allocation54_spill] sm:$0xff] %v5517_v1  ;;  %v823_v42 = vld [vmem:[#allocation8 + $0xb0] sm:$0xff]  ;;  %vm6884_vm14 = vmmov %vm6872_vm1  ;;  %v3921_v13 = vpack.c.bf16 %v885_v14, %v881_v2  ;;  %v840_v2 = vld [vmem:[#allocation8 + $0x138] sm:$0xff] }
 0x1cf   :  { %1469 = vmatprep.mubr.f32.mxu0 %v6881_v0  ;;  %1678 = vmatprep.mubr.f32.mxu1 %v6881_v0  ;;  %6886 = vst [vmem:[#allocation55_spill] sm:$0xff] %v5528_v45  ;;  %v897_v14 = vld [vmem:[#allocation8 + $0x300] sm:$0xff] }
 0x1d0   :  { %3914 = vmatpush1.bf16.msra.mxu0 %v3913_v51  ;;  %4010 = vmatpush1.bf16.msra.mxu1 %v4009_v57  ;;  %v828_v51 = vld [vmem:[#allocation8 + $0xd8] sm:$0xff]  ;;  %v827_v57 = vld [vmem:[#allocation8 + $0xd0] sm:$0xff] }
 0x1d1   :  { %3916 = vmatprep.subr.bf16.mxu0 %v3915_v58  ;;  %4012 = vmatprep.subr.bf16.mxu1 %v4011_v49  ;;  %v4017_v49 = vpack.c.bf16 %v823_v42, %v819_v26  ;;  %v4019_v53 = vpack.c.bf16 %v832_v52, %v828_v51  ;;  %v831_v58 = vld [vmem:[#allocation8 + $0xf0] sm:$0xff]  ;;  %v5539_v42 = vsel %vm6888_vm10, 1.0, %v6881_v0  ;;  %vm6909_vm10 = vcmask 130048  }
 0x1d2   :  { %3426 = vmatmul.mubr.msk.f32.gmra.mrb[22].mxu0 %vm6872_vm1, %v5517_v1  ;;  %3450 = vmatmul.mubr.msk.f32.gmra.mrb[22].mxu1 %vm6884_vm14, %v5341_v59  ;;  %vm6887_vm14 = vmmov %vm6872_vm1  ;;  %v902_v59 = vld [vmem:[#allocation8 + $0x328] sm:$0xff]  ;;  %6889 = vst [vmem:[#allocation56_spill] sm:$0xff] %v5539_v42  ;;  %v835_v51 = vld [vmem:[#allocation8 + $0x110] sm:$0xff] }
 0x1d3   :  { %1475 = vmatprep.mubr.f32.mxu0 %v6881_v0  ;;  %1684 = vmatprep.mubr.f32.mxu1 %v6881_v0  ;;  %v3927_v22 = vpack.c.bf16 %v902_v59, %v898_v38  ;;  %v839_v52 = vld [vmem:[#allocation8 + $0x130] sm:$0xff]  ;;  %v5550_v59 = vsel %vm5254_vm13, 1.0, %v6881_v0  ;;  %vm6897_vm13 = vmmov %vm6872_vm1 }
 0x1d4   :  { %3918 = vmatpush1.bf16.msra.mxu0 %v3917_v8  ;;  %4014 = vmatpush1.bf16.msra.mxu1 %v4013_v17  ;;  %v836_v8 = vld [vmem:[#allocation8 + $0x118] sm:$0xff]  ;;  %v901_v17 = vld [vmem:[#allocation8 + $0x320] sm:$0xff]  ;;  %6891 = vst [vmem:[#allocation57_spill] sm:$0xff] %v5550_v59  ;;  %v4025_v38 = vpack.c.bf16 %v839_v52, %v835_v51  ;;  %v922_v52 = vld [vmem:[#allocation8 + $0x3c8] sm:$0xff] }
 0x1d5   :  { %3920 = vmatprep.subr.bf16.mxu0 %v3919_v21  ;;  %4016 = vmatprep.subr.bf16.mxu1 %v4015_v25  ;;  %v4021_v21 = vpack.c.bf16 %v831_v58, %v827_v57  ;;  %v906_v25 = vld [vmem:[#allocation8 + $0x348] sm:$0xff]  ;;  %v4023_v26 = vpack.c.bf16 %v840_v2, %v836_v8  ;;  %v3929_v48 = vpack.c.bf16 %v901_v17, %v897_v14  ;;  %v843_v8 = vld [vmem:[#allocation8 + $0x150] sm:$0xff]  ;;  %v856_v14 = vld [vmem:[#allocation8 + $0x1b8] sm:$0xff]  ;;  %v1074_v17 = vadd.s32 128, %v5135_v12 }
 0x1d6   :  { %3427 = vmatmul.mubr.msk.f32.gmra.mrb[24].mxu0 %vm6872_vm1, %v5528_v45  ;;  %3451 = vmatmul.mubr.msk.f32.gmra.mrb[24].mxu1 %vm6887_vm14, %v5369_v5  ;;  %vm6890_vm14 = vmmov %vm6872_vm1  ;;  %v910_v5 = vld [vmem:[#allocation8 + $0x368] sm:$0xff]  ;;  %v847_v2 = vld [vmem:[#allocation8 + $0x170] sm:$0xff] }
 0x1d7   :  { %1481 = vmatprep.mubr.f32.mxu0 %v6881_v0  ;;  %1690 = vmatprep.mubr.f32.mxu1 %v6881_v0  ;;  %v914_v57 = vld [vmem:[#allocation8 + $0x388] sm:$0xff] }
 0x1d8   :  { %3922 = vmatpush1.bf16.msra.mxu0 %v3921_v13  ;;  %4018 = vmatpush1.bf16.msra.mxu1 %v4017_v49  ;;  %v844_v13 = vld [vmem:[#allocation8 + $0x158] sm:$0xff]  ;;  %v905_v49 = vld [vmem:[#allocation8 + $0x340] sm:$0xff] }
 0x1d9   :  { %3924 = vmatprep.subr.bf16.mxu0 %v3923_v9  ;;  %4020 = vmatprep.subr.bf16.mxu1 %v4019_v53  ;;  %v909_v9 = vld [vmem:[#allocation8 + $0x360] sm:$0xff]  ;;  %v3931_v53 = vpack.c.bf16 %v910_v5, %v906_v25  ;;  %v4027_v58 = vpack.c.bf16 %v848_v47, %v844_v13  ;;  %v5561_v5 = vsel %vm5258_vm7, 1.0, %v6881_v0  ;;  %v851_v47 = vld [vmem:[#allocation8 + $0x190] sm:$0xff]  ;;  %vm6901_vm7 = vcmp.ge.s32.totalorder %v1074_v17, %v5129_v10 }
 0x1da   :  { %3428 = vmatmul.mubr.msk.f32.gmra.mrb[26].mxu0 %vm6872_vm1, %v5539_v42  ;;  %3452 = vmatmul.mubr.msk.f32.gmra.mrb[26].mxu1 %vm6890_vm14, %v5396_v29  ;;  %vm6892_vm14 = vmmov %vm6872_vm1  ;;  %v918_v29 = vld [vmem:[#allocation8 + $0x3a8] sm:$0xff]  ;;  %6893 = vst [vmem:[#allocation58_spill] sm:$0xff] %v5561_v5  ;;  %v917_v25 = vld [vmem:[#allocation8 + $0x3a0] sm:$0xff] }
 0x1db   :  { %1487 = vmatprep.mubr.f32.mxu0 %v6881_v0  ;;  %1696 = vmatprep.mubr.f32.mxu1 %v6881_v0  ;;  %v3935_v51 = vpack.c.bf16 %v918_v29, %v914_v57  ;;  %v5573_v29 = vsel %vm5272_vm6, 1.0, %v6881_v0  ;;  %v925_v57 = vld [vmem:[#allocation8 + $0x3e0] sm:$0xff]  ;;  %vm6900_vm6 = vcmp.lt.s32.totalorder %v1074_v17, %v5132_v11  ;;  %v871_v17 = vld [vmem:[#allocation8 + $0x230] sm:$0xff] }
 0x1dc   :  { %3926 = vmatpush1.bf16.msra.mxu0 %v3925_v56  ;;  %4022 = vmatpush1.bf16.msra.mxu1 %v4021_v21  ;;  %v852_v56 = vld [vmem:[#allocation8 + $0x198] sm:$0xff]  ;;  %v3933_v21 = vpack.c.bf16 %v909_v9, %v905_v49  ;;  %6895 = vst [vmem:[#allocation59_spill] sm:$0xff] %v5573_v29  ;;  %v1075_v9 = vadd.s32 136, %v5135_v12 }
 0x1dd   :  { %3928 = vmatprep.subr.bf16.mxu0 %v3927_v22  ;;  %4024 = vmatprep.subr.bf16.mxu1 %v4023_v26  ;;  %v913_v22 = vld [vmem:[#allocation8 + $0x380] sm:$0xff]  ;;  %v4029_v26 = vpack.c.bf16 %v847_v2, %v843_v8  ;;  %v4031_v13 = vpack.c.bf16 %v856_v14, %v852_v56  ;;  %v864_v49 = vld [vmem:[#allocation8 + $0x1f8] sm:$0xff]  ;;  %v3939_v8 = vpack.c.bf16 %v926_v39, %v922_v52  ;;  %v930_v2 = vld [vmem:[#allocation8 + $0x408] sm:$0xff]  ;;  %v1076_v52 = vadd.s32 144, %v5135_v12 }
 0x1de   :  { %3429 = vmatmul.mubr.msk.f32.gmra.mrb[28].mxu0 %vm6872_vm1, %v5550_v59  ;;  %3453 = vmatmul.mubr.msk.f32.gmra.mrb[28].mxu1 %vm6892_vm14, %v5421_v54  ;;  %v855_v54 = vld [vmem:[#allocation8 + $0x1b0] sm:$0xff]  ;;  %vm6894_vm14 = vmmov %vm6872_vm1  ;;  %vm1143_vm8 = vcmp.lt.s32.totalorder %v1075_v9, %v5132_v11 }
 0x1df   :  { %1493 = vmatprep.mubr.f32.mxu0 %v6881_v0  ;;  %1702 = vmatprep.mubr.f32.mxu1 %v6881_v0  ;;  %v859_v14 = vld [vmem:[#allocation8 + $0x1d0] sm:$0xff] }
 0x1e0   :  { %3930 = vmatpush1.bf16.msra.mxu0 %v3929_v48  ;;  %4026 = vmatpush1.bf16.msra.mxu1 %v4025_v38  ;;  %v860_v48 = vld [vmem:[#allocation8 + $0x1d8] sm:$0xff]  ;;  %v3937_v38 = vpack.c.bf16 %v917_v25, %v913_v22 }
 0x1e1   :  { %3932 = vmatprep.subr.bf16.mxu0 %v3931_v53  ;;  %4028 = vmatprep.subr.bf16.mxu1 %v4027_v58  ;;  %v921_v53 = vld [vmem:[#allocation8 + $0x3c0] sm:$0xff]  ;;  %v4033_v58 = vpack.c.bf16 %v855_v54, %v851_v47  ;;  %v4035_v56 = vpack.c.bf16 %v864_v49, %v860_v48  ;;  %v868_v22 = vld [vmem:[#allocation8 + $0x218] sm:$0xff]  ;;  %v867_v48 = vld [vmem:[#allocation8 + $0x210] sm:$0xff] }
 0x1e2   :  { %3430 = vmatmul.mubr.msk.f32.gmra.mrb[30].mxu0 %vm6872_vm1, %v5561_v5  ;;  %3454 = vmatmul.mubr.msk.f32.gmra.mrb[30].mxu1 %vm6894_vm14, %v5446_v3  ;;  %v863_v3 = vld [vmem:[#allocation8 + $0x1f0] sm:$0xff]  ;;  %vm6896_vm14 = vmmov %vm6872_vm1  ;;  %v872_v25 = vld [vmem:[#allocation8 + $0x238] sm:$0xff]  ;;  %vm6898_vm1 = vnez %v6820_v44 }
 0x1e3   :  { %1499 = vmatprep.mubr.f32.mxu0 %v6881_v0  ;;  %1708 = vmatprep.mubr.f32.mxu1 %v6881_v0  ;;  %v5587_v39 = vsel %vm6898_vm1, 1.0, %v6881_v0  ;;  %v4039_v47 = vpack.c.bf16 %v872_v25, %v868_v22  ;;  %v876_v49 = vld [vmem:[#allocation8 + $0x258] sm:$0xff]  ;;  %v5785_v44 = vld [vmem:[#allocation5 + $0xa8] sm:$0xff] }
 0x1e4   :  { %3934 = vmatpush1.bf16.msra.mxu0 %v3933_v21  ;;  %4030 = vmatpush1.bf16.msra.mxu1 %v4029_v26  ;;  %v934_v21 = vld [vmem:[#allocation8 + $0x428] sm:$0xff]  ;;  %6899 = vst [vmem:[#allocation60_spill] sm:$0xff] %v5587_v39  ;;  %v3941_v26 = vpack.c.bf16 %v925_v57, %v921_v53  ;;  %v4041_v57 = vpack.c.bf16 %v871_v17, %v867_v48  ;;  %v896_v48 = vld [vmem:[#allocation8 + $0x2f8] sm:$0xff] }
 0x1e5   :  { %3936 = vmatprep.subr.bf16.mxu0 %v3935_v51  ;;  %4032 = vmatprep.subr.bf16.mxu1 %v4031_v13  ;;  %v4037_v51 = vpack.c.bf16 %v863_v3, %v859_v14  ;;  %v3943_v13 = vpack.c.bf16 %v934_v21, %v930_v2  ;;  %v875_v2 = vld [vmem:[#allocation8 + $0x250] sm:$0xff]  ;;  %v888_v14 = vld [vmem:[#allocation8 + $0x2b8] sm:$0xff]  ;;  %v6972_v53 = vld [vmem:[#allocation15_spill] sm:$0xff] }
 0x1e6   :  { %3431 = vmatmul.mubr.msk.f32.gmra.mrb[32].mxu0 %vm6896_vm14, %v5573_v29  ;;  %3455 = vmatmul.mubr.msk.f32.gmra.mrb[32].mxu1 %vm6897_vm13, %v5470_v34  ;;  %vm5593_vm14 = vmand %vm6901_vm7, %vm6900_vm6  ;;  %vm1110_vm13 = vcmp.ge.s32.totalorder %v1075_v9, %v5129_v10  ;;  %vm6904_vm7 = vcmask 130048   ;;  %v884_v9 = vld [vmem:[#allocation8 + $0x298] sm:$0xff]  ;;  %v5756_v34 = vld [vmem:[#allocation5 + $0x20] sm:$0xff] }
 0x1e7   :  { %1505 = vmatprep.mubr.f32.mxu0 %v6881_v0  ;;  %1714 = vmatprep.mubr.f32.mxu1 %v6881_v0  ;;  %vm6905_vm6 = vmmov %vm6904_vm7  ;;  %v5609_v3 = vsel %vm5593_vm14, 1.0, %v6881_v0  ;;  %v7045_v22 = vld [vmem:[#allocation54_spill] sm:$0xff] }
 0x1e8   :  { %3938 = vmatpush1.bf16.msra.mxu0 %v3937_v38  ;;  %4034 = vmatpush1.bf16.msra.mxu1 %v4033_v58  ;;  %v880_v38 = vld [vmem:[#allocation8 + $0x278] sm:$0xff]  ;;  %6906 = vst [vmem:[#allocation61_spill] sm:$0xff] %v5609_v3  ;;  %vm5615_vm1 = vmand %vm1110_vm13, %vm1143_vm8  ;;  %v1077_v58 = vadd.s32 152, %v5135_v12 }
 0x1e9   :  { %3940 = vmatprep.subr.bf16.mxu0 %v3939_v8  ;;  %4036 = vmatprep.subr.bf16.mxu1 %v4035_v56  ;;  %v4043_v8 = vpack.c.bf16 %v880_v38, %v876_v49  ;;  %v879_v56 = vld [vmem:[#allocation8 + $0x270] sm:$0xff]  ;;  %vm6910_vm8 = vmmov %vm6909_vm10  ;;  %v5631_v21 = vsel %vm5615_vm1, 1.0, %v6881_v0 }
 0x1ea   :  { %3432 = vmatmul.mubr.msk.f32.gmra.mrb[34].mxu0 %vm6904_vm7, %v5587_v39  ;;  %3456 = vmatmul.mubr.msk.f32.gmra.mrb[34].mxu1 %vm6905_vm6, %v5490_v62  ;;  %vm1111_vm7 = vcmp.ge.s32.totalorder %v1076_v52, %v5129_v10  ;;  %vm1144_vm6 = vcmp.lt.s32.totalorder %v1076_v52, %v5132_v11  ;;  %6911 = vst [vmem:[#allocation62_spill] sm:$0xff] %v5631_v21  ;;  %v892_v52 = vld [vmem:[#allocation8 + $0x2d8] sm:$0xff]  ;;  %v950_v62 = vld [vmem:[#allocation8 + $0x4a8] sm:$0xff] }
 0x1eb   :  { %1511 = vmatprep.mubr.f32.mxu0 %v6881_v0  ;;  %1720 = vmatprep.mubr.f32.mxu1 %v6881_v0  ;;  %vm5635_vm13 = vmand %vm1111_vm7, %vm1144_vm6  ;;  %v4045_v25 = vpack.c.bf16 %v879_v56, %v875_v2  ;;  %v895_v2 = vld [vmem:[#allocation8 + $0x2f0] sm:$0xff]  ;;  %v900_v56 = vld [vmem:[#allocation8 + $0x318] sm:$0xff] }
 0x1ec   :  { %3942 = vmatpush1.bf16.msra.mxu0 %v3941_v26  ;;  %4038 = vmatpush1.bf16.msra.mxu1 %v4037_v51  ;;  %v1078_v26 = vadd.s32 160, %v5135_v12  ;;  %v4047_v51 = vpack.c.bf16 %v888_v14, %v884_v9  ;;  %vm6915_vm7 = vmmov %vm6914_vm0  ;;  %v5651_v17 = vsel %vm5635_vm13, 1.0, %v6881_v0  ;;  %v904_v9 = vld [vmem:[#allocation8 + $0x338] sm:$0xff] }
 0x1ed   :  { %3944 = vmatprep.subr.bf16.mxu0 %v3943_v13  ;;  %4040 = vmatprep.subr.bf16.mxu1 %v4039_v47  ;;  %v883_v13 = vld [vmem:[#allocation8 + $0x290] sm:$0xff]  ;;  %6916 = vst [vmem:[#allocation63_spill] sm:$0xff] %v5651_v17 }
 0x1ee   :  { %3433 = vmatmul.mubr.msk.f32.gmra.mrb[36].mxu0 %vm6909_vm10, %v5609_v3  ;;  %3457 = vmatmul.mubr.msk.f32.gmra.mrb[36].mxu1 %vm6910_vm8, %v5506_v41  ;;  %vm1112_vm10 = vcmp.ge.s32.totalorder %v1077_v58, %v5129_v10  ;;  %vm1145_vm8 = vcmp.lt.s32.totalorder %v1077_v58, %v5132_v11  ;;  %v887_v47 = vld [vmem:[#allocation8 + $0x2b0] sm:$0xff]  ;;  %v4051_v58 = vpack.c.bf16 %v896_v48, %v892_v52  ;;  %v908_v48 = vld [vmem:[#allocation8 + $0x358] sm:$0xff]  ;;  %v941_v41 = vld [vmem:[#allocation8 + $0x460] sm:$0xff] }
 0x1ef   :  { %1517 = vmatprep.mubr.f32.mxu0 %v6881_v0  ;;  %1726 = vmatprep.mubr.f32.mxu1 %v6881_v0  ;;  %vm5653_vm6 = vmand %vm1112_vm10, %vm1145_vm8  ;;  %v4049_v38 = vpack.c.bf16 %v887_v47, %v883_v13  ;;  %v4055_v13 = vpack.c.bf16 %v904_v9, %v900_v56  ;;  %v899_v47 = vld [vmem:[#allocation8 + $0x310] sm:$0xff] }
 0x1f0   :  { %4042 = vmatpush1.bf16.msra.mxu1 %v4041_v57  ;;  %v1079_v57 = vadd.s32 168, %v5135_v12  ;;  %vm6920_vm10 = vmmov %vm6919_vm11  ;;  %v5669_v14 = vsel %vm5653_vm6, 1.0, %v6881_v0  ;;  %v903_v52 = vld [vmem:[#allocation8 + $0x330] sm:$0xff] }
 0x1f1   :  { %4044 = vmatprep.subr.bf16.mxu1 %v4043_v8  ;;  %v891_v8 = vld [vmem:[#allocation8 + $0x2d0] sm:$0xff]  ;;  %6921 = vst [vmem:[#allocation64_spill] sm:$0xff] %v5669_v14 }
 0x1f2   :  { %3434 = vmatmul.mubr.msk.f32.gmra.mrb[38].mxu0 %vm6914_vm0, %v5631_v21  ;;  %3458 = vmatmul.mubr.msk.f32.gmra.mrb[38].mxu1 %vm6915_vm7, %v5517_v1  ;;  %vm1113_vm0 = vcmp.ge.s32.totalorder %v1078_v26, %v5129_v10  ;;  %vm1146_vm7 = vcmp.lt.s32.totalorder %v1078_v26, %v5132_v11  ;;  %v4053_v26 = vpack.c.bf16 %v895_v2, %v891_v8  ;;  %v1081_v8 = vadd.s32 184, %v5135_v12  ;;  %v907_v56 = vld [vmem:[#allocation8 + $0x350] sm:$0xff]  ;;  %v920_v1 = vld [vmem:[#allocation8 + $0x3b8] sm:$0xff] }
 0x1f3   :  { %1523 = vmatprep.mubr.f32.mxu0 %v6881_v0  ;;  %1732 = vmatprep.mubr.f32.mxu1 %v6881_v0  ;;  %vm5671_vm8 = vmand %vm1113_vm0, %vm1146_vm7  ;;  %v911_v9 = vld [vmem:[#allocation8 + $0x370] sm:$0xff] }
 0x1f4   :  { %4046 = vmatpush1.bf16.msra.mxu1 %v4045_v25  ;;  %vm6925_vm0 = vmmov %vm6924_vm15  ;;  %v6979_v49 = vld [vmem:[#allocation17_spill] sm:$0xff] }
 0x1f5   :  { %4048 = vmatprep.subr.bf16.mxu1 %v4047_v51  ;;  %v1080_v51 = vadd.s32 176, %v5135_v12  ;;  %v6982_v25 = vld [vmem:[#allocation29_spill] sm:$0xff] }
 0x1f6   :  { %3435 = vmatmul.mubr.msk.f32.gmra.mrb[40].mxu0 %vm6919_vm11, %v5651_v17  ;;  %3459 = vmatmul.mubr.msk.f32.gmra.mrb[40].mxu1 %vm6920_vm10, %v5528_v45  ;;  %vm1114_vm11 = vcmp.ge.s32.totalorder %v1079_v57, %v5129_v10  ;;  %vm1147_vm10 = vcmp.lt.s32.totalorder %v1079_v57, %v5132_v11  ;;  %v912_v45 = vld [vmem:[#allocation8 + $0x378] sm:$0xff]  ;;  %v6984_v57 = vld [vmem:[#allocation32_spill] sm:$0xff] }
 0x1f7   :  { %1529 = vmatprep.mubr.f32.mxu0 %v6881_v0  ;;  %1738 = vmatprep.mubr.f32.mxu1 %v6881_v0  ;;  %vm5689_vm7 = vmand %vm1114_vm11, %vm1147_vm10  ;;  %v4059_v2 = vpack.c.bf16 %v912_v45, %v908_v48  ;;  %v6932_v45 = vmov 0  ;;  %v924_v48 = vld [vmem:[#allocation8 + $0x3d8] sm:$0xff] }
 0x1f8   :  { %4050 = vmatpush1.bf16.msra.mxu1 %v4049_v38  ;;  %v5687_v38 = vsel %vm5671_vm8, 1.0, %v6881_v0  ;;  %vm6930_vm11 = vmmov %vm6929_vm9 }
 0x1f9   :  { %4052 = vmatprep.subr.bf16.mxu1 %v4051_v58  ;;  %6926 = vst [vmem:[#allocation65_spill] sm:$0xff] %v5687_v38  ;;  %v4057_v58 = vpack.c.bf16 %v903_v52, %v899_v47  ;;  %v915_v47 = vld [vmem:[#allocation8 + $0x390] sm:$0xff] }
 0x1fa   :  { %3436 = vmatmul.mubr.msk.f32.gmra.mrb[42].mxu0 %vm6924_vm15, %v5669_v14  ;;  %3460 = vmatmul.mubr.msk.f32.gmra.mrb[42].mxu1 %vm6925_vm0, %v5539_v42  ;;  %vm1115_vm15 = vcmp.ge.s32.totalorder %v1080_v51, %v5129_v10  ;;  %vm1148_vm0 = vcmp.lt.s32.totalorder %v1080_v51, %v5132_v11  ;;  %v916_v42 = vld [vmem:[#allocation8 + $0x398] sm:$0xff]  ;;  %v4061_v51 = vpack.c.bf16 %v911_v9, %v907_v56  ;;  %v919_v52 = vld [vmem:[#allocation8 + $0x3b0] sm:$0xff]  ;;  %v5739_v56 = vld [vmem:[#allocation5 + $0x8] sm:$0xff] }
 0x1fb   :  { %1535 = vmatprep.mubr.f32.mxu0 %v6881_v0  ;;  %1744 = vmatprep.mubr.f32.mxu1 %v6881_v0  ;;  %vm5707_vm10 = vmand %vm1115_vm15, %vm1148_vm0  ;;  %v929_v9 = vld [vmem:[#allocation8 + $0x400] sm:$0xff] }
 0x1fc   :  { %4054 = vmatpush1.bf16.msra.mxu1 %v4053_v26  ;;  %v5705_v26 = vsel %vm5689_vm7, 1.0, %v6881_v0  ;;  %v6933_v45 = vsel %vm5707_vm10, 4294967295, %v6932_v45  ;;  %vm6943_vm0 = vmmov %vm6935_vm2 }
 0x1fd   :  { %4056 = vmatprep.subr.bf16.mxu1 %v4055_v13  ;;  %6931 = vst [vmem:[#allocation66_spill] sm:$0xff] %v5705_v26  ;;  %6934 = vst [vmem:[#allocation67_spill] sm:$0xff] %v6933_v45  ;;  %v4063_v13 = vpack.c.bf16 %v920_v1, %v916_v42  ;;  %v4065_v1 = vpack.c.bf16 %v919_v52, %v915_v47  ;;  %v942_v47 = vld [vmem:[#allocation8 + $0x468] sm:$0xff]  ;;  %v5747_v52 = vld [vmem:[#allocation5] sm:$0xff] }
 0x1fe   :  { %3437 = vmatmul.mubr.msk.f32.gmra.mrb[44].mxu0 %vm6929_vm9, %v5687_v38  ;;  %3461 = vmatmul.mubr.msk.f32.gmra.mrb[44].mxu1 %vm6930_vm11, %v5550_v59  ;;  %vm1116_vm9 = vcmp.ge.s32.totalorder %v1081_v8, %v5129_v10  ;;  %vm1149_vm11 = vcmp.lt.s32.totalorder %v1081_v8, %v5132_v11  ;;  %v928_v59 = vld [vmem:[#allocation8 + $0x3f8] sm:$0xff]  ;;  %v5722_v10 = vsel %vm5707_vm10, 1.0, %v6881_v0  ;;  %v6938_v11 = vmov 0  ;;  %v927_v8 = vld [vmem:[#allocation8 + $0x3f0] sm:$0xff] }
 0x1ff   :  { %1541 = vmatprep.mubr.f32.mxu0 %v6881_v0  ;;  %1750 = vmatprep.mubr.f32.mxu1 %v6881_v0  ;;  %6937 = vst [vmem:[#allocation68_spill] sm:$0xff] %v5722_v10  ;;  %vm5724_vm15 = vmand %vm1116_vm9, %vm1149_vm11  ;;  %v4067_v42 = vpack.c.bf16 %v928_v59, %v924_v48  ;;  %v932_v48 = vld [vmem:[#allocation8 + $0x418] sm:$0xff] }
 0x200   :  { %4058 = vmatpush1.bf16.msra.mxu1 %v4057_v58  ;;  %v6939_v11 = vsel %vm5724_vm15, 4294967295, %v6938_v11  ;;  %v923_v58 = vld [vmem:[#allocation8 + $0x3d0] sm:$0xff]  ;;  %vm6944_vm9 = vmmov %vm6943_vm0  ;;  %v6093_v45 = vld [vmem:[#allocation5 + $0xd8] sm:$0xff] }
 0x201   :  { %4060 = vmatprep.subr.bf16.mxu1 %v4059_v2  ;;  %6940 = vst [vmem:[#allocation69_spill] sm:$0xff] %v6939_v11  ;;  %v5737_v2 = vsel %vm5724_vm15, 1.0, %v6881_v0  ;;  %v4069_v59 = vpack.c.bf16 %v927_v8, %v923_v58  ;;  %v5749_v58 = vld [vmem:[#allocation5 + $0x28] sm:$0xff]  ;;  %vm6945_vm11 = vmmov %vm6943_vm0 }
 0x202   :  { %3438 = vmatmul.mubr.msk.f32.gmra.mrb[46].mxu0 %vm6935_vm2, %v5705_v26  ;;  %3462 = vmatmul.mubr.msk.f32.gmra.mrb[46].mxu1 %vm6936_vm3, %v5561_v5  ;;  %vm6941_vm3 = vmmov %vm6935_vm2  ;;  %6942 = vst [vmem:[#allocation70_spill] sm:$0xff] %v5737_v2  ;;  %v937_v5 = vld [vmem:[#allocation8 + $0x440] sm:$0xff] }
 0x203   :  { %1547 = vmatprep.mubr.f32.mxu0 %v6881_v0  ;;  %1756 = vmatprep.mubr.f32.mxu1 %v6881_v0 }
 0x204   :  { %4062 = vmatpush1.bf16.msra.mxu1 %v4061_v51  ;;  %v933_v51 = vld [vmem:[#allocation8 + $0x420] sm:$0xff] }
 0x205   :  { %4064 = vmatprep.subr.bf16.mxu1 %v4063_v13  ;;  %v938_v13 = vld [vmem:[#allocation8 + $0x448] sm:$0xff]  ;;  %v3945_v8 = vpack.c.bf16 %v933_v51, %v929_v9 }
 0x206   :  { %3439 = vmatmul.mubr.msk.f32.gmra.mrb[48].mxu0 %vm6935_vm2, %v5722_v10  ;;  %3463 = vmatmul.mubr.msk.f32.gmra.mrb[48].mxu1 %vm6941_vm3, %v5573_v29  ;;  %v3947_v29 = vpack.c.bf16 %v942_v47, %v938_v13  ;;  %v5758_v9 = vld [vmem:[#allocation5 + $0x48] sm:$0xff]  ;;  %v945_v13 = vld [vmem:[#allocation8 + $0x480] sm:$0xff]  ;;  %vm6946_vm2 = vmmov %vm6943_vm0 }
 0x207   :  { %1553 = vmatprep.mubr.f32.mxu0 %v6881_v0  ;;  %1762 = vmatprep.mubr.f32.mxu1 %v6881_v0  ;;  %v949_v47 = vld [vmem:[#allocation8 + $0x4a0] sm:$0xff]  ;;  %vm6947_vm3 = vmmov %vm6943_vm0 }
 0x208   :  { %4066 = vmatpush1.bf16.msra.mxu1 %v4065_v1  ;;  %v936_v1 = vld [vmem:[#allocation8 + $0x438] sm:$0xff] }
 0x209   :  { %4068 = vmatprep.subr.bf16.mxu1 %v4067_v42  ;;  %v4071_v42 = vpack.c.bf16 %v936_v1, %v932_v48  ;;  %v954_v48 = vld [vmem:[#allocation8 + $0x4c8] sm:$0xff] }
 0x20a   :  { %3440 = vmatmul.mubr.msk.f32.gmra.mrb[50].mxu0 %vm6943_vm0, %v5737_v2  ;;  %3464 = vmatmul.mubr.msk.f32.gmra.mrb[50].mxu1 %vm6944_vm9, %v5587_v39  ;;  %v946_v39 = vld [vmem:[#allocation8 + $0x488] sm:$0xff]  ;;  %vm6948_vm9 = vmmov %vm6943_vm0 }
 0x20b   :  { %1768 = vmatprep.mubr.f32.mxu1 %v6881_v0  ;;  %1929 = vmatprep.mubr.f32.mxu0 %v5739_v56  ;;  %v3951_v51 = vpack.c.bf16 %v950_v62, %v946_v39  ;;  %v958_v1 = vld [vmem:[#allocation8 + $0x4e8] sm:$0xff] }
 0x20c   :  { %4070 = vmatpush1.bf16.msra.mxu1 %v4069_v59  ;;  %v3949_v59 = vpack.c.bf16 %v941_v41, %v937_v5  ;;  %v3953_v41 = vpack.c.bf16 %v949_v47, %v945_v13  ;;  %v3955_v62 = vpack.c.bf16 %v958_v1, %v954_v48  ;;  %v953_v5 = vld [vmem:[#allocation8 + $0x4c0] sm:$0xff]  ;;  %v962_v39 = vld [vmem:[#allocation8 + $0x508] sm:$0xff] }
 0x20d   :  { %4072 = vmatprep.subr.bf16.mxu1 %v4071_v42  ;;  %v966_v42 = vld [vmem:[#allocation8 + $0x528] sm:$0xff]  ;;  %v961_v13 = vld [vmem:[#allocation8 + $0x500] sm:$0xff] }
 0x20e   :  { %3465 = vmatmul.mubr.msk.f32.gmra.mrb[52].mxu1 %vm6945_vm11, %v5609_v3  ;;  %1930 = vmatmul.mubr.f32.vlgmr.msra.gmra.mrb[4].mxu0 %v5747_v52  ;;  %v5767_v3 = vld [vmem:[#allocation5 + $0x68] sm:$0xff]  ;;  %v965_v47 = vld [vmem:[#allocation8 + $0x520] sm:$0xff]  ;;  %vm6949_vm11 = vmmov %vm6943_vm0 }
 0x20f   :  { %1774 = vmatprep.mubr.f32.mxu1 %v6881_v0  ;;  %1935 = vmatprep.mubr.f32.mxu0 %v5749_v58  ;;  %v970_v48 = vld [vmem:[#allocation8 + $0x548] sm:$0xff] }
 0x210   :  { %3946 = vmatpush1.bf16.msra.mxu0 %v3945_v8  ;;  %v5765_v8 = vld [vmem:[#allocation5 + $0x40] sm:$0xff]  ;;  %v974_v1 = vld [vmem:[#allocation8 + $0x568] sm:$0xff] }
 0x211   :  { %3948 = vmatprep.subr.bf16.mxu0 %v3947_v29  ;;  %v957_v29 = vld [vmem:[#allocation8 + $0x4e0] sm:$0xff] }
 0x212   :  { %3466 = vmatmul.mubr.msk.f32.gmra.mrb[54].mxu1 %vm6946_vm2, %v5631_v21  ;;  %1936 = vmatmul.mubr.f32.gmra.mrb[6].mxu0 %v5756_v34  ;;  %v5774_v21 = vld [vmem:[#allocation5 + $0x60] sm:$0xff]  ;;  %vm6950_vm2 = vmmov %vm6943_vm0 }
 0x213   :  { %1780 = vmatprep.mubr.f32.mxu1 %v6881_v0  ;;  %1941 = vmatprep.mubr.f32.mxu0 %v5758_v9 }
 0x214   :  { %3950 = vmatpush1.bf16.msra.mxu0 %v3949_v59  ;;  %v3957_v59 = vpack.c.bf16 %v957_v29, %v953_v5  ;;  %v969_v5 = vld [vmem:[#allocation8 + $0x540] sm:$0xff] }
 0x215   :  { %3952 = vmatprep.subr.bf16.mxu0 %v3951_v51  ;;  %v3959_v51 = vpack.c.bf16 %v966_v42, %v962_v39  ;;  %v973_v29 = vld [vmem:[#allocation8 + $0x560] sm:$0xff]  ;;  %v978_v39 = vld [vmem:[#allocation8 + $0x588] sm:$0xff] }
 0x216   :  { %3467 = vmatmul.mubr.msk.f32.gmra.mrb[56].mxu1 %vm6947_vm3, %v5651_v17  ;;  %1942 = vmatmul.mubr.f32.gmra.mrb[8].mxu0 %v5765_v8  ;;  %v5783_v17 = vld [vmem:[#allocation5 + $0x80] sm:$0xff]  ;;  %v982_v42 = vld [vmem:[#allocation8 + $0x5a8] sm:$0xff]  ;;  %vm6951_vm3 = vmmov %vm6943_vm0 }
 0x217   :  { %1786 = vmatprep.mubr.f32.mxu1 %v6881_v0  ;;  %1947 = vmatprep.mubr.f32.mxu0 %v5767_v3 }
 0x218   :  { %3954 = vmatpush1.bf16.msra.mxu0 %v3953_v41  ;;  %v3961_v41 = vpack.c.bf16 %v965_v47, %v961_v13  ;;  %v977_v13 = vld [vmem:[#allocation8 + $0x580] sm:$0xff] }
 0x219   :  { %3956 = vmatprep.subr.bf16.mxu0 %v3955_v62  ;;  %v3963_v62 = vpack.c.bf16 %v974_v1, %v970_v48  ;;  %v981_v47 = vld [vmem:[#allocation8 + $0x5a0] sm:$0xff]  ;;  %v986_v48 = vld [vmem:[#allocation8 + $0x5c8] sm:$0xff] }
 0x21a   :  { %3468 = vmatmul.mubr.msk.f32.gmra.mrb[58].mxu1 %vm6943_vm0, %v5669_v14  ;;  %1948 = vmatmul.mubr.f32.gmra.mrb[10].mxu0 %v5774_v21  ;;  %v5792_v14 = vld [vmem:[#allocation5 + $0xa0] sm:$0xff]  ;;  %v990_v1 = vld [vmem:[#allocation8 + $0x5e8] sm:$0xff] }
 0x21b   :  { %1792 = vmatprep.mubr.f32.mxu1 %v6881_v0  ;;  %1953 = vmatprep.mubr.f32.mxu0 %v5776_v43 }
 0x21c   :  { %3958 = vmatpush1.bf16.msra.mxu0 %v3957_v59  ;;  %v3965_v59 = vpack.c.bf16 %v973_v29, %v969_v5  ;;  %v985_v5 = vld [vmem:[#allocation8 + $0x5c0] sm:$0xff] }
 0x21d   :  { %3960 = vmatprep.subr.bf16.mxu0 %v3959_v51  ;;  %v3967_v51 = vpack.c.bf16 %v982_v42, %v978_v39  ;;  %v989_v29 = vld [vmem:[#allocation8 + $0x5e0] sm:$0xff]  ;;  %v994_v39 = vld [vmem:[#allocation8 + $0x608] sm:$0xff] }
 0x21e   :  { %3469 = vmatmul.mubr.msk.f32.gmra.mrb[60].mxu1 %vm6948_vm9, %v5687_v38  ;;  %1954 = vmatmul.mubr.f32.gmra.mrb[12].mxu0 %v5783_v17  ;;  %v5801_v38 = vld [vmem:[#allocation5 + $0xc0] sm:$0xff]  ;;  %v998_v42 = vld [vmem:[#allocation8 + $0x628] sm:$0xff]  ;;  %vm6952_vm9 = vmmov %vm6943_vm0 }
 0x21f   :  { %1798 = vmatprep.mubr.f32.mxu1 %v6881_v0  ;;  %1959 = vmatprep.mubr.f32.mxu0 %v5785_v44 }
 0x220   :  { %3962 = vmatpush1.bf16.msra.mxu0 %v3961_v41  ;;  %v3969_v41 = vpack.c.bf16 %v981_v47, %v977_v13  ;;  %v993_v13 = vld [vmem:[#allocation8 + $0x600] sm:$0xff] }
 0x221   :  { %3964 = vmatprep.subr.bf16.mxu0 %v3963_v62  ;;  %v3971_v62 = vpack.c.bf16 %v990_v1, %v986_v48  ;;  %v997_v47 = vld [vmem:[#allocation8 + $0x620] sm:$0xff]  ;;  %v1002_v48 = vld [vmem:[#allocation8 + $0x648] sm:$0xff] }
 0x222   :  { %3470 = vmatmul.mubr.msk.f32.gmra.mrb[62].mxu1 %vm6949_vm11, %v5705_v26  ;;  %1960 = vmatmul.mubr.f32.gmra.mrb[14].mxu0 %v5792_v14  ;;  %v5810_v26 = vld [vmem:[#allocation5 + $0xe0] sm:$0xff]  ;;  %v1006_v1 = vld [vmem:[#allocation8 + $0x668] sm:$0xff]  ;;  %vm6953_vm11 = vmmov %vm6943_vm0 }
 0x223   :  { %1804 = vmatprep.mubr.f32.mxu1 %v6881_v0  ;;  %1965 = vmatprep.mubr.f32.mxu0 %v5794_v40 }
 0x224   :  { %3966 = vmatpush1.bf16.msra.mxu0 %v3965_v59  ;;  %v3973_v59 = vpack.c.bf16 %v989_v29, %v985_v5  ;;  %v1001_v5 = vld [vmem:[#allocation8 + $0x640] sm:$0xff] }
 0x225   :  { %3968 = vmatprep.subr.bf16.mxu0 %v3967_v51  ;;  %v3975_v51 = vpack.c.bf16 %v998_v42, %v994_v39  ;;  %v1005_v29 = vld [vmem:[#allocation8 + $0x660] sm:$0xff]  ;;  %v1010_v39 = vld [vmem:[#allocation8 + $0x688] sm:$0xff] }
 0x226   :  { %3471 = vmatmul.mubr.msk.f32.gmra.mrb[64].mxu1 %vm6950_vm2, %v5722_v10  ;;  %1966 = vmatmul.mubr.f32.gmra.mrb[16].mxu0 %v5801_v38  ;;  %v5819_v10 = vld [vmem:[#allocation5 + $0x100] sm:$0xff]  ;;  %v1014_v42 = vld [vmem:[#allocation8 + $0x6a8] sm:$0xff]  ;;  %vm6954_vm2 = vmmov %vm6943_vm0 }
 0x227   :  { %1810 = vmatprep.mubr.f32.mxu1 %v6881_v0  ;;  %1971 = vmatprep.mubr.f32.mxu0 %v5803_v35 }
 0x228   :  { %3970 = vmatpush1.bf16.msra.mxu0 %v3969_v41  ;;  %v3977_v41 = vpack.c.bf16 %v997_v47, %v993_v13  ;;  %v1009_v13 = vld [vmem:[#allocation8 + $0x680] sm:$0xff] }
 0x229   :  { %3972 = vmatprep.subr.bf16.mxu0 %v3971_v62  ;;  %v3979_v62 = vpack.c.bf16 %v1006_v1, %v1002_v48  ;;  %v1013_v47 = vld [vmem:[#allocation8 + $0x6a0] sm:$0xff]  ;;  %v1018_v48 = vld [vmem:[#allocation8 + $0x6c8] sm:$0xff] }
 0x22a   :  { %3472 = vmatmul.mubr.msk.f32.gmra.mrb[66].mxu1 %vm6951_vm3, %v5737_v2  ;;  %1972 = vmatmul.mubr.f32.gmra.mrb[18].mxu0 %v5810_v26  ;;  %v5828_v2 = vld [vmem:[#allocation5 + $0x120] sm:$0xff]  ;;  %v1022_v1 = vld [vmem:[#allocation8 + $0x6e8] sm:$0xff]  ;;  %vm6955_vm3 = vmmov %vm6943_vm0 }
 0x22b   :  { %1816 = vmatprep.mubr.f32.mxu1 %v6881_v0  ;;  %1977 = vmatprep.mubr.f32.mxu0 %v5812_v36 }
 0x22c   :  { %3974 = vmatpush1.bf16.msra.mxu0 %v3973_v59  ;;  %v3981_v59 = vpack.c.bf16 %v1005_v29, %v1001_v5  ;;  %v1017_v5 = vld [vmem:[#allocation8 + $0x6c0] sm:$0xff] }
 0x22d   :  { %3976 = vmatprep.subr.bf16.mxu0 %v3975_v51  ;;  %v3983_v51 = vpack.c.bf16 %v1014_v42, %v1010_v39  ;;  %v1021_v29 = vld [vmem:[#allocation8 + $0x6e0] sm:$0xff]  ;;  %v1026_v39 = vld [vmem:[#allocation8 + $0x708] sm:$0xff] }
 0x22e   :  { %3473 = vmatmul.mubr.msk.f32.gmra.mrb[68].mxu1 %vm6943_vm0, %v5320_v46  ;;  %1978 = vmatmul.mubr.f32.gmra.mrb[20].mxu0 %v5819_v10  ;;  %v5837_v46 = vld [vmem:[#allocation5 + $0x140] sm:$0xff]  ;;  %v1030_v42 = vld [vmem:[#allocation8 + $0x728] sm:$0xff] }
 0x22f   :  { %1822 = vmatprep.mubr.f32.mxu1 %v6881_v0  ;;  %1983 = vmatprep.mubr.f32.mxu0 %v5821_v33 }
 0x230   :  { %3978 = vmatpush1.bf16.msra.mxu0 %v3977_v41  ;;  %v3985_v41 = vpack.c.bf16 %v1013_v47, %v1009_v13  ;;  %v1025_v13 = vld [vmem:[#allocation8 + $0x700] sm:$0xff] }
 0x231   :  { %3980 = vmatprep.subr.bf16.mxu0 %v3979_v62  ;;  %v3987_v62 = vpack.c.bf16 %v1022_v1, %v1018_v48  ;;  %v1029_v47 = vld [vmem:[#allocation8 + $0x720] sm:$0xff]  ;;  %v1034_v48 = vld [vmem:[#allocation8 + $0x748] sm:$0xff] }
 0x232   :  { %3474 = vmatmul.mubr.msk.f32.gmra.mrb[70].mxu1 %vm6952_vm9, %v5346_v60  ;;  %1984 = vmatmul.mubr.f32.gmra.mrb[22].mxu0 %v5828_v2  ;;  %v5846_v60 = vld [vmem:[#allocation5 + $0x160] sm:$0xff]  ;;  %v1038_v1 = vld [vmem:[#allocation8 + $0x768] sm:$0xff]  ;;  %vm6956_vm9 = vmmov %vm6943_vm0 }
 0x233   :  { %1828 = vmatprep.mubr.f32.mxu1 %v6881_v0  ;;  %1989 = vmatprep.mubr.f32.mxu0 %v5830_v31 }
 0x234   :  { %3982 = vmatpush1.bf16.msra.mxu0 %v3981_v59  ;;  %v3989_v59 = vpack.c.bf16 %v1021_v29, %v1017_v5  ;;  %v1033_v5 = vld [vmem:[#allocation8 + $0x740] sm:$0xff] }
 0x235   :  { %3984 = vmatprep.subr.bf16.mxu0 %v3983_v51  ;;  %v3991_v51 = vpack.c.bf16 %v1030_v42, %v1026_v39  ;;  %v1037_v29 = vld [vmem:[#allocation8 + $0x760] sm:$0xff]  ;;  %v1042_v39 = vld [vmem:[#allocation8 + $0x788] sm:$0xff] }
 0x236   :  { %3475 = vmatmul.mubr.msk.f32.gmra.mrb[72].mxu1 %vm6953_vm11, %v5374_v6  ;;  %1990 = vmatmul.mubr.f32.gmra.mrb[24].mxu0 %v5837_v46  ;;  %v5855_v6 = vld [vmem:[#allocation5 + $0x180] sm:$0xff]  ;;  %v1046_v42 = vld [vmem:[#allocation8 + $0x7a8] sm:$0xff]  ;;  %vm6957_vm11 = vmmov %vm6943_vm0 }
 0x237   :  { %1834 = vmatprep.mubr.f32.mxu1 %v6881_v0  ;;  %1995 = vmatprep.mubr.f32.mxu0 %v5839_v32 }
 0x238   :  { %3986 = vmatpush1.bf16.msra.mxu0 %v3985_v41  ;;  %v3993_v41 = vpack.c.bf16 %v1029_v47, %v1025_v13  ;;  %v1041_v13 = vld [vmem:[#allocation8 + $0x780] sm:$0xff] }
 0x239   :  { %3988 = vmatprep.subr.bf16.mxu0 %v3987_v62  ;;  %v3995_v62 = vpack.c.bf16 %v1038_v1, %v1034_v48  ;;  %v1045_v47 = vld [vmem:[#allocation8 + $0x7a0] sm:$0xff]  ;;  %v1050_v48 = vld [vmem:[#allocation8 + $0x7c8] sm:$0xff] }
 0x23a   :  { %3476 = vmatmul.mubr.msk.f32.gmra.mrb[74].mxu1 %vm6954_vm2, %v5401_v30  ;;  %1996 = vmatmul.mubr.f32.gmra.mrb[26].mxu0 %v5846_v60  ;;  %v5864_v30 = vld [vmem:[#allocation5 + $0x1a0] sm:$0xff]  ;;  %v1054_v1 = vld [vmem:[#allocation8 + $0x7e8] sm:$0xff]  ;;  %vm4263_vm2 = vmpackc.low %vm5615_vm1, %vm5593_vm14  ;;  %vm6973_vm1 = vnez %v6972_v53 }
 0x23b   :  { %1840 = vmatprep.mubr.f32.mxu1 %v6881_v0  ;;  %2001 = vmatprep.mubr.f32.mxu0 %v5848_v7  ;;  %vm6974_vm14 = vmpackc.low %vm5168_vm12, %vm6973_vm1  ;;  %v7044_v53 = vld [vmem:[#allocation53_spill] sm:$0xff] }
 0x23c   :  { %3990 = vmatpush1.bf16.msra.mxu0 %v3989_v59  ;;  %v3997_v59 = vpack.c.bf16 %v1037_v29, %v1033_v5  ;;  %v1049_v5 = vld [vmem:[#allocation8 + $0x7c0] sm:$0xff]  ;;  %v4322_v16 = vpack.c.bf16 %v7045_v22, %v7044_v53 }
 0x23d   :  { %3992 = vmatprep.subr.bf16.mxu0 %v3991_v51  ;;  %v3999_v51 = vpack.c.bf16 %v1046_v42, %v1042_v39  ;;  %v1053_v29 = vld [vmem:[#allocation8 + $0x7e0] sm:$0xff]  ;;  %v5884_v42 = vld [vmem:[#allocation5 + $0x208] sm:$0xff] }
 0x23e   :  { %3477 = vmatmul.mubr.msk.f32.gmra.mrb[76].mxu1 %vm6955_vm3, %v5426_v55  ;;  %2002 = vmatmul.mubr.f32.gmra.mrb[28].mxu0 %v5855_v6  ;;  %v5873_v55 = vld [vmem:[#allocation5 + $0x1c0] sm:$0xff]  ;;  %vm4267_vm3 = vmpackc.low %vm5653_vm6, %vm5635_vm13 }
 0x23f   :  { %1846 = vmatprep.mubr.f32.mxu1 %v6881_v0  ;;  %2007 = vmatprep.mubr.f32.mxu0 %v5857_v61  ;;  %v5882_v39 = vld [vmem:[#allocation5 + $0x1e0] sm:$0xff]  ;;  %vm4275_vm13 = vmpackc.low %vm5724_vm15, %vm5707_vm10 }
 0x240   :  { %3994 = vmatpush1.bf16.msra.mxu0 %v3993_v41  ;;  %v4001_v41 = vpack.c.bf16 %v1045_v47, %v1041_v13  ;;  %v935_v13 = vld [vmem:[#allocation8 + $0x430] sm:$0xff]  ;;  %v940_v47 = vld [vmem:[#allocation8 + $0x458] sm:$0xff] }
 0x241   :  { %3996 = vmatprep.subr.bf16.mxu0 %v3995_v62  ;;  %v4003_v62 = vpack.c.bf16 %v1054_v1, %v1050_v48  ;;  %v944_v48 = vld [vmem:[#allocation8 + $0x478] sm:$0xff]  ;;  %v5893_v1 = vld [vmem:[#allocation5 + $0x228] sm:$0xff] }
 0x242   :  { %3478 = vmatmul.mubr.msk.f32.gmra.mrb[78].mxu1 %vm6943_vm0, %v5451_v4  ;;  %2008 = vmatmul.mubr.f32.gmra.mrb[30].mxu0 %v5864_v30  ;;  %v5901_v4 = vld [vmem:[#allocation5 + $0x248] sm:$0xff]  ;;  %vm6970_vm0 = vmpackc.low %vm5150_vm5, %vm5146_vm4  ;;  %vm6978_vm4 = vnez %v6977_v15  ;;  %vm6980_vm5 = vnez %v6979_v49  ;;  %v7046_v15 = vld [vmem:[#allocation37_spill] sm:$0xff] }
 0x243   :  { %1852 = vmatprep.mubr.f32.mxu1 %v6881_v0  ;;  %2013 = vmatprep.mubr.f32.mxu0 %v5866_v27  ;;  %vm6981_vm6 = vmpackc.low %vm6978_vm4, %vm6980_vm5  ;;  %v7047_v49 = vld [vmem:[#allocation40_spill] sm:$0xff] }
 0x244   :  { %3998 = vmatpush1.bf16.msra.mxu0 %v3997_v59  ;;  %v4005_v59 = vpack.c.bf16 %v1053_v29, %v1049_v5  ;;  %v939_v5 = vld [vmem:[#allocation8 + $0x450] sm:$0xff] }
 0x245   :  { %4000 = vmatprep.subr.bf16.mxu0 %v3999_v51  ;;  %v931_v51 = vld [vmem:[#allocation8 + $0x410] sm:$0xff] }
 0x246   :  { %3479 = vmatmul.mubr.msk.f32.gmra.mrb[80].mxu1 %vm6956_vm9, %v5475_v37  ;;  %2014 = vmatmul.mubr.f32.gmra.mrb[32].mxu0 %v5873_v55  ;;  %v943_v29 = vld [vmem:[#allocation8 + $0x470] sm:$0xff]  ;;  %v952_v37 = vld [vmem:[#allocation8 + $0x4b8] sm:$0xff]  ;;  %vm4271_vm9 = vmpackc.low %vm5689_vm7, %vm5671_vm8  ;;  %vm6983_vm8 = vnez %v6982_v25  ;;  %vm6985_vm7 = vnez %v6984_v57  ;;  %v4325_v25 = vpack.c.bf16 %v7047_v49, %v7046_v15 }
 0x247   :  { %1858 = vmatprep.mubr.f32.mxu1 %v6881_v0  ;;  %2019 = vmatprep.mubr.f32.mxu0 %v5875_v28  ;;  %v5891_v0 = vld [vmem:[#allocation5 + $0x200] sm:$0xff] }
 0x248   :  { %4002 = vmatpush1.bf16.msra.mxu0 %v4001_v41  ;;  %v4073_v41 = vpack.c.bf16 %v935_v13, %v931_v51  ;;  %v947_v13 = vld [vmem:[#allocation8 + $0x490] sm:$0xff]  ;;  %v7048_v57 = vld [vmem:[#allocation55_spill] sm:$0xff] }
 0x249   :  { %4004 = vmatprep.subr.bf16.mxu0 %v4003_v62  ;;  %v4075_v62 = vpack.c.bf16 %v944_v48, %v940_v47  ;;  %v951_v47 = vld [vmem:[#allocation8 + $0x4b0] sm:$0xff]  ;;  %v960_v48 = vld [vmem:[#allocation8 + $0x4f8] sm:$0xff] }
 0x24a   :  { %3480 = vmatmul.mubr.msk.f32.gmra.mrb[82].mxu1 %vm6957_vm11, %v5495_v63  ;;  %2020 = vmatmul.mubr.f32.gmra.mrb[34].mxu0 %v5882_v39  ;;  %v948_v63 = vld [vmem:[#allocation8 + $0x498] sm:$0xff]  ;;  %vm4279_vm11 = vmpackc.low %vm6985_vm7, %vm6983_vm8 }
 0x24b   :  { %2025 = vmatprep.mubr.f32.mxu0 %v5884_v42  ;;  %2443 = vmatprep.mubr.f32.mxu1 %v5739_v56  ;;  %v5899_v56 = vld [vmem:[#allocation5 + $0x220] sm:$0xff]  ;;  %v4079_v51 = vpack.c.bf16 %v952_v37, %v948_v63  ;;  %v955_v63 = vld [vmem:[#allocation8 + $0x4d0] sm:$0xff] }
 0x24c   :  { %4006 = vmatpush1.bf16.msra.mxu0 %v4005_v59  ;;  %v4077_v59 = vpack.c.bf16 %v943_v29, %v939_v5  ;;  %v968_v5 = vld [vmem:[#allocation8 + $0x538] sm:$0xff]  ;;  %v5917_v29 = vld [vmem:[#allocation5 + $0x288] sm:$0xff] }
 0x24e   :  { %2026 = vmatmul.mubr.f32.gmra.mrb[36].mxu0 %v5891_v0  ;;  %2444 = vmatmul.mubr.f32.vlgmr.msra.gmra.mrb[20].mxu1 %v5747_v52  ;;  %v956_v52 = vld [vmem:[#allocation8 + $0x4d8] sm:$0xff] }
 0x24f   :  { %2031 = vmatprep.mubr.f32.mxu0 %v5893_v1  ;;  %2449 = vmatprep.mubr.f32.mxu1 %v5749_v58  ;;  %v5907_v58 = vld [vmem:[#allocation5 + $0x240] sm:$0xff]  ;;  %v4083_v37 = vpack.c.bf16 %v960_v48, %v956_v52  ;;  %v976_v52 = vld [vmem:[#allocation8 + $0x578] sm:$0xff]  ;;  %v5925_v48 = vld [vmem:[#allocation5 + $0x2a8] sm:$0xff] }
 0x250   :  { %4074 = vmatpush1.bf16.msra.mxu1 %v4073_v41  ;;  %v4081_v41 = vpack.c.bf16 %v951_v47, %v947_v13  ;;  %v963_v13 = vld [vmem:[#allocation8 + $0x510] sm:$0xff] }
 0x251   :  { %4076 = vmatprep.subr.bf16.mxu1 %v4075_v62  ;;  %v959_v62 = vld [vmem:[#allocation8 + $0x4f0] sm:$0xff] }
 0x252   :  { %2032 = vmatmul.mubr.f32.gmra.mrb[38].mxu0 %v5899_v56  ;;  %2450 = vmatmul.mubr.f32.gmra.mrb[22].mxu1 %v5756_v34  ;;  %v964_v34 = vld [vmem:[#allocation8 + $0x518] sm:$0xff]  ;;  %v967_v47 = vld [vmem:[#allocation8 + $0x530] sm:$0xff] }
 0x253   :  { %2037 = vmatprep.mubr.f32.mxu0 %v5901_v4  ;;  %2455 = vmatprep.mubr.f32.mxu1 %v5758_v9  ;;  %v5915_v9 = vld [vmem:[#allocation5 + $0x260] sm:$0xff] }
 0x254   :  { %4078 = vmatpush1.bf16.msra.mxu1 %v4077_v59  ;;  %v4085_v59 = vpack.c.bf16 %v959_v62, %v955_v63  ;;  %v971_v63 = vld [vmem:[#allocation8 + $0x550] sm:$0xff] }
 0x255   :  { %4080 = vmatprep.subr.bf16.mxu1 %v4079_v51  ;;  %v4087_v51 = vpack.c.bf16 %v968_v5, %v964_v34  ;;  %v975_v62 = vld [vmem:[#allocation8 + $0x570] sm:$0xff]  ;;  %v984_v34 = vld [vmem:[#allocation8 + $0x5b8] sm:$0xff]  ;;  %v5933_v5 = vld [vmem:[#allocation5 + $0x2c8] sm:$0xff] }
 0x256   :  { %2038 = vmatmul.mubr.f32.gmra.mrb[40].mxu0 %v5907_v58  ;;  %2456 = vmatmul.mubr.f32.gmra.mrb[24].mxu1 %v5765_v8  ;;  %v972_v8 = vld [vmem:[#allocation8 + $0x558] sm:$0xff] }
 0x257   :  { %2043 = vmatprep.mubr.f32.mxu0 %v5909_v50  ;;  %2461 = vmatprep.mubr.f32.mxu1 %v5767_v3  ;;  %v5923_v3 = vld [vmem:[#allocation5 + $0x280] sm:$0xff] }
 0x258   :  { %4082 = vmatpush1.bf16.msra.mxu1 %v4081_v41  ;;  %v4089_v41 = vpack.c.bf16 %v967_v47, %v963_v13  ;;  %v979_v13 = vld [vmem:[#allocation8 + $0x590] sm:$0xff] }
 0x259   :  { %4084 = vmatprep.subr.bf16.mxu1 %v4083_v37  ;;  %v4091_v37 = vpack.c.bf16 %v976_v52, %v972_v8  ;;  %v983_v47 = vld [vmem:[#allocation8 + $0x5b0] sm:$0xff]  ;;  %v992_v8 = vld [vmem:[#allocation8 + $0x5f8] sm:$0xff]  ;;  %v5941_v52 = vld [vmem:[#allocation5 + $0x2e8] sm:$0xff] }
 0x25a   :  { %2044 = vmatmul.mubr.f32.gmra.mrb[42].mxu0 %v5915_v9  ;;  %2462 = vmatmul.mubr.f32.gmra.mrb[26].mxu1 %v5774_v21  ;;  %v980_v21 = vld [vmem:[#allocation8 + $0x598] sm:$0xff] }
 0x25b   :  { %2049 = vmatprep.mubr.f32.mxu0 %v5917_v29  ;;  %2467 = vmatprep.mubr.f32.mxu1 %v5776_v43  ;;  %v5931_v43 = vld [vmem:[#allocation5 + $0x2a0] sm:$0xff] }
 0x25c   :  { %4086 = vmatpush1.bf16.msra.mxu1 %v4085_v59  ;;  %v4093_v59 = vpack.c.bf16 %v975_v62, %v971_v63  ;;  %v987_v63 = vld [vmem:[#allocation8 + $0x5d0] sm:$0xff] }
 0x25d   :  { %4088 = vmatprep.subr.bf16.mxu1 %v4087_v51  ;;  %v4095_v51 = vpack.c.bf16 %v984_v34, %v980_v21  ;;  %v991_v62 = vld [vmem:[#allocation8 + $0x5f0] sm:$0xff]  ;;  %v1000_v21 = vld [vmem:[#allocation8 + $0x638] sm:$0xff]  ;;  %v5949_v34 = vld [vmem:[#allocation5 + $0x308] sm:$0xff] }
 0x25e   :  { %2050 = vmatmul.mubr.f32.gmra.mrb[44].mxu0 %v5923_v3  ;;  %2468 = vmatmul.mubr.f32.gmra.mrb[28].mxu1 %v5783_v17  ;;  %v988_v17 = vld [vmem:[#allocation8 + $0x5d8] sm:$0xff] }
 0x25f   :  { %2055 = vmatprep.mubr.f32.mxu0 %v5925_v48  ;;  %2473 = vmatprep.mubr.f32.mxu1 %v5785_v44  ;;  %v5939_v44 = vld [vmem:[#allocation5 + $0x2c0] sm:$0xff] }
 0x260   :  { %4090 = vmatpush1.bf16.msra.mxu1 %v4089_v41  ;;  %v4097_v41 = vpack.c.bf16 %v983_v47, %v979_v13  ;;  %v995_v13 = vld [vmem:[#allocation8 + $0x610] sm:$0xff] }
 0x261   :  { %4092 = vmatprep.subr.bf16.mxu1 %v4091_v37  ;;  %v4099_v37 = vpack.c.bf16 %v992_v8, %v988_v17  ;;  %v999_v47 = vld [vmem:[#allocation8 + $0x630] sm:$0xff]  ;;  %v1008_v17 = vld [vmem:[#allocation8 + $0x678] sm:$0xff]  ;;  %v5957_v8 = vld [vmem:[#allocation5 + $0x328] sm:$0xff] }
 0x262   :  { %2056 = vmatmul.mubr.f32.gmra.mrb[46].mxu0 %v5931_v43  ;;  %2474 = vmatmul.mubr.f32.gmra.mrb[30].mxu1 %v5792_v14  ;;  %v996_v14 = vld [vmem:[#allocation8 + $0x618] sm:$0xff] }
 0x263   :  { %2061 = vmatprep.mubr.f32.mxu0 %v5933_v5  ;;  %2479 = vmatprep.mubr.f32.mxu1 %v5794_v40  ;;  %v5947_v40 = vld [vmem:[#allocation5 + $0x2e0] sm:$0xff] }
 0x264   :  { %4094 = vmatpush1.bf16.msra.mxu1 %v4093_v59  ;;  %v4101_v59 = vpack.c.bf16 %v991_v62, %v987_v63  ;;  %v1003_v63 = vld [vmem:[#allocation8 + $0x650] sm:$0xff] }
 0x265   :  { %4096 = vmatprep.subr.bf16.mxu1 %v4095_v51  ;;  %v4103_v51 = vpack.c.bf16 %v1000_v21, %v996_v14  ;;  %v1007_v62 = vld [vmem:[#allocation8 + $0x670] sm:$0xff]  ;;  %v1016_v14 = vld [vmem:[#allocation8 + $0x6b8] sm:$0xff]  ;;  %v5965_v21 = vld [vmem:[#allocation5 + $0x348] sm:$0xff] }
 0x266   :  { %2062 = vmatmul.mubr.f32.gmra.mrb[48].mxu0 %v5939_v44  ;;  %2480 = vmatmul.mubr.f32.gmra.mrb[32].mxu1 %v5801_v38  ;;  %v1004_v38 = vld [vmem:[#allocation8 + $0x658] sm:$0xff] }
 0x267   :  { %2067 = vmatprep.mubr.f32.mxu0 %v5941_v52  ;;  %2485 = vmatprep.mubr.f32.mxu1 %v5803_v35  ;;  %v5955_v35 = vld [vmem:[#allocation5 + $0x300] sm:$0xff] }
 0x268   :  { %4098 = vmatpush1.bf16.msra.mxu1 %v4097_v41  ;;  %v4105_v41 = vpack.c.bf16 %v999_v47, %v995_v13  ;;  %v1011_v13 = vld [vmem:[#allocation8 + $0x690] sm:$0xff] }
 0x269   :  { %4100 = vmatprep.subr.bf16.mxu1 %v4099_v37  ;;  %v4107_v37 = vpack.c.bf16 %v1008_v17, %v1004_v38  ;;  %v1015_v47 = vld [vmem:[#allocation8 + $0x6b0] sm:$0xff]  ;;  %v1024_v38 = vld [vmem:[#allocation8 + $0x6f8] sm:$0xff]  ;;  %v5973_v17 = vld [vmem:[#allocation5 + $0x368] sm:$0xff] }
 0x26a   :  { %2068 = vmatmul.mubr.f32.gmra.mrb[50].mxu0 %v5947_v40  ;;  %2486 = vmatmul.mubr.f32.gmra.mrb[34].mxu1 %v5810_v26  ;;  %v1012_v26 = vld [vmem:[#allocation8 + $0x698] sm:$0xff] }
 0x26b   :  { %2073 = vmatprep.mubr.f32.mxu0 %v5949_v34  ;;  %2491 = vmatprep.mubr.f32.mxu1 %v5812_v36  ;;  %v5963_v36 = vld [vmem:[#allocation5 + $0x320] sm:$0xff] }
 0x26c   :  { %4102 = vmatpush1.bf16.msra.mxu1 %v4101_v59  ;;  %v4109_v59 = vpack.c.bf16 %v1007_v62, %v1003_v63  ;;  %v1019_v63 = vld [vmem:[#allocation8 + $0x6d0] sm:$0xff] }
 0x26d   :  { %4104 = vmatprep.subr.bf16.mxu1 %v4103_v51  ;;  %v4111_v51 = vpack.c.bf16 %v1016_v14, %v1012_v26  ;;  %v1023_v62 = vld [vmem:[#allocation8 + $0x6f0] sm:$0xff]  ;;  %v1032_v26 = vld [vmem:[#allocation8 + $0x738] sm:$0xff]  ;;  %v5981_v14 = vld [vmem:[#allocation5 + $0x388] sm:$0xff] }
 0x26e   :  { %2074 = vmatmul.mubr.f32.gmra.mrb[52].mxu0 %v5955_v35  ;;  %2492 = vmatmul.mubr.f32.gmra.mrb[36].mxu1 %v5819_v10  ;;  %v1020_v10 = vld [vmem:[#allocation8 + $0x6d8] sm:$0xff] }
 0x26f   :  { %2079 = vmatprep.mubr.f32.mxu0 %v5957_v8  ;;  %2497 = vmatprep.mubr.f32.mxu1 %v5821_v33  ;;  %v5971_v33 = vld [vmem:[#allocation5 + $0x340] sm:$0xff] }
 0x270   :  { %4106 = vmatpush1.bf16.msra.mxu1 %v4105_v41  ;;  %v4113_v41 = vpack.c.bf16 %v1015_v47, %v1011_v13  ;;  %v1027_v13 = vld [vmem:[#allocation8 + $0x710] sm:$0xff] }
 0x271   :  { %4108 = vmatprep.subr.bf16.mxu1 %v4107_v37  ;;  %v4115_v37 = vpack.c.bf16 %v1024_v38, %v1020_v10  ;;  %v1031_v47 = vld [vmem:[#allocation8 + $0x730] sm:$0xff]  ;;  %v1040_v10 = vld [vmem:[#allocation8 + $0x778] sm:$0xff]  ;;  %v5989_v38 = vld [vmem:[#allocation5 + $0x3a8] sm:$0xff] }
 0x272   :  { %2080 = vmatmul.mubr.f32.gmra.mrb[54].mxu0 %v5963_v36  ;;  %2498 = vmatmul.mubr.f32.gmra.mrb[38].mxu1 %v5828_v2  ;;  %v1028_v2 = vld [vmem:[#allocation8 + $0x718] sm:$0xff] }
 0x273   :  { %2085 = vmatprep.mubr.f32.mxu0 %v5965_v21  ;;  %2503 = vmatprep.mubr.f32.mxu1 %v5830_v31  ;;  %v5979_v31 = vld [vmem:[#allocation5 + $0x360] sm:$0xff] }
 0x274   :  { %4110 = vmatpush1.bf16.msra.mxu1 %v4109_v59  ;;  %v4117_v59 = vpack.c.bf16 %v1023_v62, %v1019_v63  ;;  %v1035_v63 = vld [vmem:[#allocation8 + $0x750] sm:$0xff] }
 0x275   :  { %4112 = vmatprep.subr.bf16.mxu1 %v4111_v51  ;;  %v4119_v51 = vpack.c.bf16 %v1032_v26, %v1028_v2  ;;  %v1039_v62 = vld [vmem:[#allocation8 + $0x770] sm:$0xff]  ;;  %v1048_v2 = vld [vmem:[#allocation8 + $0x7b8] sm:$0xff]  ;;  %v5997_v26 = vld [vmem:[#allocation5 + $0x3c8] sm:$0xff] }
 0x276   :  { %2086 = vmatmul.mubr.f32.gmra.mrb[56].mxu0 %v5971_v33  ;;  %2504 = vmatmul.mubr.f32.gmra.mrb[40].mxu1 %v5837_v46  ;;  %v1036_v46 = vld [vmem:[#allocation8 + $0x758] sm:$0xff] }
 0x277   :  { %2091 = vmatprep.mubr.f32.mxu0 %v5973_v17  ;;  %2509 = vmatprep.mubr.f32.mxu1 %v5839_v32  ;;  %v5987_v32 = vld [vmem:[#allocation5 + $0x380] sm:$0xff] }
 0x278   :  { %4114 = vmatpush1.bf16.msra.mxu1 %v4113_v41  ;;  %v4121_v41 = vpack.c.bf16 %v1031_v47, %v1027_v13  ;;  %v1043_v47 = vld [vmem:[#allocation8 + $0x790] sm:$0xff] }
 0x279   :  { %4116 = vmatprep.subr.bf16.mxu1 %v4115_v37  ;;  %v4123_v37 = vpack.c.bf16 %v1040_v10, %v1036_v46  ;;  %v1047_v46 = vld [vmem:[#allocation8 + $0x7b0] sm:$0xff]  ;;  %v1052_v10 = vld [vmem:[#allocation8 + $0x7d8] sm:$0xff] }
 0x27a   :  { %2092 = vmatmul.mubr.f32.gmra.mrb[58].mxu0 %v5979_v31  ;;  %2510 = vmatmul.mubr.f32.gmra.mrb[42].mxu1 %v5846_v60  ;;  %v1044_v60 = vld [vmem:[#allocation8 + $0x798] sm:$0xff] }
 0x27b   :  { %2097 = vmatprep.mubr.f32.mxu0 %v5981_v14  ;;  %2515 = vmatprep.mubr.f32.mxu1 %v5848_v7  ;;  %v5995_v7 = vld [vmem:[#allocation5 + $0x3a0] sm:$0xff] }
 0x27c   :  { %4118 = vmatpush1.bf16.msra.mxu1 %v4117_v59  ;;  %v4125_v59 = vpack.c.bf16 %v1039_v62, %v1035_v63  ;;  %v4129_v63 = vpack.c.bf16 %v1047_v46, %v1043_v47  ;;  %v6033_v46 = vld [vmem:[#allocation5 + $0x38] sm:$0xff] }
 0x27d   :  { %4120 = vmatprep.subr.bf16.mxu1 %v4119_v51  ;;  %v4127_v51 = vpack.c.bf16 %v1048_v2, %v1044_v60  ;;  %v1051_v2 = vld [vmem:[#allocation8 + $0x7d0] sm:$0xff] }
 0x27e   :  { %2098 = vmatmul.mubr.f32.gmra.mrb[60].mxu0 %v5987_v32  ;;  %2516 = vmatmul.mubr.f32.gmra.mrb[44].mxu1 %v5855_v6 }
 0x27f   :  { %2103 = vmatprep.mubr.f32.mxu0 %v5989_v38  ;;  %2521 = vmatprep.mubr.f32.mxu1 %v5857_v61  ;;  %v1056_v61 = vld [vmem:[#allocation8 + $0x7f8] sm:$0xff] }
 0x280   :  { %4122 = vmatpush1.bf16.msra.mxu1 %v4121_v41  ;;  %v6007_v41 = vld [vmem:[#allocation5 + $0x3c0] sm:$0xff]  ;;  %v4131_v62 = vpack.c.bf16 %v1056_v61, %v1052_v10 }
 0x281   :  { %4124 = vmatprep.subr.bf16.mxu1 %v4123_v37  ;;  %v5999_v13 = vpop.f32.mrb[4].mxu1  ;;  %v6009_v37 = vld [vmem:[#allocation5 + $0x3e8] sm:$0xff] }
 0x282   :  { %2104 = vmatmul.mubr.f32.gmra.mrb[62].mxu0 %v5995_v7  ;;  %2522 = vmatmul.mubr.f32.gmra.mrb[46].mxu1 %v5864_v30  ;;  %v6003_v6 = vpop.f32.mrb[5].mxu1  ;;  %v1055_v30 = vld [vmem:[#allocation8 + $0x7f0] sm:$0xff] }
 0x283   :  { %2109 = vmatprep.mubr.f32.mxu0 %v5997_v26  ;;  %2527 = vmatprep.mubr.f32.mxu1 %v5866_v27  ;;  %v6019_v27 = vld [vmem:[#allocation5 + $0x3e0] sm:$0xff] }
 0x284   :  { %4126 = vmatpush1.bf16.msra.mxu1 %v4125_v59  ;;  %v6021_v59 = vld [vmem:[#allocation5 + $0x18] sm:$0xff] }
 0x285   :  { %4128 = vmatprep.subr.bf16.mxu1 %v4127_v51  ;;  %v6011_v60 = vpop.f32.mrb[6].mxu1  ;;  %v4133_v51 = vpack.c.bf16 %v1055_v30, %v1051_v2  ;;  %v6057_v2 = vld [vmem:[#allocation5 + $0x78] sm:$0xff] }
 0x286   :  { %2110 = vmatmul.mubr.f32.gmra.mrb[64].mxu0 %v6007_v41  ;;  %2528 = vmatmul.mubr.f32.gmra.mrb[48].mxu1 %v5873_v55  ;;  %v6015_v18 = vpop.f32.mrb[7].mxu1 }
 0x287   :  { %2115 = vmatprep.mubr.f32.mxu0 %v6009_v37  ;;  %2533 = vmatprep.mubr.f32.mxu1 %v5875_v28  ;;  %v6031_v28 = vld [vmem:[#allocation5 + $0x10] sm:$0xff] }
 0x288   :  { %4130 = vmatpush1.bf16.msra.mxu1 %v4129_v63 }
 0x289   :  { %4132 = vmatprep.subr.bf16.mxu1 %v4131_v62  ;;  %v6023_v47 = vpop.f32.mrb[8].mxu1 }
 0x28a   :  { %2116 = vmatmul.mubr.f32.gmra.mrb[66].mxu0 %v6019_v27  ;;  %2534 = vmatmul.mubr.f32.gmra.mrb[50].mxu1 %v5882_v39  ;;  %v6027_v55 = vpop.f32.mrb[9].mxu1  ;;  %v6043_v39 = vld [vmem:[#allocation5 + $0x30] sm:$0xff] }
 0x28b   :  { %2186 = vmatprep.mubr.f32.mxu0 %v6021_v59  ;;  %2539 = vmatprep.mubr.f32.mxu1 %v5884_v42  ;;  %v6045_v42 = vld [vmem:[#allocation5 + $0x58] sm:$0xff] }
 0x28c   :  { %4134 = vmatpush1.bf16.msra.mxu1 %v4133_v51  ;;  %v6069_v51 = vld [vmem:[#allocation5 + $0x98] sm:$0xff] }
 0x28d   :  { %v6035_v10 = vpop.f32.mrb[10].mxu1 }
 0x28e   :  { %2187 = vmatmul.mubr.f32.vlgmr.msra.gmra.mrb[4].mxu0 %v6031_v28  ;;  %2540 = vmatmul.mubr.f32.gmra.mrb[52].mxu1 %v5891_v0  ;;  %v6039_v61 = vpop.f32.mrb[11].mxu1  ;;  %v6055_v0 = vld [vmem:[#allocation5 + $0x50] sm:$0xff] }
 0x28f   :  { %2192 = vmatprep.mubr.f32.mxu0 %v6033_v46  ;;  %2545 = vmatprep.mubr.f32.mxu1 %v5893_v1 }
 0x291   :  { %v6047_v63 = vpop.f32.mrb[12].mxu1 }
 0x292   :  { %2193 = vmatmul.mubr.f32.gmra.mrb[6].mxu0 %v6043_v39  ;;  %2546 = vmatmul.mubr.f32.gmra.mrb[54].mxu1 %v5899_v56  ;;  %v6051_v62 = vpop.f32.mrb[13].mxu1  ;;  %v6067_v56 = vld [vmem:[#allocation5 + $0x70] sm:$0xff] }
 0x293   :  { %2198 = vmatprep.mubr.f32.mxu0 %v6045_v42  ;;  %2551 = vmatprep.mubr.f32.mxu1 %v5901_v4 }
 0x295   :  { %v6059_v1 = vpop.f32.mrb[14].mxu1 }
 0x296   :  { %2199 = vmatmul.mubr.f32.gmra.mrb[8].mxu0 %v6055_v0  ;;  %2552 = vmatmul.mubr.f32.gmra.mrb[56].mxu1 %v5907_v58  ;;  %v6063_v30 = vpop.f32.mrb[15].mxu1  ;;  %v6079_v58 = vld [vmem:[#allocation5 + $0x90] sm:$0xff] }
 0x297   :  { %2204 = vmatprep.mubr.f32.mxu0 %v6057_v2  ;;  %2557 = vmatprep.mubr.f32.mxu1 %v5909_v50 }
 0x299   :  { %v6071_v4 = vpop.f32.mrb[16].mxu1 }
 0x29a   :  { %2205 = vmatmul.mubr.f32.gmra.mrb[10].mxu0 %v6067_v56  ;;  %2558 = vmatmul.mubr.f32.gmra.mrb[58].mxu1 %v5915_v9  ;;  %v6075_v23 = vpop.f32.mrb[17].mxu1  ;;  %v6091_v9 = vld [vmem:[#allocation5 + $0xb0] sm:$0xff] }
 0x29b   :  { %2210 = vmatprep.mubr.f32.mxu0 %v6069_v51  ;;  %2563 = vmatprep.mubr.f32.mxu1 %v5917_v29  ;;  %v6099_v29 = vld [vmem:[#allocation5 + $0xd0] sm:$0xff] }
 0x29d   :  { %v6083_v50 = vpop.f32.mrb[18].mxu1 }
 0x29e   :  { %2211 = vmatmul.mubr.f32.gmra.mrb[12].mxu0 %v6079_v58  ;;  %2564 = vmatmul.mubr.f32.gmra.mrb[60].mxu1 %v5923_v3  ;;  %v6087_v11 = vpop.f32.mrb[19].mxu1  ;;  %v6101_v3 = vld [vmem:[#allocation5 + $0xf8] sm:$0xff] }
 0x29f   :  { %2216 = vmatprep.mubr.f32.mxu0 %v6081_v24  ;;  %2569 = vmatprep.mubr.f32.mxu1 %v5925_v48  ;;  %v6107_v48 = vld [vmem:[#allocation5 + $0xf0] sm:$0xff] }
 0x2a2   :  { %2217 = vmatmul.mubr.f32.gmra.mrb[14].mxu0 %v6091_v9  ;;  %2570 = vmatmul.mubr.f32.gmra.mrb[62].mxu1 %v5931_v43  ;;  %v6115_v43 = vld [vmem:[#allocation5 + $0x110] sm:$0xff] }
 0x2a3   :  { %2222 = vmatprep.mubr.f32.mxu0 %v6093_v45  ;;  %2575 = vmatprep.mubr.f32.mxu1 %v5933_v5  ;;  %v6117_v5 = vld [vmem:[#allocation5 + $0x138] sm:$0xff] }
 0x2a6   :  { %2223 = vmatmul.mubr.f32.gmra.mrb[16].mxu0 %v6099_v29  ;;  %2576 = vmatmul.mubr.f32.gmra.mrb[64].mxu1 %v5939_v44  ;;  %v6123_v44 = vld [vmem:[#allocation5 + $0x130] sm:$0xff] }
 0x2a7   :  { %2228 = vmatprep.mubr.f32.mxu0 %v6101_v3  ;;  %2581 = vmatprep.mubr.f32.mxu1 %v5941_v52  ;;  %v6125_v52 = vld [vmem:[#allocation5 + $0x158] sm:$0xff] }
 0x2aa   :  { %2229 = vmatmul.mubr.f32.gmra.mrb[18].mxu0 %v6107_v48  ;;  %2582 = vmatmul.mubr.f32.gmra.mrb[66].mxu1 %v5947_v40  ;;  %v6131_v40 = vld [vmem:[#allocation5 + $0x150] sm:$0xff] }
 0x2ab   :  { %2234 = vmatprep.mubr.f32.mxu0 %v6109_v19  ;;  %2587 = vmatprep.mubr.f32.mxu1 %v5949_v34  ;;  %v6133_v34 = vld [vmem:[#allocation5 + $0x178] sm:$0xff] }
 0x2ae   :  { %2235 = vmatmul.mubr.f32.gmra.mrb[20].mxu0 %v6115_v43  ;;  %2588 = vmatmul.mubr.f32.gmra.mrb[68].mxu1 %v5955_v35  ;;  %v6139_v35 = vld [vmem:[#allocation5 + $0x170] sm:$0xff] }
 0x2af   :  { %2240 = vmatprep.mubr.f32.mxu0 %v6117_v5  ;;  %2593 = vmatprep.mubr.f32.mxu1 %v5957_v8  ;;  %v6141_v8 = vld [vmem:[#allocation5 + $0x198] sm:$0xff] }
 0x2b2   :  { %2241 = vmatmul.mubr.f32.gmra.mrb[22].mxu0 %v6123_v44  ;;  %2594 = vmatmul.mubr.f32.gmra.mrb[70].mxu1 %v5963_v36  ;;  %v6147_v36 = vld [vmem:[#allocation5 + $0x190] sm:$0xff] }
 0x2b3   :  { %2246 = vmatprep.mubr.f32.mxu0 %v6125_v52  ;;  %2599 = vmatprep.mubr.f32.mxu1 %v5965_v21  ;;  %v6149_v21 = vld [vmem:[#allocation5 + $0x1b8] sm:$0xff] }
 0x2b6   :  { %2247 = vmatmul.mubr.f32.gmra.mrb[24].mxu0 %v6131_v40  ;;  %2600 = vmatmul.mubr.f32.gmra.mrb[72].mxu1 %v5971_v33  ;;  %v6155_v33 = vld [vmem:[#allocation5 + $0x1b0] sm:$0xff] }
 0x2b7   :  { %2252 = vmatprep.mubr.f32.mxu0 %v6133_v34  ;;  %2605 = vmatprep.mubr.f32.mxu1 %v5973_v17  ;;  %v6157_v17 = vld [vmem:[#allocation5 + $0x1d8] sm:$0xff] }
 0x2ba   :  { %2253 = vmatmul.mubr.f32.gmra.mrb[26].mxu0 %v6139_v35  ;;  %2606 = vmatmul.mubr.f32.gmra.mrb[74].mxu1 %v5979_v31  ;;  %v6163_v31 = vld [vmem:[#allocation5 + $0x1d0] sm:$0xff] }
 0x2bb   :  { %2258 = vmatprep.mubr.f32.mxu0 %v6141_v8  ;;  %2611 = vmatprep.mubr.f32.mxu1 %v5981_v14  ;;  %v6165_v14 = vld [vmem:[#allocation5 + $0x1f8] sm:$0xff] }
 0x2be   :  { %2259 = vmatmul.mubr.f32.gmra.mrb[28].mxu0 %v6147_v36  ;;  %2612 = vmatmul.mubr.f32.gmra.mrb[76].mxu1 %v5987_v32  ;;  %v6171_v32 = vld [vmem:[#allocation5 + $0x1f0] sm:$0xff] }
 0x2bf   :  { %2264 = vmatprep.mubr.f32.mxu0 %v6149_v21  ;;  %2617 = vmatprep.mubr.f32.mxu1 %v5989_v38  ;;  %v6173_v38 = vld [vmem:[#allocation5 + $0x218] sm:$0xff] }
 0x2c2   :  { %2265 = vmatmul.mubr.f32.gmra.mrb[30].mxu0 %v6155_v33  ;;  %2618 = vmatmul.mubr.f32.gmra.mrb[78].mxu1 %v5995_v7  ;;  %v6179_v7 = vld [vmem:[#allocation5 + $0x210] sm:$0xff] }
 0x2c3   :  { %2270 = vmatprep.mubr.f32.mxu0 %v6157_v17  ;;  %2623 = vmatprep.mubr.f32.mxu1 %v5997_v26  ;;  %v6181_v26 = vld [vmem:[#allocation5 + $0x238] sm:$0xff] }
 0x2c6   :  { %2271 = vmatmul.mubr.f32.gmra.mrb[32].mxu0 %v6163_v31  ;;  %2624 = vmatmul.mubr.f32.gmra.mrb[80].mxu1 %v6007_v41  ;;  %v6187_v41 = vld [vmem:[#allocation5 + $0x230] sm:$0xff] }
 0x2c7   :  { %2276 = vmatprep.mubr.f32.mxu0 %v6165_v14  ;;  %2629 = vmatprep.mubr.f32.mxu1 %v6009_v37  ;;  %v6189_v37 = vld [vmem:[#allocation5 + $0x258] sm:$0xff] }
 0x2ca   :  { %2277 = vmatmul.mubr.f32.gmra.mrb[34].mxu0 %v6171_v32  ;;  %2630 = vmatmul.mubr.f32.gmra.mrb[82].mxu1 %v6019_v27  ;;  %v6195_v27 = vld [vmem:[#allocation5 + $0x250] sm:$0xff] }
 0x2cb   :  { %2282 = vmatprep.mubr.f32.mxu0 %v6173_v38  ;;  %2700 = vmatprep.mubr.f32.mxu1 %v6021_v59  ;;  %v6197_v59 = vld [vmem:[#allocation5 + $0x278] sm:$0xff] }
 0x2ce   :  { %2283 = vmatmul.mubr.f32.gmra.mrb[36].mxu0 %v6179_v7  ;;  %2701 = vmatmul.mubr.f32.vlgmr.msra.gmra.mrb[20].mxu1 %v6031_v28  ;;  %v6203_v28 = vld [vmem:[#allocation5 + $0x270] sm:$0xff] }
 0x2cf   :  { %2288 = vmatprep.mubr.f32.mxu0 %v6181_v26  ;;  %2706 = vmatprep.mubr.f32.mxu1 %v6033_v46  ;;  %v6205_v46 = vld [vmem:[#allocation5 + $0x298] sm:$0xff] }
 0x2d2   :  { %2289 = vmatmul.mubr.f32.gmra.mrb[38].mxu0 %v6187_v41  ;;  %2707 = vmatmul.mubr.f32.gmra.mrb[22].mxu1 %v6043_v39  ;;  %v6211_v39 = vld [vmem:[#allocation5 + $0x290] sm:$0xff] }
 0x2d3   :  { %2294 = vmatprep.mubr.f32.mxu0 %v6189_v37  ;;  %2712 = vmatprep.mubr.f32.mxu1 %v6045_v42  ;;  %v6213_v42 = vld [vmem:[#allocation5 + $0x2b8] sm:$0xff] }
 0x2d6   :  { %2295 = vmatmul.mubr.f32.gmra.mrb[40].mxu0 %v6195_v27  ;;  %2713 = vmatmul.mubr.f32.gmra.mrb[24].mxu1 %v6055_v0  ;;  %v6219_v0 = vld [vmem:[#allocation5 + $0x2b0] sm:$0xff] }
 0x2d7   :  { %2300 = vmatprep.mubr.f32.mxu0 %v6197_v59  ;;  %2718 = vmatprep.mubr.f32.mxu1 %v6057_v2  ;;  %v6221_v2 = vld [vmem:[#allocation5 + $0x2d8] sm:$0xff] }
 0x2da   :  { %2301 = vmatmul.mubr.f32.gmra.mrb[42].mxu0 %v6203_v28  ;;  %2719 = vmatmul.mubr.f32.gmra.mrb[26].mxu1 %v6067_v56  ;;  %v6227_v56 = vld [vmem:[#allocation5 + $0x2d0] sm:$0xff] }
 0x2db   :  { %2306 = vmatprep.mubr.f32.mxu0 %v6205_v46  ;;  %2724 = vmatprep.mubr.f32.mxu1 %v6069_v51  ;;  %v6229_v51 = vld [vmem:[#allocation5 + $0x2f8] sm:$0xff] }
 0x2de   :  { %2307 = vmatmul.mubr.f32.gmra.mrb[44].mxu0 %v6211_v39  ;;  %2725 = vmatmul.mubr.f32.gmra.mrb[28].mxu1 %v6079_v58  ;;  %v6237_v58 = vld [vmem:[#allocation5 + $0x318] sm:$0xff] }
 0x2df   :  { %2312 = vmatprep.mubr.f32.mxu0 %v6213_v42  ;;  %2730 = vmatprep.mubr.f32.mxu1 %v6081_v24  ;;  %v6235_v24 = vld [vmem:[#allocation5 + $0x2f0] sm:$0xff] }
 0x2e2   :  { %2313 = vmatmul.mubr.f32.gmra.mrb[46].mxu0 %v6219_v0  ;;  %2731 = vmatmul.mubr.f32.gmra.mrb[30].mxu1 %v6091_v9  ;;  %v776_v9 = vld [vmem:[#allocation5 + $0x338] sm:$0xff] }
 0x2e3   :  { %2318 = vmatprep.mubr.f32.mxu0 %v6221_v2  ;;  %2736 = vmatprep.mubr.f32.mxu1 %v6093_v45  ;;  %v771_v45 = vld [vmem:[#allocation5 + $0x310] sm:$0xff] }
 0x2e6   :  { %2319 = vmatmul.mubr.f32.gmra.mrb[48].mxu0 %v6227_v56  ;;  %2737 = vmatmul.mubr.f32.gmra.mrb[32].mxu1 %v6099_v29  ;;  %v775_v29 = vld [vmem:[#allocation5 + $0x330] sm:$0xff] }
 0x2e7   :  { %2324 = vmatprep.mubr.f32.mxu0 %v6229_v51  ;;  %2742 = vmatprep.mubr.f32.mxu1 %v6101_v3  ;;  %v780_v3 = vld [vmem:[#allocation5 + $0x358] sm:$0xff] }
 0x2ea   :  { %2325 = vmatmul.mubr.f32.gmra.mrb[50].mxu0 %v6235_v24  ;;  %2743 = vmatmul.mubr.f32.gmra.mrb[34].mxu1 %v6107_v48  ;;  %v779_v48 = vld [vmem:[#allocation5 + $0x350] sm:$0xff] }
 0x2eb   :  { %2330 = vmatprep.mubr.f32.mxu0 %v6237_v58  ;;  %2748 = vmatprep.mubr.f32.mxu1 %v6109_v19  ;;  %v783_v19 = vld [vmem:[#allocation5 + $0x370] sm:$0xff] }
 0x2ee   :  { %2331 = vmatmul.mubr.f32.gmra.mrb[52].mxu0 %v771_v45  ;;  %2749 = vmatmul.mubr.f32.gmra.mrb[36].mxu1 %v6115_v43  ;;  %v788_v43 = vld [vmem:[#allocation5 + $0x398] sm:$0xff] }
 0x2ef   :  { %2336 = vmatprep.mubr.f32.mxu0 %v776_v9  ;;  %2754 = vmatprep.mubr.f32.mxu1 %v6117_v5  ;;  %v787_v5 = vld [vmem:[#allocation5 + $0x390] sm:$0xff] }
 0x2f2   :  { %2337 = vmatmul.mubr.f32.gmra.mrb[54].mxu0 %v775_v29  ;;  %2755 = vmatmul.mubr.f32.gmra.mrb[38].mxu1 %v6123_v44  ;;  %v792_v44 = vld [vmem:[#allocation5 + $0x3b8] sm:$0xff] }
 0x2f3   :  { %2342 = vmatprep.mubr.f32.mxu0 %v780_v3  ;;  %2760 = vmatprep.mubr.f32.mxu1 %v6125_v52  ;;  %v791_v52 = vld [vmem:[#allocation5 + $0x3b0] sm:$0xff] }
 0x2f6   :  { %2343 = vmatmul.mubr.f32.gmra.mrb[56].mxu0 %v779_v48  ;;  %2761 = vmatmul.mubr.f32.gmra.mrb[40].mxu1 %v6131_v40  ;;  %v796_v40 = vld [vmem:[#allocation5 + $0x3d8] sm:$0xff] }
 0x2f7   :  { %2348 = vmatprep.mubr.f32.mxu0 %v784_v20  ;;  %2766 = vmatprep.mubr.f32.mxu1 %v6133_v34  ;;  %v795_v34 = vld [vmem:[#allocation5 + $0x3d0] sm:$0xff] }
 0x2fa   :  { %2349 = vmatmul.mubr.f32.gmra.mrb[58].mxu0 %v783_v19  ;;  %2767 = vmatmul.mubr.f32.gmra.mrb[42].mxu1 %v6139_v35  ;;  %v800_v35 = vld [vmem:[#allocation5 + $0x3f8] sm:$0xff] }
 0x2fb   :  { %2354 = vmatprep.mubr.f32.mxu0 %v788_v43  ;;  %2772 = vmatprep.mubr.f32.mxu1 %v6141_v8  ;;  %v799_v8 = vld [vmem:[#allocation5 + $0x3f0] sm:$0xff] }
 0x2fe   :  { %2355 = vmatmul.mubr.f32.gmra.mrb[60].mxu0 %v787_v5  ;;  %2773 = vmatmul.mubr.f32.gmra.mrb[44].mxu1 %v6147_v36 }
 0x2ff   :  { %2360 = vmatprep.mubr.f32.mxu0 %v792_v44  ;;  %2778 = vmatprep.mubr.f32.mxu1 %v6149_v21 }
 0x302   :  { %2361 = vmatmul.mubr.f32.gmra.mrb[62].mxu0 %v791_v52  ;;  %2779 = vmatmul.mubr.f32.gmra.mrb[46].mxu1 %v6155_v33 }
 0x303   :  { %2366 = vmatprep.mubr.f32.mxu0 %v796_v40  ;;  %2784 = vmatprep.mubr.f32.mxu1 %v6157_v17 }
 0x306   :  { %2367 = vmatmul.mubr.f32.gmra.mrb[64].mxu0 %v795_v34  ;;  %2785 = vmatmul.mubr.f32.gmra.mrb[48].mxu1 %v6163_v31 }
 0x307   :  { %2372 = vmatprep.mubr.f32.mxu0 %v800_v35  ;;  %2790 = vmatprep.mubr.f32.mxu1 %v6165_v14 }
 0x30a   :  { %2373 = vmatmul.mubr.f32.gmra.mrb[66].mxu0 %v799_v8  ;;  %2791 = vmatmul.mubr.f32.gmra.mrb[50].mxu1 %v6171_v32 }
 0x30b   :  { %2796 = vmatprep.mubr.f32.mxu1 %v6173_v38 }
 0x30e   :  { %2797 = vmatmul.mubr.f32.gmra.mrb[52].mxu1 %v6179_v7 }
 0x30f   :  { %2802 = vmatprep.mubr.f32.mxu1 %v6181_v26 }
 0x312   :  { %2803 = vmatmul.mubr.f32.gmra.mrb[54].mxu1 %v6187_v41 }
 0x313   :  { %2808 = vmatprep.mubr.f32.mxu1 %v6189_v37 }
 0x316   :  { %2809 = vmatmul.mubr.f32.gmra.mrb[56].mxu1 %v6195_v27 }
 0x317   :  { %2814 = vmatprep.mubr.f32.mxu1 %v6197_v59 }
 0x31a   :  { %2815 = vmatmul.mubr.f32.gmra.mrb[58].mxu1 %v6203_v28 }
 0x31b   :  { %2820 = vmatprep.mubr.f32.mxu1 %v6205_v46  ;;  %v6278_v46 = vld [vmem:[%s6684_s5] sm:$0xf]  ;;  %s5018_s5 = smov [#allocation10]  }
 0x31c   :  { %s3374_s21 = sshll.u32 %s5018_s5, 4  ;;  %s3375_s21 = int_to_ptr.vmem [resolvable:$true] %s3374_s21 }
 0x31d   :  { %s4979_s22 = scalar_lea.vmem %s3375_s21, 32  ;;  %p4984_p5 = scmp.lt.s32.totalorder %s3375_s21, %s3375_s21 }
 0x31e   :  { %2821 = vmatmul.mubr.f32.gmra.mrb[60].mxu1 %v6211_v39  ;;  %p4980_p4 = scmp.ne.s32.totalorder %s3375_s21, %s4979_s22  ;;  %p4985_p6 = scmp.lt.s32.totalorder %s4979_s22, %s4979_s22 }
 0x31f   :  { %2826 = vmatprep.mubr.f32.mxu1 %v6213_v42 }
 0x320   :  { %p4986_p7 = por %p4985_p6, %p4984_p5 }
 0x322   :  { %2827 = vmatmul.mubr.f32.gmra.mrb[62].mxu1 %v6219_v0  ;;  %p4987_p8 = pnand %p4986_p7, %p4980_p4 }
 0x323   :  { %2832 = vmatprep.mubr.f32.mxu1 %v6221_v2  ;;  %v6958_v2 = vsub.s32 1, %v5135_v12 }
 0x326   :  { %2833 = vmatmul.mubr.f32.gmra.mrb[64].mxu1 %v6227_v56  ;;  %v3030_v56 = vrot.slane %v6278_v46, %v6958_v2 }
 0x327   :  { %2838 = vmatprep.mubr.f32.mxu1 %v6229_v51 }
 0x328   :  { %3107 = vmatprep.mubr.f32.mxu0 %v3030_v56 }
 0x32a   :  { %2839 = vmatmul.mubr.f32.gmra.mrb[66].mxu1 %v6235_v24 }
 0x32b   :  { %2844 = vmatprep.mubr.f32.mxu1 %v6237_v58 }
 0x32e   :  { %2845 = vmatmul.mubr.f32.gmra.mrb[68].mxu1 %v771_v45 }
 0x32f   :  { %2850 = vmatprep.mubr.f32.mxu1 %v776_v9 }
 0x332   :  { %2851 = vmatmul.mubr.f32.gmra.mrb[70].mxu1 %v775_v29 }
 0x333   :  { %2856 = vmatprep.mubr.f32.mxu1 %v780_v3 }
 0x336   :  { %2857 = vmatmul.mubr.f32.gmra.mrb[72].mxu1 %v779_v48 }
 0x337   :  { %2862 = vmatprep.mubr.f32.mxu1 %v784_v20 }
 0x33a   :  { %2863 = vmatmul.mubr.f32.gmra.mrb[74].mxu1 %v783_v19 }
 0x33b   :  { %2868 = vmatprep.mubr.f32.mxu1 %v788_v43 }
 0x33e   :  { %2869 = vmatmul.mubr.f32.gmra.mrb[76].mxu1 %v787_v5 }
 0x33f   :  { %2874 = vmatprep.mubr.f32.mxu1 %v792_v44 }
 0x342   :  { %2875 = vmatmul.mubr.f32.gmra.mrb[78].mxu1 %v791_v52 }
 0x343   :  { %2880 = vmatprep.mubr.f32.mxu1 %v796_v40 }
 0x346   :  { %2881 = vmatmul.mubr.f32.gmra.mrb[80].mxu1 %v795_v34 }
 0x347   :  { %2886 = vmatprep.mubr.f32.mxu1 %v800_v35 }
 0x34a   :  { %2887 = vmatmul.mubr.f32.gmra.mrb[82].mxu1 %v799_v8 }
 0x361   :  { %v2188_v36 = vpop.f32.mrb[4].mxu0 }
 0x362   :  { %v2190_v21 = vpop.f32.mrb[5].mxu0  ;;  %4629 = vtanh.f32 %v2188_v36 }
 0x363   :  { %4631 = vtanh.f32 %v2190_v21 }
 0x365   :  { %v2194_v33 = vpop.f32.mrb[6].mxu0 }
 0x366   :  { %4633 = vtanh.f32 %v2194_v33  ;;  %v2196_v17 = vpop.f32.mrb[7].mxu0 }
 0x367   :  { %4635 = vtanh.f32 %v2196_v17 }
 0x369   :  { %v2200_v31 = vpop.f32.mrb[8].mxu0 }
 0x36a   :  { %v2202_v14 = vpop.f32.mrb[9].mxu0  ;;  %4637 = vtanh.f32 %v2200_v31 }
 0x36b   :  { %4639 = vtanh.f32 %v2202_v14 }
 0x36c   :  { %v4630_v32 = vpop.eup %4629 }
 0x36d   :  { %v2206_v20 = vpop.f32.mrb[10].mxu0  ;;  %v4632_v7 = vpop.eup %4631 }
 0x36e   :  { %4641 = vtanh.f32 %v2206_v20  ;;  %v2208_v38 = vpop.f32.mrb[11].mxu0 }
 0x36f   :  { %4643 = vtanh.f32 %v2208_v38 }
 0x370   :  { %v4634_v26 = vpop.eup %4633 }
 0x371   :  { %v4636_v41 = vpop.eup %4635  ;;  %v2212_v37 = vpop.f32.mrb[12].mxu0  ;;  %v4137_v27 = vpack.c.bf16 %v4634_v26, %v4630_v32 }
 0x372   :  { %v2214_v59 = vpop.f32.mrb[13].mxu0  ;;  %v4135_v28 = vpack.c.bf16 %v4636_v41, %v4632_v7  ;;  %4645 = vtanh.f32 %v2212_v37 }
 0x373   :  { %4647 = vtanh.f32 %v2214_v59 }
 0x374   :  { %4136 = vmatprep.subr.bf16.mxu0 %v4135_v28  ;;  %v4638_v42 = vpop.eup %4637 }
 0x375   :  { %v2218_v39 = vpop.f32.mrb[14].mxu0  ;;  %4138 = vmatpush1.bf16.xpose.msra.mxu0 %v4137_v27  ;;  %v4640_v51 = vpop.eup %4639 }
 0x376   :  { %4649 = vtanh.f32 %v2218_v39  ;;  %v2220_v0 = vpop.f32.mrb[15].mxu0 }
 0x377   :  { %4651 = vtanh.f32 %v2220_v0 }
 0x378   :  { %v4642_v24 = vpop.eup %4641 }
 0x379   :  { %v4644_v58 = vpop.eup %4643  ;;  %v2224_v45 = vpop.f32.mrb[16].mxu0  ;;  %v4141_v9 = vpack.c.bf16 %v4642_v24, %v4638_v42 }
 0x37a   :  { %v2226_v29 = vpop.f32.mrb[17].mxu0  ;;  %v4139_v3 = vpack.c.bf16 %v4644_v58, %v4640_v51  ;;  %4653 = vtanh.f32 %v2224_v45 }
 0x37b   :  { %4655 = vtanh.f32 %v2226_v29 }
 0x37c   :  { %4140 = vmatprep.subr.bf16.mxu0 %v4139_v3  ;;  %v4646_v19 = vpop.eup %4645 }
 0x37d   :  { %v2230_v48 = vpop.f32.mrb[18].mxu0  ;;  %4142 = vmatpush1.bf16.xpose.msra.mxu0 %v4141_v9  ;;  %v4648_v5 = vpop.eup %4647 }
 0x37e   :  { %4657 = vtanh.f32 %v2230_v48  ;;  %v2232_v43 = vpop.f32.mrb[19].mxu0 }
 0x37f   :  { %4659 = vtanh.f32 %v2232_v43 }
 0x380   :  { %v4650_v44 = vpop.eup %4649 }
 0x381   :  { %v4652_v52 = vpop.eup %4651  ;;  %v2236_v40 = vpop.f32.mrb[20].mxu0  ;;  %v4145_v34 = vpack.c.bf16 %v4650_v44, %v4646_v19 }
 0x382   :  { %v2238_v35 = vpop.f32.mrb[21].mxu0  ;;  %v4143_v8 = vpack.c.bf16 %v4652_v52, %v4648_v5  ;;  %4661 = vtanh.f32 %v2236_v40 }
 0x383   :  { %4663 = vtanh.f32 %v2238_v35 }
 0x384   :  { %4144 = vmatprep.subr.bf16.mxu0 %v4143_v8  ;;  %v4654_v21 = vpop.eup %4653 }
 0x385   :  { %v2242_v36 = vpop.f32.mrb[22].mxu0  ;;  %4146 = vmatpush1.bf16.xpose.msra.mxu0 %v4145_v34  ;;  %v4656_v17 = vpop.eup %4655 }
 0x386   :  { %4665 = vtanh.f32 %v2242_v36  ;;  %v2244_v33 = vpop.f32.mrb[23].mxu0 }
 0x387   :  { %4667 = vtanh.f32 %v2244_v33 }
 0x388   :  { %v4658_v31 = vpop.eup %4657 }
 0x389   :  { %v4660_v14 = vpop.eup %4659  ;;  %v2248_v20 = vpop.f32.mrb[24].mxu0  ;;  %v4149_v32 = vpack.c.bf16 %v4658_v31, %v4654_v21 }
 0x38a   :  { %v2250_v38 = vpop.f32.mrb[25].mxu0  ;;  %v4147_v7 = vpack.c.bf16 %v4660_v14, %v4656_v17  ;;  %4669 = vtanh.f32 %v2248_v20 }
 0x38b   :  { %4671 = vtanh.f32 %v2250_v38 }
 0x38c   :  { %4148 = vmatprep.subr.bf16.mxu0 %v4147_v7  ;;  %v4662_v41 = vpop.eup %4661 }
 0x38d   :  { %v2254_v26 = vpop.f32.mrb[26].mxu0  ;;  %4150 = vmatpush1.bf16.xpose.msra.mxu0 %v4149_v32  ;;  %v4664_v27 = vpop.eup %4663 }
 0x38e   :  { %4673 = vtanh.f32 %v2254_v26  ;;  %v2256_v37 = vpop.f32.mrb[27].mxu0 }
 0x38f   :  { %4675 = vtanh.f32 %v2256_v37 }
 0x390   :  { %v4666_v59 = vpop.eup %4665 }
 0x391   :  { %v4668_v28 = vpop.eup %4667  ;;  %v2260_v39 = vpop.f32.mrb[28].mxu0  ;;  %v4153_v42 = vpack.c.bf16 %v4666_v59, %v4662_v41 }
 0x392   :  { %v2262_v0 = vpop.f32.mrb[29].mxu0  ;;  %v4151_v2 = vpack.c.bf16 %v4668_v28, %v4664_v27  ;;  %4677 = vtanh.f32 %v2260_v39 }
 0x393   :  { %4679 = vtanh.f32 %v2262_v0 }
 0x394   :  { %4152 = vmatprep.subr.bf16.mxu0 %v4151_v2  ;;  %v4670_v51 = vpop.eup %4669 }
 0x395   :  { %v2266_v56 = vpop.f32.mrb[30].mxu0  ;;  %4154 = vmatpush1.bf16.xpose.msra.mxu0 %v4153_v42  ;;  %v4672_v58 = vpop.eup %4671 }
 0x396   :  { %4681 = vtanh.f32 %v2266_v56  ;;  %v2268_v24 = vpop.f32.mrb[31].mxu0 }
 0x397   :  { %4683 = vtanh.f32 %v2268_v24 }
 0x398   :  { %v4674_v45 = vpop.eup %4673 }
 0x399   :  { %v4676_v9 = vpop.eup %4675  ;;  %v2272_v29 = vpop.f32.mrb[32].mxu0  ;;  %v4157_v3 = vpack.c.bf16 %v4674_v45, %v4670_v51 }
 0x39a   :  { %v2274_v48 = vpop.f32.mrb[33].mxu0  ;;  %v4155_v19 = vpack.c.bf16 %v4676_v9, %v4672_v58  ;;  %4685 = vtanh.f32 %v2272_v29 }
 0x39b   :  { %4687 = vtanh.f32 %v2274_v48 }
 0x39c   :  { %4156 = vmatprep.subr.bf16.mxu0 %v4155_v19  ;;  %v4678_v5 = vpop.eup %4677 }
 0x39d   :  { %v2278_v43 = vpop.f32.mrb[34].mxu0  ;;  %4158 = vmatpush1.bf16.xpose.msra.mxu0 %v4157_v3  ;;  %v4680_v52 = vpop.eup %4679 }
 0x39e   :  { %4689 = vtanh.f32 %v2278_v43  ;;  %v2280_v44 = vpop.f32.mrb[35].mxu0 }
 0x39f   :  { %4691 = vtanh.f32 %v2280_v44 }
 0x3a0   :  { %v4682_v40 = vpop.eup %4681 }
 0x3a1   :  { %v4684_v34 = vpop.eup %4683  ;;  %v2284_v35 = vpop.f32.mrb[36].mxu0  ;;  %v4161_v36 = vpack.c.bf16 %v4682_v40, %v4678_v5 }
 0x3a2   :  { %v2702_v8 = vpop.f32.mrb[20].mxu1  ;;  %4693 = vtanh.f32 %v2284_v35  ;;  %v2286_v21 = vpop.f32.mrb[37].mxu0  ;;  %v4159_v17 = vpack.c.bf16 %v4684_v34, %v4680_v52 }
 0x3a3   :  { %v2704_v33 = vpop.f32.mrb[21].mxu1  ;;  %4695 = vtanh.f32 %v2702_v8 }
 0x3a4   :  { %4697 = vtanh.f32 %v2286_v21  ;;  %4160 = vmatprep.subr.bf16.mxu0 %v4159_v17  ;;  %v4686_v20 = vpop.eup %4685 }
 0x3a5   :  { %4699 = vtanh.f32 %v2704_v33  ;;  %v2290_v31 = vpop.f32.mrb[38].mxu0  ;;  %v2708_v14 = vpop.f32.mrb[22].mxu1  ;;  %4162 = vmatpush1.bf16.xpose.msra.mxu0 %v4161_v36 }
 0x3a6   :  { %4701 = vtanh.f32 %v2290_v31  ;;  %v2292_v32 = vpop.f32.mrb[39].mxu0  ;;  %v2710_v38 = vpop.f32.mrb[23].mxu1 }
 0x3a7   :  { %v4688_v7 = vpop.eup %4687  ;;  %4703 = vtanh.f32 %v2708_v14 }
 0x3a8   :  { %v4690_v26 = vpop.eup %4689  ;;  %4705 = vtanh.f32 %v2292_v32 }
 0x3a9   :  { %v4692_v41 = vpop.eup %4691  ;;  %4707 = vtanh.f32 %v2710_v38  ;;  %v2296_v37 = vpop.f32.mrb[40].mxu0  ;;  %v4165_v59 = vpack.c.bf16 %v4690_v26, %v4686_v20 }
 0x3aa   :  { %v2714_v27 = vpop.f32.mrb[24].mxu1  ;;  %4709 = vtanh.f32 %v2296_v37  ;;  %v2298_v28 = vpop.f32.mrb[41].mxu0  ;;  %v4163_v42 = vpack.c.bf16 %v4692_v41, %v4688_v7 }
 0x3ab   :  { %v2716_v39 = vpop.f32.mrb[25].mxu1  ;;  %4711 = vtanh.f32 %v2714_v27 }
 0x3ac   :  { %v4694_v0 = vpop.eup %4693  ;;  %4713 = vtanh.f32 %v2298_v28  ;;  %4164 = vmatprep.subr.bf16.mxu0 %v4163_v42 }
 0x3ad   :  { %v6283_v2 = vpop.eup %4695  ;;  %4715 = vtanh.f32 %v2716_v39  ;;  %v2302_v56 = vpop.f32.mrb[42].mxu0  ;;  %4166 = vmatpush1.bf16.xpose.msra.mxu0 %v4165_v59 }
 0x3ae   :  { %v2720_v51 = vpop.f32.mrb[26].mxu1  ;;  %v4698_v24 = vpop.eup %4697  ;;  %4717 = vtanh.f32 %v2302_v56 }
 0x3af   :  { %v2304_v58 = vpop.f32.mrb[43].mxu0  ;;  %v2722_v45 = vpop.f32.mrb[27].mxu1  ;;  %4719 = vtanh.f32 %v2720_v51 }
 0x3b0   :  { %v6285_v9 = vpop.eup %4699  ;;  %4721 = vtanh.f32 %v2304_v58 }
 0x3b1   :  { %v4702_v29 = vpop.eup %4701  ;;  %4723 = vtanh.f32 %v2722_v45  ;;  %v2308_v48 = vpop.f32.mrb[44].mxu0 }
 0x3b2   :  { %v6287_v3 = vpop.eup %4703  ;;  %v2726_v19 = vpop.f32.mrb[28].mxu1  ;;  %v4169_v43 = vpack.c.bf16 %v4702_v29, %v4694_v0  ;;  %4725 = vtanh.f32 %v2308_v48 }
 0x3b3   :  { %v4706_v5 = vpop.eup %4705  ;;  %v2310_v44 = vpop.f32.mrb[45].mxu0  ;;  %v4201_v40 = vpack.c.bf16 %v6287_v3, %v6283_v2  ;;  %4727 = vtanh.f32 %v2726_v19 }
 0x3b4   :  { %v2728_v52 = vpop.f32.mrb[29].mxu1  ;;  %v6291_v34 = vpop.eup %4707  ;;  %v4167_v35 = vpack.c.bf16 %v4706_v5, %v4698_v24  ;;  %4729 = vtanh.f32 %v2310_v44 }
 0x3b5   :  { %v4710_v8 = vpop.eup %4709  ;;  %v4199_v36 = vpack.c.bf16 %v6291_v34, %v6285_v9  ;;  %4731 = vtanh.f32 %v2728_v52  ;;  %v2314_v33 = vpop.f32.mrb[46].mxu0 }
 0x3b6   :  { %v6295_v21 = vpop.eup %4711  ;;  %4168 = vmatprep.subr.bf16.mxu0 %v4167_v35  ;;  %v2732_v17 = vpop.f32.mrb[30].mxu1  ;;  %4733 = vtanh.f32 %v2314_v33 }
 0x3b7   :  { %v4714_v31 = vpop.eup %4713  ;;  %4170 = vmatpush1.bf16.xpose.msra.mxu0 %v4169_v43  ;;  %v2316_v14 = vpop.f32.mrb[47].mxu0  ;;  %4735 = vtanh.f32 %v2732_v17 }
 0x3b8   :  { %v2734_v20 = vpop.f32.mrb[31].mxu1  ;;  %v6297_v32 = vpop.eup %4715  ;;  %4737 = vtanh.f32 %v2316_v14 }
 0x3b9   :  { %v4718_v38 = vpop.eup %4717  ;;  %4739 = vtanh.f32 %v2734_v20  ;;  %v2320_v26 = vpop.f32.mrb[48].mxu0 }
 0x3ba   :  { %v6299_v7 = vpop.eup %4719  ;;  %v2738_v41 = vpop.f32.mrb[32].mxu1  ;;  %v4173_v37 = vpack.c.bf16 %v4718_v38, %v4710_v8  ;;  %4741 = vtanh.f32 %v2320_v26 }
 0x3bb   :  { %v4722_v27 = vpop.eup %4721  ;;  %v2322_v59 = vpop.f32.mrb[49].mxu0  ;;  %v4205_v39 = vpack.c.bf16 %v6299_v7, %v6295_v21  ;;  %4743 = vtanh.f32 %v2738_v41 }
 0x3bc   :  { %v2740_v28 = vpop.f32.mrb[33].mxu1  ;;  %v6303_v42 = vpop.eup %4723  ;;  %v4171_v0 = vpack.c.bf16 %v4722_v27, %v4714_v31  ;;  %4745 = vtanh.f32 %v2322_v59 }
 0x3bd   :  { %v4726_v56 = vpop.eup %4725  ;;  %v4203_v51 = vpack.c.bf16 %v6303_v42, %v6297_v32  ;;  %4747 = vtanh.f32 %v2740_v28  ;;  %v2326_v58 = vpop.f32.mrb[50].mxu0 }
 0x3be   :  { %v6307_v24 = vpop.eup %4727  ;;  %4172 = vmatprep.subr.bf16.mxu0 %v4171_v0  ;;  %v2744_v45 = vpop.f32.mrb[34].mxu1  ;;  %4749 = vtanh.f32 %v2326_v58 }
 0x3bf   :  { %v4730_v29 = vpop.eup %4729  ;;  %4174 = vmatpush1.bf16.xpose.msra.mxu0 %v4173_v37  ;;  %v2328_v48 = vpop.f32.mrb[51].mxu0  ;;  %4751 = vtanh.f32 %v2744_v45 }
 0x3c0   :  { %v2746_v19 = vpop.f32.mrb[35].mxu1  ;;  %v6309_v43 = vpop.eup %4731  ;;  %4753 = vtanh.f32 %v2328_v48 }
 0x3c1   :  { %v4734_v5 = vpop.eup %4733  ;;  %4755 = vtanh.f32 %v2746_v19  ;;  %v2332_v52 = vpop.f32.mrb[52].mxu0 }
 0x3c2   :  { %v6311_v44 = vpop.eup %4735  ;;  %v2750_v35 = vpop.f32.mrb[36].mxu1  ;;  %v4177_v8 = vpack.c.bf16 %v4734_v5, %v4726_v56  ;;  %v4353_v17 = vadd.f32 %v2332_v52, %v5999_v13 }
 0x3c3   :  { %v4738_v33 = vpop.eup %4737  ;;  %4757 = vtanh.f32 %v2750_v35  ;;  %v2334_v31 = vpop.f32.mrb[53].mxu0  ;;  %v4209_v20 = vpack.c.bf16 %v6311_v44, %v6307_v24 }
 0x3c4   :  { %v2752_v14 = vpop.f32.mrb[37].mxu1  ;;  %v6316_v38 = vpop.eup %4739  ;;  %v4354_v26 = vadd.f32 %v2334_v31, %v6003_v6  ;;  %v4175_v41 = vpack.c.bf16 %v4738_v33, %v4730_v29 }
 0x3c5   :  { %4759 = vtanh.f32 %v2752_v14  ;;  %v4742_v37 = vpop.eup %4741  ;;  %v4207_v27 = vpack.c.bf16 %v6316_v38, %v6309_v43  ;;  %v2338_v13 = vpop.f32.mrb[54].mxu0 }
 0x3c6   :  { %4761 = vtanh.f32 %v4353_v17  ;;  %v6321_v59 = vpop.eup %4743  ;;  %4176 = vmatprep.subr.bf16.mxu0 %v4175_v41  ;;  %v2756_v28 = vpop.f32.mrb[38].mxu1  ;;  %v4355_v56 = vadd.f32 %v2338_v13, %v6011_v60 }
 0x3c7   :  { %4763 = vtanh.f32 %v4354_v26  ;;  %v4746_v0 = vpop.eup %4745  ;;  %4178 = vmatpush1.bf16.xpose.msra.mxu0 %v4177_v8  ;;  %v2340_v58 = vpop.f32.mrb[55].mxu0 }
 0x3c8   :  { %4765 = vtanh.f32 %v2756_v28  ;;  %v2758_v6 = vpop.f32.mrb[39].mxu1  ;;  %v6324_v45 = vpop.eup %4747  ;;  %v4356_v29 = vadd.f32 %v2340_v58, %v6015_v18 }
 0x3c9   :  { %4767 = vtanh.f32 %v2758_v6  ;;  %v4750_v48 = vpop.eup %4749  ;;  %v2344_v5 = vpop.f32.mrb[56].mxu0 }
 0x3ca   :  { %4769 = vtanh.f32 %v4355_v56  ;;  %v6327_v19 = vpop.eup %4751  ;;  %v2762_v52 = vpop.f32.mrb[40].mxu1  ;;  %v4181_v35 = vpack.c.bf16 %v4750_v48, %v4742_v37  ;;  %v4357_v60 = vadd.f32 %v2344_v5, %v6023_v47 }
 0x3cb   :  { %4771 = vtanh.f32 %v4356_v29  ;;  %v4754_v33 = vpop.eup %4753  ;;  %v2346_v8 = vpop.f32.mrb[57].mxu0  ;;  %v4213_v31 = vpack.c.bf16 %v6327_v19, %v6321_v59 }
 0x3cc   :  { %4773 = vtanh.f32 %v2762_v52  ;;  %v2764_v17 = vpop.f32.mrb[41].mxu1  ;;  %v6332_v14 = vpop.eup %4755  ;;  %v4358_v18 = vadd.f32 %v2346_v8, %v6027_v55  ;;  %v4179_v26 = vpack.c.bf16 %v4754_v33, %v4746_v0 }
 0x3cd   :  { %4775 = vtanh.f32 %v2764_v17  ;;  %v6335_v41 = vpop.eup %4757  ;;  %v4211_v37 = vpack.c.bf16 %v6332_v14, %v6324_v45  ;;  %v2350_v47 = vpop.f32.mrb[58].mxu0 }
 0x3ce   :  { %4777 = vtanh.f32 %v4357_v60  ;;  %4180 = vmatprep.subr.bf16.mxu0 %v4179_v26  ;;  %v2768_v28 = vpop.f32.mrb[42].mxu1  ;;  %v4359_v58 = vadd.f32 %v2350_v47, %v6035_v10  ;;  %v2352_v55 = vpop.f32.mrb[59].mxu0 }
 0x3cf   :  { %v6339_v13 = vpop.eup %4759  ;;  %4779 = vtanh.f32 %v4358_v18  ;;  %4182 = vmatpush1.bf16.xpose.msra.mxu0 %v4181_v35  ;;  %v2770_v6 = vpop.f32.mrb[43].mxu1  ;;  %v4360_v29 = vadd.f32 %v2352_v55, %v6039_v61 }
 0x3d0   :  { %v4762_v56 = vpop.eup %4761  ;;  %4781 = vtanh.f32 %v2768_v28 }
 0x3d1   :  { %v4764_v0 = vpop.eup %4763  ;;  %4783 = vtanh.f32 %v2770_v6  ;;  %v2356_v52 = vpop.f32.mrb[60].mxu0 }
 0x3d2   :  { %v6343_v48 = vpop.eup %4765  ;;  %4785 = vtanh.f32 %v4359_v58  ;;  %v2774_v33 = vpop.f32.mrb[44].mxu1  ;;  %v4361_v35 = vadd.f32 %v2356_v52, %v6047_v63 }
 0x3d3   :  { %v6345_v5 = vpop.eup %4767  ;;  %4787 = vtanh.f32 %v4360_v29  ;;  %v2358_v8 = vpop.f32.mrb[61].mxu0  ;;  %v6962_v59 = vpack.c.bf16 %v6343_v48, %v6335_v41 }
 0x3d4   :  { %v4770_v10 = vpop.eup %4769  ;;  %4789 = vtanh.f32 %v2774_v33  ;;  %v2776_v17 = vpop.f32.mrb[45].mxu1  ;;  %v4362_v26 = vadd.f32 %v2358_v8, %v6051_v62  ;;  %v6961_v14 = vpack.c.bf16 %v6345_v5, %v6339_v13 }
 0x3d5   :  { %v4772_v18 = vpop.eup %4771  ;;  %4791 = vtanh.f32 %v2776_v17  ;;  %v4185_v47 = vpack.c.bf16 %v4770_v10, %v4762_v56  ;;  %v2362_v6 = vpop.f32.mrb[62].mxu0 }
 0x3d6   :  { %v6353_v28 = vpop.eup %4773  ;;  %4793 = vtanh.f32 %v4361_v35  ;;  %v4183_v58 = vpack.c.bf16 %v4772_v18, %v4764_v0  ;;  %v2780_v63 = vpop.f32.mrb[46].mxu1  ;;  %v4363_v52 = vadd.f32 %v2362_v6, %v6059_v1 }
 0x3d7   :  { %v6355_v55 = vpop.eup %4775  ;;  %4795 = vtanh.f32 %v4362_v26  ;;  %v2364_v33 = vpop.f32.mrb[63].mxu0 }
 0x3d8   :  { %v4778_v29 = vpop.eup %4777  ;;  %4797 = vtanh.f32 %v2780_v63  ;;  %v2782_v60 = vpop.f32.mrb[47].mxu1  ;;  %4184 = vmatprep.subr.bf16.mxu0 %v4183_v58  ;;  %v4364_v62 = vadd.f32 %v2364_v33, %v6063_v30 }
 0x3d9   :  { %v4780_v61 = vpop.eup %4779  ;;  %4799 = vtanh.f32 %v2782_v60  ;;  %4186 = vmatpush1.bf16.xpose.msra.mxu0 %v4185_v47  ;;  %v2368_v10 = vpop.f32.mrb[64].mxu0 }
 0x3da   :  { %v6359_v56 = vpop.eup %4781  ;;  %4801 = vtanh.f32 %v4363_v52  ;;  %v2786_v35 = vpop.f32.mrb[48].mxu1  ;;  %v4365_v17 = vadd.f32 %v2368_v10, %v6071_v4 }
 0x3db   :  { %v6361_v0 = vpop.eup %4783  ;;  %4803 = vtanh.f32 %v4364_v62  ;;  %v2370_v18 = vpop.f32.mrb[65].mxu0  ;;  %v6964_v41 = vpack.c.bf16 %v6359_v56, %v6353_v28 }
 0x3dc   :  { %v4786_v8 = vpop.eup %4785  ;;  %4805 = vtanh.f32 %v2786_v35  ;;  %v2788_v26 = vpop.f32.mrb[49].mxu1  ;;  %v4366_v47 = vadd.f32 %v2370_v18, %v6075_v23 }
 0x3dd   :  { %v4788_v60 = vpop.eup %4787  ;;  %4807 = vtanh.f32 %v2788_v26  ;;  %v4189_v58 = vpack.c.bf16 %v4786_v8, %v4778_v29  ;;  %v2374_v33 = vpop.f32.mrb[66].mxu0 }
 0x3de   :  { %v6369_v6 = vpop.eup %4789  ;;  %4809 = vtanh.f32 %v4365_v17  ;;  %v4187_v63 = vpack.c.bf16 %v4788_v60, %v4780_v61  ;;  %v2792_v4 = vpop.f32.mrb[50].mxu1  ;;  %v4367_v10 = vadd.f32 %v2374_v33, %v6083_v50 }
 0x3df   :  { %v6371_v52 = vpop.eup %4791  ;;  %4811 = vtanh.f32 %v4366_v47  ;;  %v2376_v35 = vpop.f32.mrb[67].mxu0 }
 0x3e0   :  { %v4794_v62 = vpop.eup %4793  ;;  %4813 = vtanh.f32 %v2792_v4  ;;  %v2794_v1 = vpop.f32.mrb[51].mxu1  ;;  %4188 = vmatprep.subr.bf16.mxu0 %v4187_v63  ;;  %v4368_v23 = vadd.f32 %v2376_v35, %v6087_v11 }
 0x3e1   :  { %v4796_v30 = vpop.eup %4795  ;;  %4815 = vtanh.f32 %v2794_v1  ;;  %4190 = vmatpush1.bf16.xpose.msra.mxu0 %v4189_v58  ;;  %v2798_v8 = vpop.f32.mrb[52].mxu1 }
 0x3e2   :  { %v6375_v29 = vpop.eup %4797  ;;  %4817 = vtanh.f32 %v4367_v10  ;;  %v2800_v18 = vpop.f32.mrb[53].mxu1 }
 0x3e3   :  { %v6377_v61 = vpop.eup %4799  ;;  %4819 = vtanh.f32 %v4368_v23 }
 0x3e4   :  { %v4802_v50 = vpop.eup %4801  ;;  %4821 = vtanh.f32 %v2798_v8 }
 0x3e5   :  { %v4804_v60 = vpop.eup %4803  ;;  %v4193_v47 = vpack.c.bf16 %v4802_v50, %v4794_v62  ;;  %4823 = vtanh.f32 %v2800_v18  ;;  %v2804_v63 = vpop.f32.mrb[54].mxu1 }
 0x3e6   :  { %v6383_v11 = vpop.eup %4805  ;;  %v4191_v1 = vpack.c.bf16 %v4804_v60, %v4796_v30  ;;  %4825 = vtanh.f32 %v2804_v63  ;;  %v2806_v4 = vpop.f32.mrb[55].mxu1 }
 0x3e7   :  { %v6385_v58 = vpop.eup %4807  ;;  %4827 = vtanh.f32 %v2806_v4 }
 0x3e8   :  { %v4810_v33 = vpop.eup %4809  ;;  %4192 = vmatprep.subr.bf16.mxu0 %v4191_v1 }
 0x3e9   :  { %v4812_v10 = vpop.eup %4811  ;;  %4194 = vmatpush1.bf16.xpose.msra.mxu0 %v4193_v47  ;;  %v2810_v62 = vpop.f32.mrb[56].mxu1 }
 0x3ea   :  { %v6387_v35 = vpop.eup %4813  ;;  %v2812_v50 = vpop.f32.mrb[57].mxu1  ;;  %4829 = vtanh.f32 %v2810_v62 }
 0x3eb   :  { %v6389_v23 = vpop.eup %4815  ;;  %4831 = vtanh.f32 %v2812_v50 }
 0x3ec   :  { %v4818_v30 = vpop.eup %4817  ;;  %v4227_v18 = vpack.c.bf16 %v6389_v23, %v6385_v58  ;;  %v6991_v58 = vld [vmem:[#allocation35_spill] sm:$0xff]  ;;  %v6995_v23 = vld [vmem:[#allocation22_spill] sm:$0xff] }
 0x3ed   :  { %v4820_v60 = vpop.eup %4819  ;;  %v4197_v63 = vpack.c.bf16 %v4818_v30, %v4810_v33  ;;  %v2816_v4 = vpop.f32.mrb[58].mxu1  ;;  %v6959_v30 = vsub.s32 0, %v5135_v12  ;;  %vm6992_vm10 = vnez %v6991_v58  ;;  %v7050_v58 = vld [vmem:[#allocation43_spill] sm:$0xff] }
 0x3ee   :  { %v4195_v1 = vpack.c.bf16 %v4820_v60, %v4812_v10  ;;  %v6395_v47 = vpop.eup %4821  ;;  %4833 = vtanh.f32 %v2816_v4  ;;  %v2818_v17 = vpop.f32.mrb[59].mxu1 }
 0x3ef   :  { %v6397_v26 = vpop.eup %4823  ;;  %4835 = vtanh.f32 %v2818_v17  ;;  %v3026_v50 = vrot.slane %v6278_v46, %v6959_v30 }
 0x3f0   :  { %4196 = vmatprep.subr.bf16.mxu0 %v4195_v1  ;;  %v6399_v8 = vpop.eup %4825 }
 0x3f1   :  { %4198 = vmatpush1.bf16.xpose.msra.mxu0 %v4197_v63  ;;  %v6404_v33 = vpop.eup %4827  ;;  %v2822_v10 = vpop.f32.mrb[60].mxu1  ;;  %v4233_v62 = vpack.c.bf16 %v6399_v8, %v6395_v47  ;;  %v6960_v63 = vsub.s32 3, %v5135_v12  ;;  %v6997_v8 = vld [vmem:[#allocation21_spill] sm:$0xff]  ;;  %v7002_v47 = vld [vmem:[#allocation44_spill] sm:$0xff] }
 0x3f2   :  { %4200 = vmatprep.subr.bf16.mxu0 %v4199_v36  ;;  %v2824_v60 = vpop.f32.mrb[61].mxu1  ;;  %v4231_v17 = vpack.c.bf16 %v6404_v33, %v6397_v26  ;;  %4837 = vtanh.f32 %v2822_v10  ;;  %v5016_v26 = vmov 1.0|1.0   ;;  %vm6998_vm1 = vnez %v6997_v8  ;;  %v7004_v33 = vld [vmem:[#allocation24_spill] sm:$0xff]  ;;  %v7052_v8 = vld [vmem:[#allocation57_spill] sm:$0xff] }
 0x3f3   :  { %v3038_v1 = vrot.slane %v6278_v46, %v6960_v63  ;;  %4839 = vtanh.f32 %v2824_v60  ;;  %4264 = vmatprep.subr.msk.bf16.mxu1 %vm4263_vm2, %v5016_v26  ;;  %vm7003_vm4 = vnez %v7002_v47 }
 0x3f4   :  { %v6416_v34 = vpop.eup %4829  ;;  %4266 = vmatpush3.bf16.msk.msra.mxu1 %vm6970_vm0, %v5016_v26 }
 0x3f5   :  { %v2828_v9 = vpop.f32.mrb[62].mxu1  ;;  %v6418_v4 = vpop.eup %4831  ;;  %4268 = vmatprep.subr.msk.bf16.mxu1 %vm4267_vm3, %v5016_v26 }
 0x3f6   :  { %4841 = vtanh.f32 %v2828_v9  ;;  %v2830_v36 = vpop.f32.mrb[63].mxu1 }
 0x3f7   :  { %4843 = vtanh.f32 %v2830_v36 }
 0x3f8   :  { %3108 = vmatmul.mubr.f32.vlgmr.msra.gmra.mrb[68].mxu0 %v3026_v50  ;;  %v6423_v30 = vpop.eup %4833  ;;  %4270 = vmatpush3.bf16.msk.msra.mxu1 %vm6974_vm14, %v5016_v26 }
 0x3f9   :  { %4202 = vmatpush1.bf16.xpose.msra.mxu0 %v4201_v40  ;;  %3178 = vmatprep.mubr.f32.mxu0 %v3038_v1  ;;  %v6428_v10 = vpop.eup %4835  ;;  %v2834_v60 = vpop.f32.mrb[64].mxu1  ;;  %v4237_v50 = vpack.c.bf16 %v6423_v30, %v6416_v34  ;;  %v7011_v34 = vld [vmem:[#allocation25_spill] sm:$0xff] }
 0x3fa   :  { %4204 = vmatprep.subr.bf16.mxu0 %v4203_v51  ;;  %v2836_v63 = vpop.f32.mrb[65].mxu1  ;;  %v4235_v9 = vpack.c.bf16 %v6428_v10, %v6418_v4  ;;  %4845 = vtanh.f32 %v2834_v60  ;;  %4272 = vmatprep.subr.msk.bf16.mxu1 %vm4271_vm9, %v5016_v26  ;;  %vm6996_vm9 = vnez %v6995_v23 }
 0x3fb   :  { %4847 = vtanh.f32 %v2836_v63  ;;  %vm6999_vm14 = vmpackc.low %vm6996_vm9, %vm6998_vm1 }
 0x3fc   :  { %v6434_v3 = vpop.eup %4837  ;;  %4274 = vmatpush3.bf16.msk.msra.mxu1 %vm6981_vm6, %v5016_v26  ;;  %vm7005_vm6 = vnez %v7004_v33  ;;  %v7054_v33 = vld [vmem:[#allocation49_spill] sm:$0xff] }
 0x3fd   :  { %v2840_v2 = vpop.f32.mrb[66].mxu1  ;;  %v6436_v1 = vpop.eup %4839  ;;  %4276 = vmatprep.subr.msk.bf16.mxu1 %vm4275_vm13, %v5016_v26 }
 0x3fe   :  { %4849 = vtanh.f32 %v2840_v2  ;;  %v2842_v40 = vpop.f32.mrb[67].mxu1 }
 0x3ff   :  { %4851 = vtanh.f32 %v2842_v40 }
 0x400   :  { %v6441_v32 = vpop.eup %4841 }
 0x401   :  { %4206 = vmatpush1.bf16.xpose.msra.mxu0 %v4205_v39  ;;  %v6446_v42 = vpop.eup %4843  ;;  %v2846_v51 = vpop.f32.mrb[68].mxu1  ;;  %v4241_v36 = vpack.c.bf16 %v6441_v32, %v6434_v3  ;;  %v7014_v3 = vld [vmem:[#allocation47_spill] sm:$0xff]  ;;  %v7018_v32 = vld [vmem:[#allocation28_spill] sm:$0xff] }
 0x402   :  { %4208 = vmatprep.subr.bf16.mxu0 %v4207_v27  ;;  %v2848_v60 = vpop.f32.mrb[69].mxu1  ;;  %v4239_v63 = vpack.c.bf16 %v6446_v42, %v6436_v1  ;;  %4853 = vtanh.f32 %v2846_v51  ;;  %v7016_v1 = vld [vmem:[#allocation50_spill] sm:$0xff]  ;;  %vm7019_vm9 = vnez %v7018_v32  ;;  %v7020_v42 = vld [vmem:[#allocation27_spill] sm:$0xff] }
 0x403   :  { %4855 = vtanh.f32 %v2848_v60  ;;  %vm7021_vm1 = vnez %v7020_v42 }
 0x404   :  { %v6452_v7 = vpop.eup %4845 }
 0x405   :  { %v2852_v21 = vpop.f32.mrb[70].mxu1  ;;  %v6454_v2 = vpop.eup %4847 }
 0x406   :  { %4857 = vtanh.f32 %v2852_v21  ;;  %v2854_v39 = vpop.f32.mrb[71].mxu1 }
 0x407   :  { %4859 = vtanh.f32 %v2854_v39 }
 0x408   :  { %v6459_v43 = vpop.eup %4849 }
 0x409   :  { %4210 = vmatpush1.bf16.xpose.msra.mxu0 %v4209_v20  ;;  %v6464_v38 = vpop.eup %4851  ;;  %v2858_v27 = vpop.f32.mrb[72].mxu1 }
 0x40a   :  { %4212 = vmatprep.subr.bf16.mxu0 %v4211_v37  ;;  %v2860_v51 = vpop.f32.mrb[73].mxu1  ;;  %v4243_v60 = vpack.c.bf16 %v6464_v38, %v6454_v2  ;;  %4861 = vtanh.f32 %v2858_v27 }
 0x40b   :  { %4863 = vtanh.f32 %v2860_v51 }
 0x40c   :  { %v4854_v44 = vpop.eup %4853 }
 0x40d   :  { %v2864_v24 = vpop.f32.mrb[74].mxu1  ;;  %v4856_v21 = vpop.eup %4855 }
 0x40e   :  { %4865 = vtanh.f32 %v2864_v24  ;;  %v2866_v20 = vpop.f32.mrb[75].mxu1 }
 0x40f   :  { %4867 = vtanh.f32 %v2866_v20 }
 0x410   :  { %v4858_v45 = vpop.eup %4857 }
 0x411   :  { %4214 = vmatpush1.bf16.xpose.msra.mxu0 %v4213_v31  ;;  %v4860_v37 = vpop.eup %4859  ;;  %v2870_v39 = vpop.f32.mrb[76].mxu1  ;;  %v4249_v2 = vpack.c.bf16 %v4858_v45, %v4854_v44  ;;  %v6963_v31 = vpack.c.bf16 %v6361_v0, %v6355_v55  ;;  %v6965_v55 = vpack.c.bf16 %v6377_v61, %v6371_v52  ;;  %v6967_v52 = vpack.c.bf16 %v6387_v35, %v6383_v11  ;;  %v6988_v11 = vld [vmem:[#allocation19_spill] sm:$0xff]  ;;  %v6993_v35 = vld [vmem:[#allocation38_spill] sm:$0xff] }
 0x412   :  { %4216 = vmatprep.subr.bf16.mxu0 %v6961_v14  ;;  %v2872_v38 = vpop.f32.mrb[77].mxu1  ;;  %v4247_v27 = vpack.c.bf16 %v4860_v37, %v4856_v21  ;;  %4869 = vtanh.f32 %v2870_v39  ;;  %vm6989_vm2 = vnez %v6988_v11  ;;  %vm6994_vm15 = vnez %v6993_v35  ;;  %v7051_v35 = vld [vmem:[#allocation46_spill] sm:$0xff] }
 0x413   :  { %4871 = vtanh.f32 %v2872_v38  ;;  %vm4283_vm0 = vmpackc.low %vm6994_vm15, %vm6992_vm10  ;;  %vm7015_vm10 = vnez %v7014_v3  ;;  %vm7017_vm15 = vnez %v7016_v1  ;;  %v4331_v23 = vpack.c.bf16 %v7051_v35, %v7050_v58 }
 0x414   :  { %v4862_v24 = vpop.eup %4861  ;;  %v5017_v1 = vmov 1966171168  }
 0x415   :  { %v2876_v51 = vpop.f32.mrb[78].mxu1  ;;  %v4864_v40 = vpop.eup %4863  ;;  %v3349_v32 = vunpack.c.l.s4 %v5017_v1 }
 0x416   :  { %4873 = vtanh.f32 %v2876_v51  ;;  %v2878_v20 = vpop.f32.mrb[79].mxu1 }
 0x417   :  { %4875 = vtanh.f32 %v2878_v20  ;;  %v3350_v42 = vunpack.c.0.s8 %v3349_v32 }
 0x418   :  { %v4866_v19 = vpop.eup %4865 }
 0x419   :  { %4218 = vmatpush1.bf16.xpose.msra.mxu0 %v6962_v59  ;;  %v4868_v13 = vpop.eup %4867  ;;  %v2882_v5 = vpop.f32.mrb[80].mxu1  ;;  %v4253_v44 = vpack.c.bf16 %v4866_v19, %v4862_v24  ;;  %v6966_v59 = vpack.c.bf16 %v6375_v29, %v6369_v6  ;;  %v6968_v6 = vpack.c.bf16 %v6459_v43, %v6452_v7  ;;  %v6969_v29 = vsub.s32 2, %v5135_v12 }
 0x41a   :  { %4220 = vmatprep.subr.bf16.mxu0 %v6963_v31  ;;  %v2884_v21 = vpop.f32.mrb[81].mxu1  ;;  %v4251_v45 = vpack.c.bf16 %v4868_v13, %v4864_v40  ;;  %4877 = vtanh.f32 %v2882_v5 }
 0x41b   :  { %4879 = vtanh.f32 %v2884_v21  ;;  %v3034_v61 = vrot.slane %v6278_v46, %v6969_v29  ;;  %v6986_v46 = vld [vmem:[#allocation20_spill] sm:$0xff]  ;;  %v7028_v21 = vld [vmem:[#allocation30_spill] sm:$0xff] }
 0x41c   :  { %v4870_v37 = vpop.eup %4869  ;;  %vm6987_vm12 = vnez %v6986_v46  ;;  %v7049_v46 = vld [vmem:[#allocation56_spill] sm:$0xff] }
 0x41d   :  { %v2888_v14 = vpop.f32.mrb[82].mxu1  ;;  %v4872_v38 = vpop.eup %4871  ;;  %vm6990_vm3 = vmpackc.low %vm6987_vm12, %vm6989_vm2  ;;  %vm7012_vm12 = vnez %v7011_v34  ;;  %v4328_v11 = vpack.c.bf16 %v7049_v46, %v7048_v57  ;;  %v7056_v34 = vld [vmem:[#allocation59_spill] sm:$0xff] }
 0x41e   :  { %4881 = vtanh.f32 %v2888_v14  ;;  %v2890_v39 = vpop.f32.mrb[83].mxu1  ;;  %4278 = vmatpush3.bf16.msk.msra.mxu1 %vm6990_vm3, %v5016_v26  ;;  %vm3185_vm3 = vcmask 1040384  }
 0x41f   :  { %4883 = vtanh.f32 %v2890_v39  ;;  %4280 = vmatprep.subr.msk.bf16.mxu1 %vm4279_vm11, %v5016_v26  ;;  %v7030_v39 = vld [vmem:[#allocation63_spill] sm:$0xff] }
 0x420   :  { %v4874_v48 = vpop.eup %4873 }
 0x421   :  { %4222 = vmatpush1.bf16.xpose.msra.mxu0 %v6964_v41  ;;  %v4876_v0 = vpop.eup %4875  ;;  %v4257_v51 = vpack.c.bf16 %v4874_v48, %v4870_v37  ;;  %v7032_v48 = vld [vmem:[#allocation36_spill] sm:$0xff] }
 0x422   :  { %4224 = vmatprep.subr.bf16.mxu0 %v6965_v55  ;;  %v4255_v40 = vpack.c.bf16 %v4876_v0, %v4872_v38  ;;  %4282 = vmatpush3.bf16.msk.msra.mxu1 %vm6999_vm14, %v5016_v26  ;;  %vm7022_vm14 = vmpackc.low %vm7019_vm9, %vm7021_vm1  ;;  %v7031_v38 = vld [vmem:[#allocation64_spill] sm:$0xff]  ;;  %v7033_v55 = vld [vmem:[#allocation39_spill] sm:$0xff] }
 0x423   :  { %4284 = vmatprep.subr.msk.bf16.mxu1 %vm4283_vm0, %v5016_v26  ;;  %vm4291_vm0 = vmpackc.low %vm7017_vm15, %vm7015_vm10  ;;  %v4301_v41 = vpack.c.bf16 %v7031_v38, %v7030_v39  ;;  %v4304_v0 = vpack.c.bf16 %v7033_v55, %v7032_v48 }
 0x424   :  { %v4878_v24 = vpop.eup %4877 }
 0x425   :  { %v4880_v20 = vpop.eup %4879 }
 0x428   :  { %v4882_v19 = vpop.eup %4881 }
 0x429   :  { %4226 = vmatpush1.bf16.xpose.msra.mxu0 %v6966_v59  ;;  %v4884_v28 = vpop.eup %4883  ;;  %v4261_v56 = vpack.c.bf16 %v4882_v19, %v4878_v24  ;;  %v7037_v59 = vld [vmem:[#allocation45_spill] sm:$0xff] }
 0x42a   :  { %4228 = vmatprep.subr.bf16.mxu0 %v4227_v18  ;;  %v4259_v31 = vpack.c.bf16 %v4884_v28, %v4880_v20  ;;  %v7000_v18 = vld [vmem:[#allocation41_spill] sm:$0xff]  ;;  %v7036_v20 = vld [vmem:[#allocation42_spill] sm:$0xff]  ;;  %v7038_v28 = vld [vmem:[#allocation68_spill] sm:$0xff] }
 0x42b   :  { %vm7001_vm13 = vnez %v7000_v18  ;;  %v4310_v19 = vpack.c.bf16 %v7037_v59, %v7036_v20  ;;  %v7053_v18 = vld [vmem:[#allocation58_spill] sm:$0xff] }
 0x42c   :  { %vm4287_vm5 = vmpackc.low %vm7003_vm4, %vm7001_vm13  ;;  %vm7025_vm13 = vcmask 130048   ;;  %v4334_v47 = vpack.c.bf16 %v7053_v18, %v7052_v8 }
 0x42d   :  { %vm6597_vm4 = vmpackc.low %vm7025_vm13, %vm7025_vm13 }
 0x431   :  { %4230 = vmatpush1.bf16.xpose.msra.mxu0 %v6967_v52  ;;  %v7040_v52 = vld [vmem:[#allocation48_spill] sm:$0xff] }
 0x432   :  { %4232 = vmatprep.subr.bf16.mxu0 %v4231_v17  ;;  %v7009_v17 = vld [vmem:[#allocation26_spill] sm:$0xff] }
 0x433   :  { %vm7010_vm11 = vnez %v7009_v17 }
 0x434   :  { %vm7013_vm2 = vmpackc.low %vm7010_vm11, %vm7012_vm12 }
 0x439   :  { %4234 = vmatpush1.bf16.xpose.msra.mxu0 %v4233_v62  ;;  %v7006_v62 = vld [vmem:[#allocation23_spill] sm:$0xff] }
 0x43a   :  { %4236 = vmatprep.subr.bf16.mxu0 %v4235_v9  ;;  %vm7007_vm8 = vnez %v7006_v62  ;;  %v7055_v62 = vld [vmem:[#allocation52_spill] sm:$0xff] }
 0x43b   :  { %vm7008_vm7 = vmpackc.low %vm7005_vm6, %vm7007_vm8  ;;  %v4337_v17 = vpack.c.bf16 %v7055_v62, %v7054_v33 }
 0x43c   :  { %4286 = vmatpush3.bf16.msk.msra.mxu1 %vm7008_vm7, %v5016_v26 }
 0x43d   :  { %4288 = vmatprep.subr.msk.bf16.mxu1 %vm4287_vm5, %v5016_v26  ;;  %vm7058_vm5 = vmmov %vm7025_vm13 }
 0x43e   :  { %vm7059_vm6 = vmmov %vm7058_vm5 }
 0x440   :  { %4290 = vmatpush3.bf16.msk.msra.mxu1 %vm7013_vm2, %v5016_v26 }
 0x441   :  { %4238 = vmatpush1.bf16.xpose.msra.mxu0 %v4237_v50  ;;  %4292 = vmatprep.subr.msk.bf16.mxu1 %vm4291_vm0, %v5016_v26 }
 0x442   :  { %4240 = vmatprep.subr.bf16.mxu0 %v4239_v63  ;;  %v7024_v63 = vld [vmem:[#allocation62_spill] sm:$0xff] }
 0x444   :  { %4294 = vmatpush3.bf16.msk.msra.mxu1 %vm7022_vm14, %v5016_v26  ;;  %v7043_v26 = vld [vmem:[#allocation34_spill] sm:$0xff] }
 0x449   :  { %4242 = vmatpush1.bf16.xpose.msra.mxu0 %v4241_v36  ;;  %v7023_v36 = vld [vmem:[#allocation61_spill] sm:$0xff] }
 0x44a   :  { %4244 = vmatprep.subr.bf16.mxu0 %v4243_v60  ;;  %v4295_v7 = vpack.c.bf16 %v7024_v63, %v7023_v36 }
 0x44c   :  { %4297 = vmatprep.subr.msk.bf16.mxu1 %vm6597_vm4, %v4295_v7 }
 0x451   :  { %4246 = vmatpush1.bf16.xpose.msra.mxu0 %v6968_v6  ;;  %v7041_v6 = vld [vmem:[#allocation51_spill] sm:$0xff] }
 0x452   :  { %4248 = vmatprep.subr.bf16.mxu0 %v4247_v27  ;;  %v4316_v29 = vpack.c.bf16 %v7041_v6, %v7040_v52 }
 0x459   :  { %4250 = vmatpush1.bf16.xpose.msra.mxu0 %v4249_v2 }
 0x45a   :  { %4252 = vmatprep.subr.bf16.mxu0 %v4251_v45  ;;  %v7029_v45 = vld [vmem:[#allocation33_spill] sm:$0xff] }
 0x45b   :  { %v4298_v14 = vpack.c.bf16 %v7029_v45, %v7028_v21 }
 0x461   :  { %4254 = vmatpush1.bf16.xpose.msra.mxu0 %v4253_v44 }
 0x462   :  { %4256 = vmatprep.subr.bf16.mxu0 %v4255_v40  ;;  %v7035_v40 = vld [vmem:[#allocation66_spill] sm:$0xff] }
 0x469   :  { %4258 = vmatpush1.bf16.xpose.msra.mxu0 %v4257_v51  ;;  %v7034_v51 = vld [vmem:[#allocation65_spill] sm:$0xff] }
 0x46a   :  { %4260 = vmatprep.subr.bf16.mxu0 %v4259_v31  ;;  %v4307_v24 = vpack.c.bf16 %v7035_v40, %v7034_v51 }
 0x471   :  { %4262 = vmatpush1.bf16.xpose.msra.mxu0 %v4261_v56  ;;  %v7039_v56 = vld [vmem:[#allocation70_spill] sm:$0xff] }
 0x472   :  { %v4313_v31 = vpack.c.bf16 %v7039_v56, %v7038_v28 }
 0x478   :  { %3179 = vmatmul.mubr.f32.vlgmr.msra.gmra.mrb[68].mxu0 %v3034_v61  ;;  %v7042_v61 = vld [vmem:[#allocation31_spill] sm:$0xff] }
 0x479   :  { %v4319_v54 = vpack.c.bf16 %v7043_v26, %v7042_v61 }
 0x54b   :  { %v3180_v4 = vpop.f32.mrb[68].mxu0 }
 0x54c   :  { %v3182_v30 = vpop.f32.mrb[69].mxu0  ;;  %v3186_v10 = vsel %vm3185_vm3, %v3180_v4, -inf }
 0x54d   :  { %v3187_v50 = vsel %vm3185_vm3, %v3182_v30, -inf }
 0x54e   :  { %v3188_v9 = vmax.f32 %v3186_v10, %v3187_v50 }
 0x550   :  { %3189 = vmax.xlane.f32.xlu0 %v3188_v9 }
 0x5dd   :  { %v3190_v60 = vpop.xlane.xlu0 %3189 }
 0x5de   :  { %v3191_v2 = vsub.f32 %v3180_v4, %v3190_v60  ;;  %v3192_v27 = vsub.f32 %v3182_v30, %v3190_v60  ;;  %v7057_v4 = vld [vmem:[#allocation60_spill] sm:$0xff] }
 0x5df   :  { %v4340_v30 = vpack.c.bf16 %v7057_v4, %v7056_v34 }
 0x5e0   :  { %v3193_v13 = vmul.f32 1.442695, %v3191_v2  ;;  %v3195_v5 = vmul.f32 1.442695, %v3192_v27  ;;  %v3353_v2 = vsub.s32 %v3350_v42, %v5135_v12 }
 0x5e2   :  { %4885 = vpow2.f32 %v3193_v13  ;;  %v7060_v13 = vlaneseq }
 0x5e3   :  { %4887 = vpow2.f32 %v3195_v5 }
 0x5e4   :  { %vm3365_vm8 = vcmp.lt.s32.totalorder %v7060_v13, 256 }
 0x5ec   :  { %v4886_v44 = vpop.eup %4885 }
 0x5ed   :  { %v4888_v37 = vpop.eup %4887 }
 0x5ee   :  { %3261 = vmatprep.mubr.f32.mxu1 %v4888_v37 }
 0x5ef   :  { %3262 = vmatmul.mubr.f32.vlgmr.msra.gmra.mrb[84].mxu1 %v4886_v44 }
 0x5f0   :  { %4300 = vmatpush3.bf16.xpose.msk.msra.mxu1 %vm6597_vm4, %v4298_v14 }
 0x5f1   :  { %4303 = vmatprep.subr.msk.bf16.mxu1 %vm6597_vm4, %v4301_v41 }
 0x5f8   :  { %4306 = vmatpush3.bf16.xpose.msk.msra.mxu1 %vm6597_vm4, %v4304_v0 }
 0x5f9   :  { %4309 = vmatprep.subr.msk.bf16.mxu1 %vm6597_vm4, %v4307_v24 }
 0x600   :  { %4312 = vmatpush3.bf16.xpose.msk.msra.mxu1 %vm6597_vm4, %v4310_v19 }
 0x601   :  { %4315 = vmatprep.subr.msk.bf16.mxu1 %vm6597_vm4, %v4313_v31 }
 0x608   :  { %4318 = vmatpush3.bf16.xpose.msk.msra.mxu1 %vm6597_vm4, %v4316_v29 }
 0x609   :  { %4321 = vmatprep.subr.msk.bf16.mxu1 %vm6597_vm4, %v4319_v54 }
 0x610   :  { %4324 = vmatpush3.bf16.xpose.msk.msra.mxu1 %vm6597_vm4, %v4322_v16 }
 0x611   :  { %4327 = vmatprep.subr.msk.bf16.mxu1 %vm6597_vm4, %v4325_v25 }
 0x618   :  { %4330 = vmatpush3.bf16.xpose.msk.msra.mxu1 %vm6597_vm4, %v4328_v11 }
 0x619   :  { %4333 = vmatprep.subr.msk.bf16.mxu1 %vm6597_vm4, %v4331_v23 }
 0x620   :  { %4336 = vmatpush3.bf16.xpose.msk.msra.mxu1 %vm6597_vm4, %v4334_v47 }
 0x621   :  { %4339 = vmatprep.subr.msk.bf16.mxu1 %vm6597_vm4, %v4337_v17 }
 0x628   :  { %4342 = vmatpush3.bf16.xpose.msk.msra.mxu1 %vm6597_vm4, %v4340_v30 }
 0x6c2   :  { %v3578_v10 = vpop.f32.mrb[84].mxu1 }
 0x6c3   :  { %v3579_v50 = vpop.f32.mrb[85].mxu1 }
 0x6c4   :  { %v3580_v9 = vadd.f32 %v3579_v50, %v3578_v10 }
 0x6c6   :  { %4889 = vrcp.f32 %v3580_v9 }
 0x6d0   :  { %v4890_v3 = vpop.eup %4889 }
 0x6d1   :  { %3613 = vmatprep.mubr.msk.f32.mxu1 %vm7058_vm5, %v4890_v3 }
 0x6d2   :  { %3614 = vmatmul.mubr.msk.f32.vlgmr.msra.gmra.mrb[86].mxu1 %vm7059_vm6, %v4890_v3 }
 0x7a5   :  { %v3338_v36 = vpop.f32.mrb[86].mxu1 }
 0x7a6   :  { %v3343_v63 = vmul.f32 %v4886_v44, %v3338_v36  ;;  %v3340_v7 = vpop.f32.mrb[87].mxu1 }
 0x7a7   :  { %v3344_v60 = vmul.f32 %v4888_v37, %v3340_v7 }
 0x7a9   :  { %v3347_v43 = vcombine.low %v3343_v63, %v3344_v60 }
 0x7ab   :  { %v3354_v27 = vrot.slane %v3347_v43, %v3353_v2 }
 0x7ad   :  { %v3361_v5 = vrot.slane %v3354_v27, %v3353_v2 }
 0x7af   :  { %3367 = vst.msk [vmem:[#allocation10] sm:$0x3] %vm3365_vm8, %v3361_v5 }
 0x7b0   :  { %4990 = shalt.err (!%p4987_p8)
}
 0x7b1   :  { %s4991_s26 = scalar_lea.hbm %s6685_s6, 32 }
 0x7b2   :  { %p4992_p9 = scmp.ne.s32.totalorder %s6685_s6, %s4991_s26  ;;  %p4995_p10 = scmp.lt.u32.totalorder %s4991_s26, %s6685_s6 }
 0x7b4   :  { %p4997_p11 = pnand %p4995_p10, %p4992_p9 }
 0x7b6   :  { %5000 = shalt.err (!%p4997_p11)
}
 0x7b7   :  { %3377 = dma.vmem_to_hbm [thread:$0]  %s3375_s21, 32, %s6685_s6, [#allocation4]  }
 0x7b8   :  { %5007 = dma.done.wait [#allocation4], 32  }
 0x7b9   :  { %5008 = vsyncadd [#allocation4], 4294967264 }
 0x7ba   :  { %3381 = vsyncpa [#allocation3], 1 }
 0x7bb   :  { %3382 = vsyncpa [#allocation6], 1 }
 0x7bc   :  { %3383 = vsyncpa [#allocation9], 1 }
 0x7bd   :  { %3384 = vsyncpa [#allocation4], 1 }

</bundles_post_ra>
